<compile_context>
chip_gen: v7x
topology: tpu7x:2x2x1
jax: 0.10.0
libtpu: 0.0.40
codegen_flags: <defaults>
</compile_context>

<pallas_src>
import numpy as np
import jax
import jax.numpy as jnp
from jax.experimental import pallas as pl
from jax.experimental.pallas import tpu as pltpu


# ------------------------------ Model constants ------------------------------

CONFIG = [8, 'M', 16, 'M', 32, 'M']       # configs['VGGs']
IN_CHANNELS = 3
IMAGE_SIZE = 32
NUM_CLASSES = 10
FINAL_MLP_HIDDEN_DIM = 64
FINAL_MLP_N_HIDDEN_LAYERS = 1
BN_EPS = 1e-5
BATCH_TILE = 16                           # grid batch tile (multiple of 8)
OUT_PAD = 128                             # logits padded 10 -> 128 (lane-dense store)

_CONV_CHANNELS = [c for c in CONFIG if c != 'M']            # [8, 16, 32]
_FEAT_HW = IMAGE_SIZE // (2 ** CONFIG.count('M'))           # 4
_FEAT_DIM = _CONV_CHANNELS[-1] * _FEAT_HW * _FEAT_HW        # 512


# ------------------------------- Fused kernel --------------------------------

def _conv_bn_relu_pool(pad_ref, H, W, Cin, Cout, w_ref, s_ref, b_ref, p_ref):
    """Conv3x3(pad=1) + BN(eval) + ReLU + MaxPool2x2 on a lane-dense (W*C) layout.

    pad_ref : (TB, H+2, W*Cin) bf16; rows 0 and H+1 are the zero H-halo.
    w_ref   : (3, W*Cin, W*Cout) bf16 banded conv weights (kw + W-padding folded in).
    s_ref/b_ref : (1, W*Cout) f32 folded BN scale / shift (tiled over w).
    p_ref   : (2, W*Cout, (W//2)*Cout) bf16 even/odd pooling selection matrices.
    returns : (TB*(H//2), (W//2)*Cout) f32 pooled activation.
    """
    TB = pad_ref.shape[0]
    rows = TB * H
    # Conv3x3: one lane-dense MXU matmul per kh row offset.
    y = jnp.dot(pad_ref[:, 0:H, :].reshape(rows, W * Cin), w_ref[0],
                preferred_element_type=jnp.float32)
    y = y + jnp.dot(pad_ref[:, 1:H + 1, :].reshape(rows, W * Cin), w_ref[1],
                    preferred_element_type=jnp.float32)
    y = y + jnp.dot(pad_ref[:, 2:H + 2, :].reshape(rows, W * Cin), w_ref[2],
                    preferred_element_type=jnp.float32)
    # Folded eval-mode BatchNorm + ReLU (f32, dense 256-lane rows).
    y = jnp.maximum(y * s_ref[...] + b_ref[...], 0.0)
    # MaxPool 2x2: H direction = max over adjacent row pairs (sublane only)...
    y = jnp.max(y.reshape(rows // 2, 2, W * Cout), axis=1)
    # ... W direction = max of even/odd column-block selections: two tiny MXU
    # matmuls with 0/1 matrices -> output already compacted & lane-dense.
    yb = y.astype(jnp.bfloat16)
    even = jnp.dot(yb, p_ref[0], preferred_element_type=jnp.float32)
    odd = jnp.dot(yb, p_ref[1], preferred_element_type=jnp.float32)
    return jnp.maximum(even, odd)                     # (TB*(H//2), (W//2)*Cout)


def vgg_fused_kernel(x_ref,
                     w1_ref, s1_ref, b1_ref, p1_ref,
                     w2_ref, s2_ref, b2_ref, p2_ref,
                     w3_ref, s3_ref, b3_ref, p3_ref,
                     wm1_ref, bm1_ref, wm2_ref, bm2_ref,
                     out_ref,
                     pad1_ref, pad2_ref, pad3_ref):
    TB = x_ref.shape[0]

    # ---- Block 1: Conv(3->8) + BN + ReLU + MaxPool, 32x32 -> 16x16 ----
    # Zero only the two H-halo rows (W padding lives in the banded weights);
    # the interior is fully overwritten every grid step.
    pad1_ref[:, 0:1, :] = jnp.zeros((TB, 1, 32 * 3), jnp.bfloat16)
    pad1_ref[:, 33:34, :] = jnp.zeros((TB, 1, 32 * 3), jnp.bfloat16)
    pad1_ref[:, 1:33, :] = x_ref[...]
    y = _conv_bn_relu_pool(pad1_ref, 32, 32, 3, 8, w1_ref, s1_ref, b1_ref, p1_ref)

    # ---- Block 2: Conv(8->16) + BN + ReLU + MaxPool, 16x16 -> 8x8 ----
    pad2_ref[:, 0:1, :] = jnp.zeros((TB, 1, 16 * 8), jnp.bfloat16)
    pad2_ref[:, 17:18, :] = jnp.zeros((TB, 1, 16 * 8), jnp.bfloat16)
    pad2_ref[:, 1:17, :] = y.reshape(TB, 16, 16 * 8).astype(jnp.bfloat16)
    y = _conv_bn_relu_pool(pad2_ref, 16, 16, 8, 16, w2_ref, s2_ref, b2_ref, p2_ref)

    # ---- Block 3: Conv(16->32) + BN + ReLU + MaxPool, 8x8 -> 4x4 ----
    pad3_ref[:, 0:1, :] = jnp.zeros((TB, 1, 8 * 16), jnp.bfloat16)
    pad3_ref[:, 9:10, :] = jnp.zeros((TB, 1, 8 * 16), jnp.bfloat16)
    pad3_ref[:, 1:9, :] = y.reshape(TB, 8, 8 * 16).astype(jnp.bfloat16)
    y = _conv_bn_relu_pool(pad3_ref, 8, 8, 16, 32, w3_ref, s3_ref, b3_ref, p3_ref)
    # y: (TB*4, 128) f32, rows = (b, h), lane = w*32 + c  ->  NHWC flatten order.

    # ---- Flatten + final MLP: Linear(512,64) -> ReLU -> Linear(64,10->128) ----
    feats = y.reshape(TB, _FEAT_DIM).astype(jnp.bfloat16)
    h = jnp.dot(feats, wm1_ref[...], preferred_element_type=jnp.float32) + bm1_ref[...]
    h = jnp.maximum(h, 0.0).astype(jnp.bfloat16)
    out_ref[...] = (jnp.dot(h, wm2_ref[...], preferred_element_type=jnp.float32)
                    + bm2_ref[...])


# ------------------------------ Parameter init -------------------------------

def init_params(key):
    params = {}
    in_c = IN_CHANNELS
    hw = IMAGE_SIZE
    for li, out_c in enumerate(_CONV_CHANNELS, start=1):
        key, k1, k2, k3, k4, k5, k6 = jax.random.split(key, 7)
        w_hwio = 0.1 * jax.random.normal(k1, (3, 3, in_c, out_c), jnp.float32)
        conv_b = 0.05 * jax.random.normal(k2, (out_c,), jnp.float32)
        gamma = 1.0 + 0.1 * jax.random.normal(k3, (out_c,), jnp.float32)
        beta = 0.05 * jax.random.normal(k4, (out_c,), jnp.float32)
        r_mean = 0.05 * jax.random.normal(k5, (out_c,), jnp.float32)
        r_var = 1.0 + 0.25 * jax.nn.sigmoid(
            jax.random.normal(k6, (out_c,), jnp.float32))
        # Fold eval-mode BatchNorm + conv bias into per-channel scale/shift.
        scale = gamma / jnp.sqrt(r_var + BN_EPS)
        shift = beta + scale * (conv_b - r_mean)

        # Banded conv weight: for each kh, a (W*Cin, W*Cout) matrix with the kw
        # offsets and the zero padding along W folded in.
        W = hw
        w_np = np.asarray(w_hwio)
        banded = np.zeros((3, W * in_c, W * out_c), np.float32)
        for kh in range(3):
            for w in range(W):
                for kw in range(3):
                    wi = w + kw - 1
                    if 0 <= wi < W:
                        banded[kh, wi * in_c:(wi + 1) * in_c,
                               w * out_c:(w + 1) * out_c] = w_np[kh, kw]
        params[f"w{li}"] = jnp.asarray(banded, jnp.bfloat16)
        # BN scale/shift tiled to the folded (w*Cout + co) lane layout (f32).
        params[f"s{li}"] = jnp.tile(scale, W).reshape(1, W * out_c)
        params[f"b{li}"] = jnp.tile(shift, W).reshape(1, W * out_c)

        # 0/1 selection matrices for the W direction of MaxPool2x2: pick the
        # even / odd column blocks and compact them to (W//2)*Cout lanes.
        Wp = W // 2
        sel = np.zeros((2, W * out_c, Wp * out_c), np.float32)
        eye = np.eye(out_c, dtype=np.float32)
        for wp in range(Wp):
            cols = slice(wp * out_c, (wp + 1) * out_c)
            sel[0, (2 * wp) * out_c:(2 * wp + 1) * out_c, cols] = eye
            sel[1, (2 * wp + 1) * out_c:(2 * wp + 2) * out_c, cols] = eye
        params[f"p{li}"] = jnp.asarray(sel, jnp.bfloat16)

        in_c = out_c
        hw //= 2

    # Final MLP: Linear(512, 64) -> ReLU -> Linear(64, 10) (classes padded to 128).
    # NOTE: wm1 rows follow the kernel's NHWC (h, w, c) flatten order.
    key, k1, k2, k3, k4 = jax.random.split(key, 5)
    params["wm1"] = (0.05 * jax.random.normal(
        k1, (_FEAT_DIM, FINAL_MLP_HIDDEN_DIM), jnp.float32)).astype(jnp.bfloat16)
    params["bm1"] = 0.05 * jax.random.normal(
        k2, (1, FINAL_MLP_HIDDEN_DIM), jnp.float32)
    wm2 = 0.05 * jax.random.normal(
        k3, (FINAL_MLP_HIDDEN_DIM, NUM_CLASSES), jnp.float32)
    bm2 = 0.05 * jax.random.normal(k4, (1, NUM_CLASSES), jnp.float32)
    params["wm2"] = jnp.zeros((FINAL_MLP_HIDDEN_DIM, OUT_PAD), jnp.bfloat16
                              ).at[:, :NUM_CLASSES].set(wm2.astype(jnp.bfloat16))
    params["bm2"] = jnp.zeros((1, OUT_PAD), jnp.float32).at[:, :NUM_CLASSES].set(bm2)
    return params


# -------------------------------- Forward pass --------------------------------

@jax.jit
def vgg_forward(params, x_nchw):
    """x_nchw: (B, 3, 32, 32) like the PyTorch module; returns (B, 10) logits."""
    B = x_nchw.shape[0]
    # NCHW -> NHWC, cast to bf16 (matmul input dtype), fold (W, C) -> lane dim.
    x = jnp.transpose(x_nchw, (0, 2, 3, 1)).astype(jnp.bfloat16)
    x = x.reshape(B, IMAGE_SIZE, IMAGE_SIZE * IN_CHANNELS)

    # Batch tiling: pipelined grid steps; "parallel" lets v7x split the batch
    # across both TensorCores.  TB multiple of 8 (or == B) keeps the (8,128)
    # BlockSpec constraint on the (TB, 128) output block.
    if B <= BATCH_TILE:
        TB = B
    else:
        TB = max(8, (BATCH_TILE // 8) * 8)
    Bp = ((B + TB - 1) // TB) * TB
    if Bp != B:
        x = jnp.pad(x, ((0, Bp - B), (0, 0), (0, 0)))

    weights = (params["w1"], params["s1"], params["b1"], params["p1"],
               params["w2"], params["s2"], params["b2"], params["p2"],
               params["w3"], params["s3"], params["b3"], params["p3"],
               params["wm1"], params["bm1"], params["wm2"], params["bm2"])

    def resident(a):
        # Full-array block + constant index_map: DMA'd once, VMEM-resident
        # across all batch-grid steps (no per-step weight re-fetch).
        return pl.BlockSpec(a.shape, lambda i, _n=a.ndim: (0,) * _n)

    in_specs = [pl.BlockSpec((TB, IMAGE_SIZE, IMAGE_SIZE * IN_CHANNELS),
                             lambda i: (i, 0, 0))]
    in_specs += [resident(a) for a in weights]

    c1, c2, _ = _CONV_CHANNELS
    out = pl.pallas_call(
        vgg_fused_kernel,
        out_shape=jax.ShapeDtypeStruct((Bp, OUT_PAD), jnp.float32),
        grid=(Bp // TB,),
        in_specs=in_specs,
        out_specs=pl.BlockSpec((TB, OUT_PAD), lambda i: (i, 0)),
        scratch_shapes=[
            # H-halo-padded, lane-dense (W*C) activation buffers (bf16).
            pltpu.VMEM((TB, IMAGE_SIZE + 2, IMAGE_SIZE * IN_CHANNELS),
                       jnp.bfloat16),
            pltpu.VMEM((TB, IMAGE_SIZE // 2 + 2, (IMAGE_SIZE // 2) * c1),
                       jnp.bfloat16),
            pltpu.VMEM((TB, IMAGE_SIZE // 4 + 2, (IMAGE_SIZE // 4) * c2),
                       jnp.bfloat16),
        ],
        compiler_params=pltpu.CompilerParams(
            dimension_semantics=("parallel",),
            vmem_limit_bytes=32 * 1024 * 1024,   # explicit; safe on v5e/v6e/v7x
        ),
    )(x, *weights)
    return out[:B, :NUM_CLASSES]


# ----------------------------------- Main -------------------------------------

if __name__ == "__main__":
    key = jax.random.PRNGKey(0)
    key, pkey, xkey = jax.random.split(key, 3)
    params = init_params(pkey)
    x = jax.random.normal(xkey, (2, IN_CHANNELS, IMAGE_SIZE, IMAGE_SIZE),
                          jnp.float32)
    out = vgg_forward(params, x)
    out = jax.block_until_ready(out)
    assert out.shape == (2, NUM_CLASSES), out.shape
    assert bool(jnp.all(jnp.isfinite(out))), "non-finite output"
    print("KERNEL_OK")
</pallas_src>

<mosaic_0001>
module attributes {stable_mosaic.version = 11 : i64} {
  func.func @vgg_fused_kernel(%arg0: i32, %arg1: memref<2x32x96xbf16, #tpu.memory_space<vmem>>, %arg2: memref<3x96x256xbf16, #tpu.memory_space<vmem>>, %arg3: memref<1x256xf32, #tpu.memory_space<vmem>>, %arg4: memref<1x256xf32, #tpu.memory_space<vmem>>, %arg5: memref<2x256x128xbf16, #tpu.memory_space<vmem>>, %arg6: memref<3x128x256xbf16, #tpu.memory_space<vmem>>, %arg7: memref<1x256xf32, #tpu.memory_space<vmem>>, %arg8: memref<1x256xf32, #tpu.memory_space<vmem>>, %arg9: memref<2x256x128xbf16, #tpu.memory_space<vmem>>, %arg10: memref<3x128x256xbf16, #tpu.memory_space<vmem>>, %arg11: memref<1x256xf32, #tpu.memory_space<vmem>>, %arg12: memref<1x256xf32, #tpu.memory_space<vmem>>, %arg13: memref<2x256x128xbf16, #tpu.memory_space<vmem>>, %arg14: memref<512x64xbf16, #tpu.memory_space<vmem>>, %arg15: memref<1x64xf32, #tpu.memory_space<vmem>>, %arg16: memref<64x128xbf16, #tpu.memory_space<vmem>>, %arg17: memref<1x128xf32, #tpu.memory_space<vmem>>, %arg18: memref<2x128xf32, #tpu.memory_space<vmem>>, %arg19: memref<2x34x96xbf16, #tpu.memory_space<vmem>>, %arg20: memref<2x18x128xbf16, #tpu.memory_space<vmem>>, %arg21: memref<2x10x128xbf16, #tpu.memory_space<vmem>>) attributes {dimension_semantics = [#tpu.dimension_semantics<parallel>], iteration_bounds = array<i64: 1>, scalar_prefetch = 0 : i64, scratch_operands = 3 : i64, tpu.core_type = #tpu.core_type<tc>, window_params = [{transform_indices = @transform_0, window_bounds = array<i64: 2, 32, 96>}, {pipeline_mode = #tpu.pipeline_mode<synchronous>, transform_indices = @transform_1, window_bounds = array<i64: 3, 96, 256>}, {pipeline_mode = #tpu.pipeline_mode<synchronous>, transform_indices = @transform_2, window_bounds = array<i64: 1, 256>}, {pipeline_mode = #tpu.pipeline_mode<synchronous>, transform_indices = @transform_3, window_bounds = array<i64: 1, 256>}, {pipeline_mode = #tpu.pipeline_mode<synchronous>, transform_indices = @transform_4, window_bounds = array<i64: 2, 256, 128>}, {pipeline_mode = #tpu.pipeline_mode<synchronous>, transform_indices = @transform_5, window_bounds = array<i64: 3, 128, 256>}, {pipeline_mode = #tpu.pipeline_mode<synchronous>, transform_indices = @transform_6, window_bounds = array<i64: 1, 256>}, {pipeline_mode = #tpu.pipeline_mode<synchronous>, transform_indices = @transform_7, window_bounds = array<i64: 1, 256>}, {pipeline_mode = #tpu.pipeline_mode<synchronous>, transform_indices = @transform_8, window_bounds = array<i64: 2, 256, 128>}, {pipeline_mode = #tpu.pipeline_mode<synchronous>, transform_indices = @transform_9, window_bounds = array<i64: 3, 128, 256>}, {pipeline_mode = #tpu.pipeline_mode<synchronous>, transform_indices = @transform_10, window_bounds = array<i64: 1, 256>}, {pipeline_mode = #tpu.pipeline_mode<synchronous>, transform_indices = @transform_11, window_bounds = array<i64: 1, 256>}, {pipeline_mode = #tpu.pipeline_mode<synchronous>, transform_indices = @transform_12, window_bounds = array<i64: 2, 256, 128>}, {pipeline_mode = #tpu.pipeline_mode<synchronous>, transform_indices = @transform_13, window_bounds = array<i64: 512, 64>}, {pipeline_mode = #tpu.pipeline_mode<synchronous>, transform_indices = @transform_14, window_bounds = array<i64: 1, 64>}, {pipeline_mode = #tpu.pipeline_mode<synchronous>, transform_indices = @transform_15, window_bounds = array<i64: 64, 128>}, {pipeline_mode = #tpu.pipeline_mode<synchronous>, transform_indices = @transform_16, window_bounds = array<i64: 1, 128>}, {transform_indices = @transform_17, window_bounds = array<i64: 2, 128>}]} {
    %cst = arith.constant 0.000000e+00 : bf16
    %0 = vector.broadcast %cst : bf16 to vector<2x1x96xbf16>
    %c0 = arith.constant 0 : index
    %c0_0 = arith.constant 0 : index
    %c0_1 = arith.constant 0 : index
    %1 = vector.load %arg19[%c0, %c0_0, %c0_1] : memref<2x34x96xbf16, #tpu.memory_space<vmem>>, vector<2x1x96xbf16>
    tpu.vector_store %arg19[%c0, %c0_0, %c0_1], %0 {strides = array<i32>} : memref<2x34x96xbf16, #tpu.memory_space<vmem>>, vector<2x1x96xbf16>,
    %cst_2 = arith.constant 0.000000e+00 : bf16
    %2 = vector.broadcast %cst_2 : bf16 to vector<2x1x96xbf16>
    %c0_3 = arith.constant 0 : index
    %c33 = arith.constant 33 : index
    %c0_4 = arith.constant 0 : index
    %3 = vector.load %arg19[%c0_3, %c33, %c0_4] : memref<2x34x96xbf16, #tpu.memory_space<vmem>>, vector<2x1x96xbf16>
    tpu.vector_store %arg19[%c0_3, %c33, %c0_4], %2 {strides = array<i32>} : memref<2x34x96xbf16, #tpu.memory_space<vmem>>, vector<2x1x96xbf16>,
    %c0_5 = arith.constant 0 : index
    %c0_6 = arith.constant 0 : index
    %c0_7 = arith.constant 0 : index
    %4 = vector.load %arg1[%c0_5, %c0_6, %c0_7] : memref<2x32x96xbf16, #tpu.memory_space<vmem>>, vector<2x32x96xbf16>
    %c0_8 = arith.constant 0 : index
    %c1 = arith.constant 1 : index
    %c0_9 = arith.constant 0 : index
    %5 = vector.load %arg19[%c0_8, %c1, %c0_9] : memref<2x34x96xbf16, #tpu.memory_space<vmem>>, vector<2x32x96xbf16>
    tpu.vector_store %arg19[%c0_8, %c1, %c0_9], %4 {strides = array<i32>} : memref<2x34x96xbf16, #tpu.memory_space<vmem>>, vector<2x32x96xbf16>,
    %c0_10 = arith.constant 0 : index
    %c0_11 = arith.constant 0 : index
    %c0_12 = arith.constant 0 : index
    %6 = vector.load %arg19[%c0_10, %c0_11, %c0_12] : memref<2x34x96xbf16, #tpu.memory_space<vmem>>, vector<2x32x96xbf16>
    %7 = vector.shape_cast %6 : vector<2x32x96xbf16> to vector<64x96xbf16>
    %c0_13 = arith.constant 0 : index
    %c0_14 = arith.constant 0 : index
    %c0_15 = arith.constant 0 : index
    %8 = vector.load %arg2[%c0_13, %c0_14, %c0_15] : memref<3x96x256xbf16, #tpu.memory_space<vmem>>, vector<1x96x256xbf16>
    %9 = vector.shape_cast %8 : vector<1x96x256xbf16> to vector<96x256xbf16>
    %cst_16 = arith.constant dense<0.000000e+00> : vector<64x256xf32>
    %10 = tpu.matmul %7, %9, %cst_16 {dimension_numbers = #tpu.dot_dimension_numbers<[1], [0], [0], [1], [0, 0, 1, 1], [], []>} : vector<64x96xbf16>, vector<96x256xbf16>, vector<64x256xf32> -> vector<64x256xf32>
    %c0_17 = arith.constant 0 : index
    %c1_18 = arith.constant 1 : index
    %c0_19 = arith.constant 0 : index
    %11 = vector.load %arg19[%c0_17, %c1_18, %c0_19] : memref<2x34x96xbf16, #tpu.memory_space<vmem>>, vector<2x32x96xbf16>
    %12 = vector.shape_cast %11 : vector<2x32x96xbf16> to vector<64x96xbf16>
    %c1_20 = arith.constant 1 : index
    %c0_21 = arith.constant 0 : index
    %c0_22 = arith.constant 0 : index
    %13 = vector.load %arg2[%c1_20, %c0_21, %c0_22] : memref<3x96x256xbf16, #tpu.memory_space<vmem>>, vector<1x96x256xbf16>
    %14 = vector.shape_cast %13 : vector<1x96x256xbf16> to vector<96x256xbf16>
    %cst_23 = arith.constant dense<0.000000e+00> : vector<64x256xf32>
    %15 = tpu.matmul %12, %14, %cst_23 {dimension_numbers = #tpu.dot_dimension_numbers<[1], [0], [0], [1], [0, 0, 1, 1], [], []>} : vector<64x96xbf16>, vector<96x256xbf16>, vector<64x256xf32> -> vector<64x256xf32>
    %16 = arith.addf %10, %15 : vector<64x256xf32>
    %c0_24 = arith.constant 0 : index
    %c2 = arith.constant 2 : index
    %c0_25 = arith.constant 0 : index
    %17 = vector.load %arg19[%c0_24, %c2, %c0_25] : memref<2x34x96xbf16, #tpu.memory_space<vmem>>, vector<2x32x96xbf16>
    %18 = vector.shape_cast %17 : vector<2x32x96xbf16> to vector<64x96xbf16>
    %c2_26 = arith.constant 2 : index
    %c0_27 = arith.constant 0 : index
    %c0_28 = arith.constant 0 : index
    %19 = vector.load %arg2[%c2_26, %c0_27, %c0_28] : memref<3x96x256xbf16, #tpu.memory_space<vmem>>, vector<1x96x256xbf16>
    %20 = vector.shape_cast %19 : vector<1x96x256xbf16> to vector<96x256xbf16>
    %cst_29 = arith.constant dense<0.000000e+00> : vector<64x256xf32>
    %21 = tpu.matmul %18, %20, %cst_29 {dimension_numbers = #tpu.dot_dimension_numbers<[1], [0], [0], [1], [0, 0, 1, 1], [], []>} : vector<64x96xbf16>, vector<96x256xbf16>, vector<64x256xf32> -> vector<64x256xf32>
    %22 = arith.addf %16, %21 : vector<64x256xf32>
    %c0_30 = arith.constant 0 : index
    %c0_31 = arith.constant 0 : index
    %23 = vector.load %arg3[%c0_30, %c0_31] : memref<1x256xf32, #tpu.memory_space<vmem>>, vector<1x256xf32>
    %24 = vector.broadcast %23 : vector<1x256xf32> to vector<64x256xf32>
    %25 = arith.mulf %22, %24 : vector<64x256xf32>
    %c0_32 = arith.constant 0 : index
    %c0_33 = arith.constant 0 : index
    %26 = vector.load %arg4[%c0_32, %c0_33] : memref<1x256xf32, #tpu.memory_space<vmem>>, vector<1x256xf32>
    %27 = vector.broadcast %26 : vector<1x256xf32> to vector<64x256xf32>
    %28 = arith.addf %25, %27 : vector<64x256xf32>
    %cst_34 = arith.constant 0.000000e+00 : f32
    %29 = vector.broadcast %cst_34 : f32 to vector<64x256xf32>
    %30 = arith.maximumf %28, %29 : vector<64x256xf32>
    %31 = vector.shape_cast %30 : vector<64x256xf32> to vector<32x2x256xf32>
    %cst_35 = arith.constant dense<0xFF800000> : vector<32x256xf32>
    %32 = vector.multi_reduction <maximumf>, %31, %cst_35 [1] : vector<32x2x256xf32> to vector<32x256xf32>
    %33 = arith.truncf %32 : vector<32x256xf32> to vector<32x256xbf16>
    %c0_36 = arith.constant 0 : index
    %c0_37 = arith.constant 0 : index
    %c0_38 = arith.constant 0 : index
    %34 = vector.load %arg5[%c0_36, %c0_37, %c0_38] : memref<2x256x128xbf16, #tpu.memory_space<vmem>>, vector<1x256x128xbf16>
    %35 = vector.shape_cast %34 : vector<1x256x128xbf16> to vector<256x128xbf16>
    %cst_39 = arith.constant dense<0.000000e+00> : vector<32x128xf32>
    %36 = tpu.matmul %33, %35, %cst_39 {dimension_numbers = #tpu.dot_dimension_numbers<[1], [0], [0], [1], [0, 0, 1, 1], [], []>} : vector<32x256xbf16>, vector<256x128xbf16>, vector<32x128xf32> -> vector<32x128xf32>
    %c1_40 = arith.constant 1 : index
    %c0_41 = arith.constant 0 : index
    %c0_42 = arith.constant 0 : index
    %37 = vector.load %arg5[%c1_40, %c0_41, %c0_42] : memref<2x256x128xbf16, #tpu.memory_space<vmem>>, vector<1x256x128xbf16>
    %38 = vector.shape_cast %37 : vector<1x256x128xbf16> to vector<256x128xbf16>
    %cst_43 = arith.constant dense<0.000000e+00> : vector<32x128xf32>
    %39 = tpu.matmul %33, %38, %cst_43 {dimension_numbers = #tpu.dot_dimension_numbers<[1], [0], [0], [1], [0, 0, 1, 1], [], []>} : vector<32x256xbf16>, vector<256x128xbf16>, vector<32x128xf32> -> vector<32x128xf32>
    %40 = arith.maximumf %36, %39 : vector<32x128xf32>
    %cst_44 = arith.constant 0.000000e+00 : bf16
    %41 = vector.broadcast %cst_44 : bf16 to vector<2x1x128xbf16>
    %c0_45 = arith.constant 0 : index
    %c0_46 = arith.constant 0 : index
    %c0_47 = arith.constant 0 : index
    %42 = vector.load %arg20[%c0_45, %c0_46, %c0_47] : memref<2x18x128xbf16, #tpu.memory_space<vmem>>, vector<2x1x128xbf16>
    tpu.vector_store %arg20[%c0_45, %c0_46, %c0_47], %41 {strides = array<i32>} : memref<2x18x128xbf16, #tpu.memory_space<vmem>>, vector<2x1x128xbf16>,
    %cst_48 = arith.constant 0.000000e+00 : bf16
    %43 = vector.broadcast %cst_48 : bf16 to vector<2x1x128xbf16>
    %c0_49 = arith.constant 0 : index
    %c17 = arith.constant 17 : index
    %c0_50 = arith.constant 0 : index
    %44 = vector.load %arg20[%c0_49, %c17, %c0_50] : memref<2x18x128xbf16, #tpu.memory_space<vmem>>, vector<2x1x128xbf16>
    tpu.vector_store %arg20[%c0_49, %c17, %c0_50], %43 {strides = array<i32>} : memref<2x18x128xbf16, #tpu.memory_space<vmem>>, vector<2x1x128xbf16>,
    %45 = vector.shape_cast %40 : vector<32x128xf32> to vector<2x16x128xf32>
    %46 = arith.truncf %45 : vector<2x16x128xf32> to vector<2x16x128xbf16>
    %c0_51 = arith.constant 0 : index
    %c1_52 = arith.constant 1 : index
    %c0_53 = arith.constant 0 : index
    %47 = vector.load %arg20[%c0_51, %c1_52, %c0_53] : memref<2x18x128xbf16, #tpu.memory_space<vmem>>, vector<2x16x128xbf16>
    tpu.vector_store %arg20[%c0_51, %c1_52, %c0_53], %46 {strides = array<i32>} : memref<2x18x128xbf16, #tpu.memory_space<vmem>>, vector<2x16x128xbf16>,
    %c0_54 = arith.constant 0 : index
    %c0_55 = arith.constant 0 : index
    %c0_56 = arith.constant 0 : index
    %48 = vector.load %arg20[%c0_54, %c0_55, %c0_56] : memref<2x18x128xbf16, #tpu.memory_space<vmem>>, vector<2x16x128xbf16>
    %49 = vector.shape_cast %48 : vector<2x16x128xbf16> to vector<32x128xbf16>
    %c0_57 = arith.constant 0 : index
    %c0_58 = arith.constant 0 : index
    %c0_59 = arith.constant 0 : index
    %50 = vector.load %arg6[%c0_57, %c0_58, %c0_59] : memref<3x128x256xbf16, #tpu.memory_space<vmem>>, vector<1x128x256xbf16>
    %51 = vector.shape_cast %50 : vector<1x128x256xbf16> to vector<128x256xbf16>
    %cst_60 = arith.constant dense<0.000000e+00> : vector<32x256xf32>
    %52 = tpu.matmul %49, %51, %cst_60 {dimension_numbers = #tpu.dot_dimension_numbers<[1], [0], [0], [1], [0, 0, 1, 1], [], []>} : vector<32x128xbf16>, vector<128x256xbf16>, vector<32x256xf32> -> vector<32x256xf32>
    %c0_61 = arith.constant 0 : index
    %c1_62 = arith.constant 1 : index
    %c0_63 = arith.constant 0 : index
    %53 = vector.load %arg20[%c0_61, %c1_62, %c0_63] : memref<2x18x128xbf16, #tpu.memory_space<vmem>>, vector<2x16x128xbf16>
    %54 = vector.shape_cast %53 : vector<2x16x128xbf16> to vector<32x128xbf16>
    %c1_64 = arith.constant 1 : index
    %c0_65 = arith.constant 0 : index
    %c0_66 = arith.constant 0 : index
    %55 = vector.load %arg6[%c1_64, %c0_65, %c0_66] : memref<3x128x256xbf16, #tpu.memory_space<vmem>>, vector<1x128x256xbf16>
    %56 = vector.shape_cast %55 : vector<1x128x256xbf16> to vector<128x256xbf16>
    %cst_67 = arith.constant dense<0.000000e+00> : vector<32x256xf32>
    %57 = tpu.matmul %54, %56, %cst_67 {dimension_numbers = #tpu.dot_dimension_numbers<[1], [0], [0], [1], [0, 0, 1, 1], [], []>} : vector<32x128xbf16>, vector<128x256xbf16>, vector<32x256xf32> -> vector<32x256xf32>
    %58 = arith.addf %52, %57 : vector<32x256xf32>
    %c0_68 = arith.constant 0 : index
    %c2_69 = arith.constant 2 : index
    %c0_70 = arith.constant 0 : index
    %59 = vector.load %arg20[%c0_68, %c2_69, %c0_70] : memref<2x18x128xbf16, #tpu.memory_space<vmem>>, vector<2x16x128xbf16>
    %60 = vector.shape_cast %59 : vector<2x16x128xbf16> to vector<32x128xbf16>
    %c2_71 = arith.constant 2 : index
    %c0_72 = arith.constant 0 : index
    %c0_73 = arith.constant 0 : index
    %61 = vector.load %arg6[%c2_71, %c0_72, %c0_73] : memref<3x128x256xbf16, #tpu.memory_space<vmem>>, vector<1x128x256xbf16>
    %62 = vector.shape_cast %61 : vector<1x128x256xbf16> to vector<128x256xbf16>
    %cst_74 = arith.constant dense<0.000000e+00> : vector<32x256xf32>
    %63 = tpu.matmul %60, %62, %cst_74 {dimension_numbers = #tpu.dot_dimension_numbers<[1], [0], [0], [1], [0, 0, 1, 1], [], []>} : vector<32x128xbf16>, vector<128x256xbf16>, vector<32x256xf32> -> vector<32x256xf32>
    %64 = arith.addf %58, %63 : vector<32x256xf32>
    %c0_75 = arith.constant 0 : index
    %c0_76 = arith.constant 0 : index
    %65 = vector.load %arg7[%c0_75, %c0_76] : memref<1x256xf32, #tpu.memory_space<vmem>>, vector<1x256xf32>
    %66 = vector.broadcast %65 : vector<1x256xf32> to vector<32x256xf32>
    %67 = arith.mulf %64, %66 : vector<32x256xf32>
    %c0_77 = arith.constant 0 : index
    %c0_78 = arith.constant 0 : index
    %68 = vector.load %arg8[%c0_77, %c0_78] : memref<1x256xf32, #tpu.memory_space<vmem>>, vector<1x256xf32>
    %69 = vector.broadcast %68 : vector<1x256xf32> to vector<32x256xf32>
    %70 = arith.addf %67, %69 : vector<32x256xf32>
    %cst_79 = arith.constant 0.000000e+00 : f32
    %71 = vector.broadcast %cst_79 : f32 to vector<32x256xf32>
    %72 = arith.maximumf %70, %71 : vector<32x256xf32>
    %73 = vector.shape_cast %72 : vector<32x256xf32> to vector<16x2x256xf32>
    %cst_80 = arith.constant dense<0xFF800000> : vector<16x256xf32>
    %74 = vector.multi_reduction <maximumf>, %73, %cst_80 [1] : vector<16x2x256xf32> to vector<16x256xf32>
    %75 = arith.truncf %74 : vector<16x256xf32> to vector<16x256xbf16>
    %c0_81 = arith.constant 0 : index
    %c0_82 = arith.constant 0 : index
    %c0_83 = arith.constant 0 : index
    %76 = vector.load %arg9[%c0_81, %c0_82, %c0_83] : memref<2x256x128xbf16, #tpu.memory_space<vmem>>, vector<1x256x128xbf16>
    %77 = vector.shape_cast %76 : vector<1x256x128xbf16> to vector<256x128xbf16>
    %cst_84 = arith.constant dense<0.000000e+00> : vector<16x128xf32>
    %78 = tpu.matmul %75, %77, %cst_84 {dimension_numbers = #tpu.dot_dimension_numbers<[1], [0], [0], [1], [0, 0, 1, 1], [], []>} : vector<16x256xbf16>, vector<256x128xbf16>, vector<16x128xf32> -> vector<16x128xf32>
    %c1_85 = arith.constant 1 : index
    %c0_86 = arith.constant 0 : index
    %c0_87 = arith.constant 0 : index
    %79 = vector.load %arg9[%c1_85, %c0_86, %c0_87] : memref<2x256x128xbf16, #tpu.memory_space<vmem>>, vector<1x256x128xbf16>
    %80 = vector.shape_cast %79 : vector<1x256x128xbf16> to vector<256x128xbf16>
    %cst_88 = arith.constant dense<0.000000e+00> : vector<16x128xf32>
    %81 = tpu.matmul %75, %80, %cst_88 {dimension_numbers = #tpu.dot_dimension_numbers<[1], [0], [0], [1], [0, 0, 1, 1], [], []>} : vector<16x256xbf16>, vector<256x128xbf16>, vector<16x128xf32> -> vector<16x128xf32>
    %82 = arith.maximumf %78, %81 : vector<16x128xf32>
    %cst_89 = arith.constant 0.000000e+00 : bf16
    %83 = vector.broadcast %cst_89 : bf16 to vector<2x1x128xbf16>
    %c0_90 = arith.constant 0 : index
    %c0_91 = arith.constant 0 : index
    %c0_92 = arith.constant 0 : index
    %84 = vector.load %arg21[%c0_90, %c0_91, %c0_92] : memref<2x10x128xbf16, #tpu.memory_space<vmem>>, vector<2x1x128xbf16>
    tpu.vector_store %arg21[%c0_90, %c0_91, %c0_92], %83 {strides = array<i32>} : memref<2x10x128xbf16, #tpu.memory_space<vmem>>, vector<2x1x128xbf16>,
    %cst_93 = arith.constant 0.000000e+00 : bf16
    %85 = vector.broadcast %cst_93 : bf16 to vector<2x1x128xbf16>
    %c0_94 = arith.constant 0 : index
    %c9 = arith.constant 9 : index
    %c0_95 = arith.constant 0 : index
    %86 = vector.load %arg21[%c0_94, %c9, %c0_95] : memref<2x10x128xbf16, #tpu.memory_space<vmem>>, vector<2x1x128xbf16>
    tpu.vector_store %arg21[%c0_94, %c9, %c0_95], %85 {strides = array<i32>} : memref<2x10x128xbf16, #tpu.memory_space<vmem>>, vector<2x1x128xbf16>,
    %87 = vector.shape_cast %82 : vector<16x128xf32> to vector<2x8x128xf32>
    %88 = arith.truncf %87 : vector<2x8x128xf32> to vector<2x8x128xbf16>
    %c0_96 = arith.constant 0 : index
    %c1_97 = arith.constant 1 : index
    %c0_98 = arith.constant 0 : index
    %89 = vector.load %arg21[%c0_96, %c1_97, %c0_98] : memref<2x10x128xbf16, #tpu.memory_space<vmem>>, vector<2x8x128xbf16>
    tpu.vector_store %arg21[%c0_96, %c1_97, %c0_98], %88 {strides = array<i32>} : memref<2x10x128xbf16, #tpu.memory_space<vmem>>, vector<2x8x128xbf16>,
    %c0_99 = arith.constant 0 : index
    %c0_100 = arith.constant 0 : index
    %c0_101 = arith.constant 0 : index
    %90 = vector.load %arg21[%c0_99, %c0_100, %c0_101] : memref<2x10x128xbf16, #tpu.memory_space<vmem>>, vector<2x8x128xbf16>
    %91 = vector.shape_cast %90 : vector<2x8x128xbf16> to vector<16x128xbf16>
    %c0_102 = arith.constant 0 : index
    %c0_103 = arith.constant 0 : index
    %c0_104 = arith.constant 0 : index
    %92 = vector.load %arg10[%c0_102, %c0_103, %c0_104] : memref<3x128x256xbf16, #tpu.memory_space<vmem>>, vector<1x128x256xbf16>
    %93 = vector.shape_cast %92 : vector<1x128x256xbf16> to vector<128x256xbf16>
    %cst_105 = arith.constant dense<0.000000e+00> : vector<16x256xf32>
    %94 = tpu.matmul %91, %93, %cst_105 {dimension_numbers = #tpu.dot_dimension_numbers<[1], [0], [0], [1], [0, 0, 1, 1], [], []>} : vector<16x128xbf16>, vector<128x256xbf16>, vector<16x256xf32> -> vector<16x256xf32>
    %c0_106 = arith.constant 0 : index
    %c1_107 = arith.constant 1 : index
    %c0_108 = arith.constant 0 : index
    %95 = vector.load %arg21[%c0_106, %c1_107, %c0_108] : memref<2x10x128xbf16, #tpu.memory_space<vmem>>, vector<2x8x128xbf16>
    %96 = vector.shape_cast %95 : vector<2x8x128xbf16> to vector<16x128xbf16>
    %c1_109 = arith.constant 1 : index
    %c0_110 = arith.constant 0 : index
    %c0_111 = arith.constant 0 : index
    %97 = vector.load %arg10[%c1_109, %c0_110, %c0_111] : memref<3x128x256xbf16, #tpu.memory_space<vmem>>, vector<1x128x256xbf16>
    %98 = vector.shape_cast %97 : vector<1x128x256xbf16> to vector<128x256xbf16>
    %cst_112 = arith.constant dense<0.000000e+00> : vector<16x256xf32>
    %99 = tpu.matmul %96, %98, %cst_112 {dimension_numbers = #tpu.dot_dimension_numbers<[1], [0], [0], [1], [0, 0, 1, 1], [], []>} : vector<16x128xbf16>, vector<128x256xbf16>, vector<16x256xf32> -> vector<16x256xf32>
    %100 = arith.addf %94, %99 : vector<16x256xf32>
    %c0_113 = arith.constant 0 : index
    %c2_114 = arith.constant 2 : index
    %c0_115 = arith.constant 0 : index
    %101 = vector.load %arg21[%c0_113, %c2_114, %c0_115] : memref<2x10x128xbf16, #tpu.memory_space<vmem>>, vector<2x8x128xbf16>
    %102 = vector.shape_cast %101 : vector<2x8x128xbf16> to vector<16x128xbf16>
    %c2_116 = arith.constant 2 : index
    %c0_117 = arith.constant 0 : index
    %c0_118 = arith.constant 0 : index
    %103 = vector.load %arg10[%c2_116, %c0_117, %c0_118] : memref<3x128x256xbf16, #tpu.memory_space<vmem>>, vector<1x128x256xbf16>
    %104 = vector.shape_cast %103 : vector<1x128x256xbf16> to vector<128x256xbf16>
    %cst_119 = arith.constant dense<0.000000e+00> : vector<16x256xf32>
    %105 = tpu.matmul %102, %104, %cst_119 {dimension_numbers = #tpu.dot_dimension_numbers<[1], [0], [0], [1], [0, 0, 1, 1], [], []>} : vector<16x128xbf16>, vector<128x256xbf16>, vector<16x256xf32> -> vector<16x256xf32>
    %106 = arith.addf %100, %105 : vector<16x256xf32>
    %c0_120 = arith.constant 0 : index
    %c0_121 = arith.constant 0 : index
    %107 = vector.load %arg11[%c0_120, %c0_121] : memref<1x256xf32, #tpu.memory_space<vmem>>, vector<1x256xf32>
    %108 = vector.broadcast %107 : vector<1x256xf32> to vector<16x256xf32>
    %109 = arith.mulf %106, %108 : vector<16x256xf32>
    %c0_122 = arith.constant 0 : index
    %c0_123 = arith.constant 0 : index
    %110 = vector.load %arg12[%c0_122, %c0_123] : memref<1x256xf32, #tpu.memory_space<vmem>>, vector<1x256xf32>
    %111 = vector.broadcast %110 : vector<1x256xf32> to vector<16x256xf32>
    %112 = arith.addf %109, %111 : vector<16x256xf32>
    %cst_124 = arith.constant 0.000000e+00 : f32
    %113 = vector.broadcast %cst_124 : f32 to vector<16x256xf32>
    %114 = arith.maximumf %112, %113 : vector<16x256xf32>
    %115 = vector.shape_cast %114 : vector<16x256xf32> to vector<8x2x256xf32>
    %cst_125 = arith.constant dense<0xFF800000> : vector<8x256xf32>
    %116 = vector.multi_reduction <maximumf>, %115, %cst_125 [1] : vector<8x2x256xf32> to vector<8x256xf32>
    %117 = arith.truncf %116 : vector<8x256xf32> to vector<8x256xbf16>
    %c0_126 = arith.constant 0 : index
    %c0_127 = arith.constant 0 : index
    %c0_128 = arith.constant 0 : index
    %118 = vector.load %arg13[%c0_126, %c0_127, %c0_128] : memref<2x256x128xbf16, #tpu.memory_space<vmem>>, vector<1x256x128xbf16>
    %119 = vector.shape_cast %118 : vector<1x256x128xbf16> to vector<256x128xbf16>
    %cst_129 = arith.constant dense<0.000000e+00> : vector<8x128xf32>
    %120 = tpu.matmul %117, %119, %cst_129 {dimension_numbers = #tpu.dot_dimension_numbers<[1], [0], [0], [1], [0, 0, 1, 1], [], []>} : vector<8x256xbf16>, vector<256x128xbf16>, vector<8x128xf32> -> vector<8x128xf32>
    %c1_130 = arith.constant 1 : index
    %c0_131 = arith.constant 0 : index
    %c0_132 = arith.constant 0 : index
    %121 = vector.load %arg13[%c1_130, %c0_131, %c0_132] : memref<2x256x128xbf16, #tpu.memory_space<vmem>>, vector<1x256x128xbf16>
    %122 = vector.shape_cast %121 : vector<1x256x128xbf16> to vector<256x128xbf16>
    %cst_133 = arith.constant dense<0.000000e+00> : vector<8x128xf32>
    %123 = tpu.matmul %117, %122, %cst_133 {dimension_numbers = #tpu.dot_dimension_numbers<[1], [0], [0], [1], [0, 0, 1, 1], [], []>} : vector<8x256xbf16>, vector<256x128xbf16>, vector<8x128xf32> -> vector<8x128xf32>
    %124 = arith.maximumf %120, %123 : vector<8x128xf32>
    %125 = vector.shape_cast %124 : vector<8x128xf32> to vector<2x512xf32>
    %126 = arith.truncf %125 : vector<2x512xf32> to vector<2x512xbf16>
    %c0_134 = arith.constant 0 : index
    %c0_135 = arith.constant 0 : index
    %127 = vector.load %arg14[%c0_134, %c0_135] : memref<512x64xbf16, #tpu.memory_space<vmem>>, vector<512x64xbf16>
    %cst_136 = arith.constant dense<0.000000e+00> : vector<2x64xf32>
    %128 = tpu.matmul %126, %127, %cst_136 {dimension_numbers = #tpu.dot_dimension_numbers<[1], [0], [0], [1], [0, 0, 1, 1], [], []>} : vector<2x512xbf16>, vector<512x64xbf16>, vector<2x64xf32> -> vector<2x64xf32>
    %c0_137 = arith.constant 0 : index
    %c0_138 = arith.constant 0 : index
    %129 = vector.load %arg15[%c0_137, %c0_138] : memref<1x64xf32, #tpu.memory_space<vmem>>, vector<1x64xf32>
    %130 = vector.broadcast %129 : vector<1x64xf32> to vector<2x64xf32>
    %131 = arith.addf %128, %130 : vector<2x64xf32>
    %cst_139 = arith.constant 0.000000e+00 : f32
    %132 = vector.broadcast %cst_139 : f32 to vector<2x64xf32>
    %133 = arith.maximumf %131, %132 : vector<2x64xf32>
    %134 = arith.truncf %133 : vector<2x64xf32> to vector<2x64xbf16>
    %c0_140 = arith.constant 0 : index
    %c0_141 = arith.constant 0 : index
    %135 = vector.load %arg16[%c0_140, %c0_141] : memref<64x128xbf16, #tpu.memory_space<vmem>>, vector<64x128xbf16>
    %cst_142 = arith.constant dense<0.000000e+00> : vector<2x128xf32>
    %136 = tpu.matmul %134, %135, %cst_142 {dimension_numbers = #tpu.dot_dimension_numbers<[1], [0], [0], [1], [0, 0, 1, 1], [], []>} : vector<2x64xbf16>, vector<64x128xbf16>, vector<2x128xf32> -> vector<2x128xf32>
    %c0_143 = arith.constant 0 : index
    %c0_144 = arith.constant 0 : index
    %137 = vector.load %arg17[%c0_143, %c0_144] : memref<1x128xf32, #tpu.memory_space<vmem>>, vector<1x128xf32>
    %138 = vector.broadcast %137 : vector<1x128xf32> to vector<2x128xf32>
    %139 = arith.addf %136, %138 : vector<2x128xf32>
    %c0_145 = arith.constant 0 : index
    %c0_146 = arith.constant 0 : index
    %140 = vector.load %arg18[%c0_145, %c0_146] : memref<2x128xf32, #tpu.memory_space<vmem>>, vector<2x128xf32>
    tpu.vector_store %arg18[%c0_145, %c0_146], %139 {strides = array<i32>} : memref<2x128xf32, #tpu.memory_space<vmem>>, vector<2x128xf32>,
    return
  }
  func.func @transform_0(%arg0: i32) -> (i32, i32, i32) {
    %c0_i32 = arith.constant 0 : i32
    %c0_i32_0 = arith.constant 0 : i32
    %c0_i32_1 = arith.constant 0 : i32
    return %arg0, %c0_i32, %c0_i32_0 : i32, i32, i32
  }
  func.func @transform_1(%arg0: i32) -> (i32, i32, i32) {
    %c0_i32 = arith.constant 0 : i32
    %c0_i32_0 = arith.constant 0 : i32
    %c0_i32_1 = arith.constant 0 : i32
    %c0_i32_2 = arith.constant 0 : i32
    return %c0_i32, %c0_i32_0, %c0_i32_1 : i32, i32, i32
  }
  func.func @transform_2(%arg0: i32) -> (i32, i32) {
    %c0_i32 = arith.constant 0 : i32
    %c0_i32_0 = arith.constant 0 : i32
    %c0_i32_1 = arith.constant 0 : i32
    return %c0_i32, %c0_i32_0 : i32, i32
  }
  func.func @transform_3(%arg0: i32) -> (i32, i32) {
    %c0_i32 = arith.constant 0 : i32
    %c0_i32_0 = arith.constant 0 : i32
    %c0_i32_1 = arith.constant 0 : i32
    return %c0_i32, %c0_i32_0 : i32, i32
  }
  func.func @transform_4(%arg0: i32) -> (i32, i32, i32) {
    %c0_i32 = arith.constant 0 : i32
    %c0_i32_0 = arith.constant 0 : i32
    %c0_i32_1 = arith.constant 0 : i32
    %c0_i32_2 = arith.constant 0 : i32
    return %c0_i32, %c0_i32_0, %c0_i32_1 : i32, i32, i32
  }
  func.func @transform_5(%arg0: i32) -> (i32, i32, i32) {
    %c0_i32 = arith.constant 0 : i32
    %c0_i32_0 = arith.constant 0 : i32
    %c0_i32_1 = arith.constant 0 : i32
    %c0_i32_2 = arith.constant 0 : i32
    return %c0_i32, %c0_i32_0, %c0_i32_1 : i32, i32, i32
  }
  func.func @transform_6(%arg0: i32) -> (i32, i32) {
    %c0_i32 = arith.constant 0 : i32
    %c0_i32_0 = arith.constant 0 : i32
    %c0_i32_1 = arith.constant 0 : i32
    return %c0_i32, %c0_i32_0 : i32, i32
  }
  func.func @transform_7(%arg0: i32) -> (i32, i32) {
    %c0_i32 = arith.constant 0 : i32
    %c0_i32_0 = arith.constant 0 : i32
    %c0_i32_1 = arith.constant 0 : i32
    return %c0_i32, %c0_i32_0 : i32, i32
  }
  func.func @transform_8(%arg0: i32) -> (i32, i32, i32) {
    %c0_i32 = arith.constant 0 : i32
    %c0_i32_0 = arith.constant 0 : i32
    %c0_i32_1 = arith.constant 0 : i32
    %c0_i32_2 = arith.constant 0 : i32
    return %c0_i32, %c0_i32_0, %c0_i32_1 : i32, i32, i32
  }
  func.func @transform_9(%arg0: i32) -> (i32, i32, i32) {
    %c0_i32 = arith.constant 0 : i32
    %c0_i32_0 = arith.constant 0 : i32
    %c0_i32_1 = arith.constant 0 : i32
    %c0_i32_2 = arith.constant 0 : i32
    return %c0_i32, %c0_i32_0, %c0_i32_1 : i32, i32, i32
  }
  func.func @transform_10(%arg0: i32) -> (i32, i32) {
    %c0_i32 = arith.constant 0 : i32
    %c0_i32_0 = arith.constant 0 : i32
    %c0_i32_1 = arith.constant 0 : i32
    return %c0_i32, %c0_i32_0 : i32, i32
  }
  func.func @transform_11(%arg0: i32) -> (i32, i32) {
    %c0_i32 = arith.constant 0 : i32
    %c0_i32_0 = arith.constant 0 : i32
    %c0_i32_1 = arith.constant 0 : i32
    return %c0_i32, %c0_i32_0 : i32, i32
  }
  func.func @transform_12(%arg0: i32) -> (i32, i32, i32) {
    %c0_i32 = arith.constant 0 : i32
    %c0_i32_0 = arith.constant 0 : i32
    %c0_i32_1 = arith.constant 0 : i32
    %c0_i32_2 = arith.constant 0 : i32
    return %c0_i32, %c0_i32_0, %c0_i32_1 : i32, i32, i32
  }
  func.func @transform_13(%arg0: i32) -> (i32, i32) {
    %c0_i32 = arith.constant 0 : i32
    %c0_i32_0 = arith.constant 0 : i32
    %c0_i32_1 = arith.constant 0 : i32
    return %c0_i32, %c0_i32_0 : i32, i32
  }
  func.func @transform_14(%arg0: i32) -> (i32, i32) {
    %c0_i32 = arith.constant 0 : i32
    %c0_i32_0 = arith.constant 0 : i32
    %c0_i32_1 = arith.constant 0 : i32
    return %c0_i32, %c0_i32_0 : i32, i32
  }
  func.func @transform_15(%arg0: i32) -> (i32, i32) {
    %c0_i32 = arith.constant 0 : i32
    %c0_i32_0 = arith.constant 0 : i32
    %c0_i32_1 = arith.constant 0 : i32
    return %c0_i32, %c0_i32_0 : i32, i32
  }
  func.func @transform_16(%arg0: i32) -> (i32, i32) {
    %c0_i32 = arith.constant 0 : i32
    %c0_i32_0 = arith.constant 0 : i32
    %c0_i32_1 = arith.constant 0 : i32
    return %c0_i32, %c0_i32_0 : i32, i32
  }
  func.func @transform_17(%arg0: i32) -> (i32, i32) {
    %c0_i32 = arith.constant 0 : i32
    %c0_i32_0 = arith.constant 0 : i32
    return %arg0, %c0_i32 : i32, i32
  }
}

</mosaic_0001>

<bundles_post_ra>
// kernel: vgg_forward.1
= control target key start
LH: loop header
LB: loop body
LE: loop exit
PB: predicated region body
PF: predicated region fallthrough
CT: control target
= control target key end

     0   :  { %s8934_s0 = inlined_call_operand.vmem [shape: bf16[2,32,96], index: 0, kind: input, shape index: {}]   ;;  %s8935_s1 = inlined_call_operand.hbm [shape: bf16[3,96,256], index: 1, kind: input, shape index: {}]   ;;  %s8936_s2 = inlined_call_operand.vmem [shape: f32[1,256], index: 2, kind: input, shape index: {}]   ;;  %s8937_s3 = inlined_call_operand.vmem [shape: f32[1,256], index: 3, kind: input, shape index: {}]   ;;  %s8938_s4 = inlined_call_operand.hbm [shape: bf16[2,256,128], index: 4, kind: input, shape index: {}]   ;;  %s8939_s5 = inlined_call_operand.vmem [shape: bf16[3,128,256], index: 5, kind: input, shape index: {}]   ;;  %s8940_s6 = inlined_call_operand.vmem [shape: f32[1,256], index: 6, kind: input, shape index: {}]   ;;  %s8941_s7 = inlined_call_operand.vmem [shape: f32[1,256], index: 7, kind: input, shape index: {}]   ;;  %s8942_s8 = inlined_call_operand.hbm [shape: bf16[2,256,128], index: 8, kind: input, shape index: {}]   ;;  %s8943_s9 = inlined_call_operand.vmem [shape: bf16[3,128,256], index: 9, kind: input, shape index: {}]   ;;  %s8944_s10 = inlined_call_operand.vmem [shape: f32[1,256], index: 10, kind: input, shape index: {}]   ;;  %s8945_s11 = inlined_call_operand.vmem [shape: f32[1,256], index: 11, kind: input, shape index: {}]   ;;  %s8946_s12 = inlined_call_operand.hbm [shape: bf16[2,256,128], index: 12, kind: input, shape index: {}]   ;;  %s8947_s13 = inlined_call_operand.vmem [shape: bf16[512,64], index: 13, kind: input, shape index: {}]   ;;  %s8948_s14 = inlined_call_operand.vmem [shape: f32[1,64], index: 14, kind: input, shape index: {}]   ;;  %s8949_s15 = inlined_call_operand.vmem [shape: bf16[64,128], index: 15, kind: input, shape index: {}]   ;;  %s8950_s16 = inlined_call_operand.vmem [shape: f32[1,128], index: 16, kind: input, shape index: {}]   ;;  %s8951_s17 = inlined_call_operand.hbm [shape: f32[2,128], index: 17, kind: output, shape index: {}]  }
   0x1   :  { %8994 = sst [smem:[#allocation47_spill]] %s8934_s0 }
   0x2   :  { %8995 = sst [smem:[#allocation48_spill]] %s8935_s1 }
   0x3   :  { %8996 = sst [smem:[#allocation49_spill]] %s8951_s17 }
   0x4   :  { %22 = vsyncpa [#allocation6], 0 }
   0x5   :  { %23 = vsyncpa [#allocation9], 0 }
   0x6   :  { %24 = vsyncpa [#allocation12], 0 }
   0x7   :  { %25 = vsyncpa [#allocation7], 0  ;;  %s6951_s24 = smov [#allocation8]   ;;  %s6833_s28 = scalar_lea.hbm %s8938_s4, 4096 }
   0x8   :  { %s49_s25 = sshll.u32 %s6951_s24, 4  ;;  %p6834_p0 = scmp.ne.s32.totalorder %s8938_s4, %s6833_s28  ;;  %s50_s25 = int_to_ptr.vmem [resolvable:$true] %s49_s25 }
   0x9   :  { %p6837_p1 = scmp.lt.u32.totalorder %s6833_s28, %s8938_s4 }
   0xb   :  { %p6839_p2 = pnand %p6837_p1, %p6834_p0 }
   0xd   :  { %6842 = shalt.err (!%p6839_p2)
}
   0xe   :  { %s6843_s19 = scalar_lea.vmem %s50_s25, 4096  ;;  %p6848_p4 = scmp.lt.s32.totalorder %s50_s25, %s50_s25 }
   0xf   :  { %p6844_p3 = scmp.ne.s32.totalorder %s50_s25, %s6843_s19  ;;  %p6849_p5 = scmp.lt.s32.totalorder %s6843_s19, %s6843_s19 }
  0x11   :  { %p6850_p6 = por %p6849_p5, %p6848_p4 }
  0x13   :  { %p6851_p7 = pnand %p6850_p6, %p6844_p3 }
  0x15   :  { %6854 = shalt.err (!%p6851_p7)
}
  0x16   :  { %s8955_s1 = smov 64   ;;  %s8957_s20 = smov 4  }
  0x17   :  { %55 = dma.hbm_to_vmem [thread:$0]  %s8938_s4, 4096, %s50_s25, [#allocation9], %s8955_s1, %s8955_s1, %s8957_s20  }
  0x18   :  { %s6954_s23 = smov [#allocation5]   ;;  %s8997_s28 = sld [smem:[#allocation48_spill]] }
  0x19   :  { %s33_s24 = sshll.u32 %s6954_s23, 4  ;;  %s34_s24 = int_to_ptr.vmem [resolvable:$true] %s33_s24 }
  0x1e   :  { %s6855_s29 = scalar_lea.hbm %s8997_s28, 4608 }
  0x1f   :  { %p6856_p8 = scmp.ne.s32.totalorder %s8997_s28, %s6855_s29  ;;  %p6859_p9 = scmp.lt.u32.totalorder %s6855_s29, %s8997_s28 }
  0x21   :  { %p6861_p10 = pnand %p6859_p9, %p6856_p8 }
  0x23   :  { %6864 = shalt.err (!%p6861_p10)
}
  0x24   :  { %s6865_s17 = scalar_lea.vmem %s34_s24, 4608  ;;  %p6870_p12 = scmp.lt.s32.totalorder %s34_s24, %s34_s24 }
  0x25   :  { %p6866_p11 = scmp.ne.s32.totalorder %s34_s24, %s6865_s17  ;;  %p6871_p13 = scmp.lt.s32.totalorder %s6865_s17, %s6865_s17 }
  0x27   :  { %p6872_p0 = por %p6871_p13, %p6870_p12 }
  0x29   :  { %p6873_p1 = pnand %p6872_p0, %p6866_p11 }
  0x2b   :  { %6876 = shalt.err (!%p6873_p1)
}
  0x2c   :  { %s6955_s4 = smov 128   ;;  %s6956_s25 = smov 8  }
  0x2d   :  { %39 = dma.hbm_to_vmem [thread:$0]  %s8997_s28, 4608, %s34_s24, [#allocation6], %s6955_s4, %s6955_s4, %s6956_s25  }
  0x2e   :  { %s6957_s23 = smov [#allocation10]   ;;  %s6958_s27 = smov [#allocation11]  }
  0x2f   :  { %s67_s26 = sshll.u32 %s6957_s23, 4  ;;  %s85_s0 = sshll.u32 %s6958_s27, 4  ;;  %s68_s26 = int_to_ptr.vmem [resolvable:$true] %s67_s26  ;;  %s7082_s0 = int_to_ptr.vmem [resolvable:$true] %s85_s0 }
  0x30   :  { %s6877_s17 = scalar_lea.hbm %s8942_s8, 4096 }
  0x31   :  { %p6878_p2 = scmp.ne.s32.totalorder %s8942_s8, %s6877_s17  ;;  %p6881_p3 = scmp.lt.u32.totalorder %s6877_s17, %s8942_s8 }
  0x33   :  { %p6883_p4 = pnand %p6881_p3, %p6878_p2 }
  0x35   :  { %6886 = shalt.err (!%p6883_p4)
}
  0x36   :  { %s6887_s24 = scalar_lea.vmem %s68_s26, 4096  ;;  %p6892_p6 = scmp.lt.s32.totalorder %s68_s26, %s68_s26 }
  0x37   :  { %p6888_p5 = scmp.ne.s32.totalorder %s68_s26, %s6887_s24  ;;  %p6893_p7 = scmp.lt.s32.totalorder %s6887_s24, %s6887_s24 }
  0x39   :  { %p6894_p8 = por %p6893_p7, %p6892_p6 }
  0x3b   :  { %p6895_p9 = pnand %p6894_p8, %p6888_p5 }
  0x3d   :  { %6898 = shalt.err (!%p6895_p9)
}
  0x3e   :  { %s8998_s28 = smov 4   ;;  %s8999_s4 = smov 64  }
  0x3f   :  { %73 = dma.hbm_to_vmem [thread:$0]  %s8942_s8, 4096, %s68_s26, [#allocation9], %s8999_s4, %s8999_s4, %s8998_s28  }
  0x40   :  { %s6899_s1 = scalar_lea.hbm %s8946_s12, 4096 }
  0x41   :  { %p6900_p10 = scmp.ne.s32.totalorder %s8946_s12, %s6899_s1  ;;  %p6903_p11 = scmp.lt.u32.totalorder %s6899_s1, %s8946_s12 }
  0x43   :  { %p6905_p12 = pnand %p6903_p11, %p6900_p10 }
  0x45   :  { %6908 = shalt.err (!%p6905_p12)
}
  0x46   :  { %s6909_s17 = scalar_lea.vmem %s7082_s0, 4096  ;;  %p6914_p0 = scmp.lt.s32.totalorder %s7082_s0, %s7082_s0 }
  0x47   :  { %p6910_p13 = scmp.ne.s32.totalorder %s7082_s0, %s6909_s17  ;;  %p6915_p1 = scmp.lt.s32.totalorder %s6909_s17, %s6909_s17 }
  0x49   :  { %p6916_p2 = por %p6915_p1, %p6914_p0 }
  0x4b   :  { %p6917_p3 = pnand %p6916_p2, %p6910_p13 }
  0x4d   :  { %6920 = shalt.err (!%p6917_p3)
}
  0x4e   :  { %91 = dma.hbm_to_vmem [thread:$0]  %s8946_s12, 4096, %s7082_s0, [#allocation12], %s8999_s4, %s8999_s4, %s8998_s28  }
  0x4f   :  { %6943 = dma.done.wait [#allocation6], 4608  }
  0x50   :  { %6944 = vsyncadd [#allocation6], 4294962688 }
  0x51   :  { %6945 = dma.done.wait [#allocation9], 8192  }
  0x52   :  { %6946 = vsyncadd [#allocation9], 4294959104 }
  0x53   :  { %6947 = dma.done.wait [#allocation12], 4096  }
  0x54   :  { %6948 = vsyncadd [#allocation12], 4294963200  ;;  %v8959_v0 = vmov 0   ;;  %v6500_v1 = vld [vmem:[#allocation5 + $0x64] ss:$8 sps:$4 sm:$0xff]   ;;  %vm113_vm0 = vcmask 778240  }
  0x55   :  { %484 = vmatprep.mubr.bf16.mxu0 %v8959_v0  ;;  %v6502_v2 = vld [vmem:[#allocation5 + $0x60] ss:$8 sps:$4 sm:$0xff]   ;;  %452 = vmatprep.subr.bf16.mxu0 %v6500_v1  ;;  %v6503_v3 = vld [vmem:[#allocation5 + $0x74] ss:$8 sps:$4 sm:$0xff]   ;;  %v6505_v4 = vld [vmem:[#allocation5 + $0x70] ss:$8 sps:$4 sm:$0xff]  }
  0x56   :  { %453 = vmatpush1.bf16.msra.mxu0 %v6502_v2  ;;  %v6506_v5 = vld [vmem:[#allocation5 + $0x84] ss:$8 sps:$4 sm:$0xff]   ;;  %vm114_vm1 = vsmask.f32 256  ;;  %v6508_v6 = vld [vmem:[#allocation5 + $0x80] ss:$8 sps:$4 sm:$0xff]  }
  0x57   :  { %454 = vmatprep.subr.bf16.mxu0 %v6503_v3  ;;  %vm7122_vm2 = vmand %vm113_vm0, %vm114_vm1  ;;  %vm122_vm3 = vsmask.f32 7938  ;;  %v6509_v8 = vld [vmem:[#allocation5 + $0x94] ss:$8 sps:$4 sm:$0xff]   ;;  %vm138_vm4 = vsmask.f32 4368 }
  0x58   :  { %v6511_v9 = vld [vmem:[#allocation5 + $0x90] ss:$8 sps:$4 sm:$0xff]   ;;  %s9002_s18 = sld [smem:[#allocation47_spill]]  ;;  %vm7139_vm5 = vmand %vm113_vm0, %vm122_vm3  ;;  %v6512_v21 = vld [vmem:[#allocation5 + $0xa4] ss:$8 sps:$4 sm:$0xff]   ;;  %vm220_vm6 = vcmask 781312  }
  0x59   :  { %v116_v10 = vld [vmem:[#allocation2] sm:$0x1]  ;;  %vm7145_vm7 = vmor %vm114_vm1, %vm138_vm4  ;;  %v9005_v24 = vmov 0  ;;  %v124_v27 = vld [vmem:[#allocation2 + $0x10] sm:$0x1]  ;;  %vm696_vm11 = vcmask 1042432  }
  0x5a   :  { %455 = vmatpush1.bf16.msra.mxu0 %v6505_v4  ;;  %v117_v12 = vsel %vm7122_vm2, 0, %v116_v10  ;;  %v9006_v24 = vsel %vm7145_vm7, 4294967295, %v9005_v24  ;;  %v125_v30 = vsel %vm7139_vm5, 0, %v124_v27  ;;  %v6514_v32 = vld [vmem:[#allocation5 + $0xa0] ss:$8 sps:$4 sm:$0xff]   ;;  %vm7156_vm8 = vmand %vm220_vm6, %vm122_vm3  ;;  %vm697_vm12 = vcmask 1046532  }
  0x5b   :  { %456 = vmatprep.subr.bf16.mxu0 %v6506_v5  ;;  %118 = vst [vmem:[#allocation2] sm:$0x1] %v117_v12  ;;  %9007 = vst [vmem:[#allocation18_spill] sm:$0xff] %v9006_v24  ;;  %v6515_v33 = vld [vmem:[#allocation5 + $0xb4] ss:$8 sps:$4 sm:$0xff]   ;;  %vm439_vm13 = vcmask 785408  }
  0x5c   :  { %126 = vst [vmem:[#allocation2 + $0x10] sm:$0x1] %v125_v30  ;;  %v6517_v42 = vld [vmem:[#allocation5 + $0xb0] ss:$8 sps:$4 sm:$0xff]   ;;  %v119_v45 = vld [vmem:[#allocation2 + $0x14] sm:$0x1]  ;;  %vm7255_vm15 = vmor %vm696_vm11, %vm697_vm12 }
  0x5d   :  { %v120_v50 = vsel %vm7122_vm2, 0, %v119_v45  ;;  %v6520_v57 = vld [vmem:[#allocation5 + $0x4] ss:$8 sps:$4 sm:$0xff]   ;;  %v127_v1 = vld [vmem:[#allocation2 + $0x24] sm:$0x1]  ;;  %vm1463_vm0 = vcmask 1041408  }
  0x5e   :  { %v130_v11 = vld [vmem:[%s9002_s18] sm:$0xf]  ;;  %v131_v13 = vld [vmem:[%s9002_s18 + $0x4] sm:$0xf]  ;;  %v132_v14 = vld [vmem:[%s9002_s18 + $0x8] sm:$0xf]  ;;  %457 = vmatpush1.bf16.msra.mxu0 %v6508_v6 }
  0x5f   :  { %v141_v15 = vshrl.u32 %v130_v11, 16  ;;  %v144_v16 = vshll.u32 %v130_v11, 16  ;;  %v149_v17 = vshrl.u32 %v131_v13, 16  ;;  %v152_v18 = vshll.u32 %v131_v13, 16  ;;  %458 = vmatprep.subr.bf16.mxu0 %v6509_v8  ;;  %v133_v28 = vld [vmem:[%s9002_s18 + $0xc] sm:$0xf] }
  0x60   :  { %v158_v19 = vshrl.u32 %v132_v14, 16  ;;  %v161_v23 = vshll.u32 %v132_v14, 16  ;;  %v167_v31 = vshrl.u32 %v133_v28, 16  ;;  %v170_v41 = vshll.u32 %v133_v28, 16  ;;  %v134_v46 = vld [vmem:[%s9002_s18 + $0x10] sm:$0xf] }
  0x61   :  { %v143_v22 = vrot.slane %v141_v15, 7  ;;  %v151_v25 = vrot.slane %v149_v17, 7  ;;  %v135_v51 = vld [vmem:[%s9002_s18 + $0x14] sm:$0xf]  ;;  %121 = vst [vmem:[#allocation2 + $0x14] sm:$0x1] %v120_v50 }
  0x62   :  { %v160_v26 = vrot.slane %v158_v19, 7  ;;  %459 = vmatpush1.bf16.msra.mxu0 %v6511_v9  ;;  %v169_v40 = vrot.slane %v167_v31, 7  ;;  %v222_v47 = vld [vmem:[#allocation2] sm:$0xf]  ;;  %v136_v53 = vld [vmem:[%s9002_s18 + $0x18] sm:$0xf] }
  0x63   :  { %v147_v29 = vrot.slane %v143_v22, 4  ;;  %v146_v34 = vor.u32 %v144_v16, %v143_v22  ;;  %v154_v35 = vor.u32 %v152_v18, %v151_v25  ;;  %v156_v36 = vrot.slane %v151_v25, 4  ;;  %460 = vmatprep.subr.bf16.mxu0 %v6512_v21  ;;  %v229_v2 = vld [vmem:[#allocation2 + $0x10] sm:$0x1]  ;;  %v137_v10 = vld [vmem:[%s9002_s18 + $0x1c] sm:$0xf] }
  0x64   :  { %v163_v37 = vor.u32 %v161_v23, %v160_v26  ;;  %v165_v39 = vrot.slane %v160_v26, 4  ;;  %v172_v48 = vor.u32 %v170_v41, %v169_v40  ;;  %v174_v49 = vrot.slane %v169_v40, 4 }
  0x65   :  { %v155_v43 = vsel %vm7145_vm7, %v147_v29, %v154_v35  ;;  %v223_v52 = vsel %vm7156_vm8, %v146_v34, %v222_v47  ;;  %v176_v54 = vshrl.u32 %v134_v46, 16  ;;  %v179_v55 = vshll.u32 %v134_v46, 16 }
  0x66   :  { %v164_v44 = vsel %vm7145_vm7, %v156_v36, %v163_v37  ;;  %226 = vst.msk [vmem:[#allocation2 + $0x4] sm:$0xf] %vm220_vm6, %v155_v43  ;;  %461 = vmatpush1.bf16.msra.mxu0 %v6514_v32  ;;  %v184_v56 = vshrl.u32 %v135_v51, 16  ;;  %224 = vst [vmem:[#allocation2] sm:$0xf] %v223_v52  ;;  %v173_v58 = vsel %vm7145_vm7, %v165_v39, %v172_v48  ;;  %v187_v59 = vshll.u32 %v135_v51, 16 }
  0x67   :  { %227 = vst.msk [vmem:[#allocation2 + $0x8] sm:$0xf] %vm220_vm6, %v164_v44  ;;  %462 = vmatprep.subr.bf16.mxu0 %v6515_v33  ;;  %v193_v60 = vshrl.u32 %v136_v53, 16  ;;  %v196_v61 = vshll.u32 %v136_v53, 16  ;;  %228 = vst.msk [vmem:[#allocation2 + $0xc] sm:$0xf] %vm220_vm6, %v173_v58  ;;  %v230_v5 = vsel %vm7122_vm2, %v174_v49, %v229_v2 }
  0x68   :  { %v178_v62 = vrot.slane %v176_v54, 7  ;;  %v186_v63 = vrot.slane %v184_v56, 7  ;;  %vm263_vm9 = vsmask.f32 3328  ;;  %v128_v4 = vsel %vm7139_vm5, 0, %v127_v1 }
  0x69   :  { %v7182_v3 = vrot.slane %v193_v60, 7  ;;  %129 = vst [vmem:[#allocation2 + $0x24] sm:$0x1] %v128_v4  ;;  %vm264_vm10 = vsmask.f32 7440  ;;  %v202_v20 = vshrl.u32 %v137_v10, 16 }
  0x6a   :  { %463 = vmatpush1.bf16.msra.mxu0 %v6517_v42  ;;  %v181_v6 = vor.u32 %v179_v55, %v178_v62  ;;  %v182_v8 = vrot.slane %v178_v62, 4  ;;  %v189_v9 = vor.u32 %v187_v59, %v186_v63  ;;  %231 = vst [vmem:[#allocation2 + $0x10] sm:$0x1] %v230_v5  ;;  %v191_v11 = vrot.slane %v186_v63, 4  ;;  %v232_v19 = vld [vmem:[#allocation2 + $0x14] sm:$0xf]  ;;  %vm7218_vm14 = vmor %vm263_vm9, %vm264_vm10 }
  0x6b   :  { %617 = vmatprep.subr.bf16.mxu0 %v6520_v57  ;;  %v198_v12 = vor.u32 %v196_v61, %v7182_v3  ;;  %v205_v26 = vshll.u32 %v137_v10, 16  ;;  %v204_v39 = vrot.slane %v202_v20, 7  ;;  %v9010_v40 = vmov 0  ;;  %v6518_v2 = vld [vmem:[#allocation5] ss:$8 sps:$4 sm:$0xff]  }
  0x6c   :  { %v190_v15 = vsel %vm7145_vm7, %v182_v8, %v189_v9  ;;  %v233_v25 = vsel %vm7156_vm8, %v181_v6, %v232_v19  ;;  %v9011_v40 = vsel %vm7218_vm14, 4294967295, %v9010_v40  ;;  %v200_v45 = vrot.slane %v7182_v3, 4  ;;  %v6523_v9 = vld [vmem:[#allocation5 + $0x14] ss:$8 sps:$4 sm:$0xff]  }
  0x6d   :  { %v7192_v13 = vld [vmem:[#allocation2 + $0x4] sm:$0xf]  ;;  %235 = vst.msk [vmem:[#allocation2 + $0x18] sm:$0xf] %vm220_vm6, %v190_v15  ;;  %v7202_v21 = vld [vmem:[#allocation2] sm:$0xf]  ;;  %v199_v23 = vsel %vm7145_vm7, %v191_v11, %v198_v12  ;;  %v207_v49 = vor.u32 %v205_v26, %v204_v39 }
  0x6e   :  { %v7194_v14 = vld [vmem:[#allocation2 + $0x8] sm:$0xf]  ;;  %v276_v16 = vshll.u32 %v7192_v13, 16  ;;  %v280_v17 = vshrl.u32 %v7192_v13, 16  ;;  %v267_v27 = vshrl.u32 %v7202_v21, 16  ;;  %v270_v28 = vshll.u32 %v7202_v21, 16 }
  0x6f   :  { %v286_v18 = vshll.u32 %v7194_v14, 16  ;;  %v290_v22 = vshrl.u32 %v7194_v14, 16  ;;  %v7211_v31 = vld [vmem:[#allocation2 + $0xc] sm:$0xf]  ;;  %234 = vst [vmem:[#allocation2 + $0x14] sm:$0xf] %v233_v25  ;;  %v208_v1 = vsel %vm7145_vm7, %v200_v45, %v207_v49 }
  0x70   :  { %v278_v29 = vrot.slane %v276_v16, 5  ;;  %v282_v30 = vrot.slane %v280_v17, 4  ;;  %236 = vst.msk [vmem:[#allocation2 + $0x1c] sm:$0xf] %vm220_vm6, %v199_v23  ;;  %v296_v34 = vshll.u32 %v7211_v31, 16  ;;  %v300_v35 = vshrl.u32 %v7211_v31, 16 }
  0x71   :  { %v288_v32 = vrot.slane %v286_v18, 5  ;;  %v292_v33 = vrot.slane %v290_v22, 4  ;;  %v269_v36 = vrot.slane %v267_v27, 4  ;;  %v272_v37 = vrot.slane %v270_v28, 5  ;;  %9012 = vst [vmem:[#allocation19_spill] sm:$0xff] %v9011_v40 }
  0x72   :  { %v283_v38 = vor.u32 %v282_v30, %v278_v29  ;;  %v7222_v41 = vld [vmem:[#allocation2 + $0x10] sm:$0x1]  ;;  %v7224_v43 = vrot.slane %v296_v34, 5  ;;  %v302_v44 = vrot.slane %v300_v35, 4  ;;  %v701_v50 = vrot.slane %v7192_v13, 5 }
  0x73   :  { %v293_v42 = vor.u32 %v292_v33, %v288_v32  ;;  %v273_v46 = vor.u32 %v272_v37, %v269_v36  ;;  %v306_v48 = vshll.u32 %v7222_v41, 16  ;;  %v209_v54 = vrot.slane %v204_v39, 4  ;;  %v238_v59 = vld [vmem:[#allocation2 + $0x24] sm:$0x1]  ;;  %237 = vst.msk [vmem:[#allocation2 + $0x20] sm:$0xf] %vm220_vm6, %v208_v1 }
  0x74   :  { %v284_v47 = vrot.slane %v283_v38, 4  ;;  %v303_v52 = vor.u32 %v302_v44, %v7224_v43  ;;  %v7230_v53 = vld [vmem:[#allocation2 + $0x18] sm:$0xf]  ;;  %v704_v12 = vrot.slane %v7194_v14, 5  ;;  %v6521_v15 = vld [vmem:[#allocation5 + $0x10] ss:$8 sps:$4 sm:$0xff]  }
  0x75   :  { %v294_v51 = vrot.slane %v293_v42, 4  ;;  %v274_v55 = vrot.slane %v273_v46, 4  ;;  %v308_v57 = vrot.slane %v306_v48, 5  ;;  %v320_v58 = vshll.u32 %v7230_v53, 16  ;;  %v6526_v23 = vld [vmem:[#allocation5 + $0x24] ss:$8 sps:$4 sm:$0xff]  }
  0x76   :  { %v289_v56 = vsel %vm7218_vm14, %v284_v47, %v288_v32  ;;  %v304_v60 = vrot.slane %v303_v52, 4  ;;  %v7235_v61 = vld [vmem:[#allocation2 + $0x14] sm:$0xf]  ;;  %v324_v63 = vshrl.u32 %v7230_v53, 16  ;;  %v239_v18 = vsel %vm7122_vm2, %v209_v54, %v238_v59  ;;  %v690_v28 = vld [vmem:[#allocation2] sm:$0xe] }
  0x77   :  { %v7237_v62 = vld [vmem:[#allocation2 + $0x1c] sm:$0xf]  ;;  %v279_v3 = vsel %vm7218_vm14, %v274_v55, %v278_v29  ;;  %v311_v4 = vshrl.u32 %v7235_v61, 16  ;;  %v314_v5 = vshll.u32 %v7235_v61, 16  ;;  %v7246_v6 = vrot.slane %v320_v58, 5 }
  0x78   :  { %v5843_v8 = vcombine.low %v279_v3, %v289_v56  ;;  %v326_v10 = vrot.slane %v324_v63, 4  ;;  %v330_v11 = vshll.u32 %v7237_v62, 16  ;;  %v9013_v19 = vmov 0  ;;  %240 = vst [vmem:[#allocation2 + $0x24] sm:$0x1] %v239_v18 }
  0x79   :  { %v313_v16 = vrot.slane %v311_v4, 4  ;;  %v316_v17 = vrot.slane %v314_v5, 5  ;;  %v9014_v19 = vsel %vm7255_vm15, 4294967295, %v9013_v19  ;;  %v299_v20 = vsel %vm7218_vm14, %v294_v51, %v7224_v43  ;;  %v691_v36 = vld [vmem:[#allocation2 + $0x14] sm:$0xe] }
  0x7a   :  { %9015 = vst [vmem:[#allocation20_spill] sm:$0xff] %v9014_v19  ;;  %5859 = vmatmul.mubr.msk.bf16.vlgmr.msra.gmra.mrb[0].mxu0 %vm439_vm13, %v5843_v8  ;;  %v309_v22 = vsel %vm7218_vm14, %v304_v60, %v308_v57  ;;  %v327_v25 = vor.u32 %v326_v10, %v7246_v6  ;;  %v334_v7 = vshrl.u32 %v7237_v62, 16  ;;  %v332_v27 = vrot.slane %v330_v11, 5  ;;  %v6524_v37 = vld [vmem:[#allocation5 + $0x20] ss:$8 sps:$4 sm:$0xff]  }
  0x7b   :  { %618 = vmatpush1.bf16.msra.mxu0 %v6518_v2  ;;  %494 = vmatprep.mubr.bf16.mxu0 %v8959_v0  ;;  %v317_v26 = vor.u32 %v316_v17, %v313_v16  ;;  %v703_v29 = vrot.slane %v701_v50, 4  ;;  %v706_v30 = vrot.slane %v704_v12, 4  ;;  %v5883_v34 = vrot.slane %v690_v28, 9  ;;  %v6529_v45 = vld [vmem:[#allocation5 + $0x34] ss:$8 sps:$4 sm:$0xff]  }
  0x7c   :  { %619 = vmatprep.subr.bf16.mxu0 %v6523_v9  ;;  %v328_v32 = vrot.slane %v327_v25, 4  ;;  %v336_v33 = vrot.slane %v334_v7, 4  ;;  %v707_v35 = vrot.slane %v7211_v31, 5  ;;  %v710_v42 = vrot.slane %v7222_v41, 5  ;;  %v7274_v46 = vld [vmem:[#allocation2 + $0x20] sm:$0xf] }
  0x7d   :  { %v318_v38 = vrot.slane %v317_v26, 4  ;;  %v7271_v39 = vsel %vm7255_vm15, %v703_v29, %v704_v12  ;;  %v5884_v43 = vrot.slane %v691_v36, 9  ;;  %v5844_v44 = vcombine.low %v299_v20, %v309_v22  ;;  %v6532_v1 = vld [vmem:[#allocation5 + $0x44] ss:$8 sps:$4 sm:$0xff]   ;;  %v6530_v18 = vld [vmem:[#allocation5 + $0x40] ss:$8 sps:$4 sm:$0xff]  }
  0x7e   :  { %v337_v47 = vor.u32 %v336_v33, %v332_v27  ;;  %v7278_v48 = vsel %vm7255_vm15, %v5883_v34, %v701_v50  ;;  %v7282_v49 = vsel %vm7255_vm15, %v706_v30, %v707_v35  ;;  %v340_v51 = vshll.u32 %v7274_v46, 16  ;;  %v6527_v50 = vld [vmem:[#allocation5 + $0x30] ss:$8 sps:$4 sm:$0xff]   ;;  %v6538_v29 = vld [vmem:[#allocation5 + $0xc4] ss:$8 sps:$4 sm:$0xff]  }
  0x7f   :  { %620 = vmatpush1.bf16.msra.mxu0 %v6521_v15  ;;  %v344_v52 = vshrl.u32 %v7274_v46, 16  ;;  %v333_v41 = vsel %vm7218_vm14, %v328_v32, %v332_v27  ;;  %v5885_v55 = vcombine.low %v7278_v48, %v7271_v39  ;;  %v709_v56 = vrot.slane %v707_v35, 4  ;;  %v262_v57 = vld [vmem:[#allocation2 + $0x24] sm:$0x1]  ;;  %v6533_v28 = vld [vmem:[#allocation5 + $0x50] ss:$8 sps:$4 sm:$0xff]  }
  0x80   :  { %621 = vmatprep.subr.bf16.mxu0 %v6526_v23  ;;  %v338_v54 = vrot.slane %v337_v47, 4  ;;  %v342_v58 = vrot.slane %v340_v51, 5  ;;  %v714_v60 = vrot.slane %v7230_v53, 5  ;;  %v717_v63 = vrot.slane %v7237_v62, 5  ;;  %v6536_v34 = vld [vmem:[#allocation5 + $0xc0] ss:$8 sps:$4 sm:$0xff]  }
  0x81   :  { %v346_v59 = vrot.slane %v344_v52, 4  ;;  %v350_v2 = vshll.u32 %v262_v57, 16  ;;  %v7295_v3 = vsel %vm7255_vm15, %v709_v56, %v710_v42  ;;  %v720_v4 = vrot.slane %v7274_v46, 5  ;;  %v6541_v36 = vld [vmem:[#allocation5 + $0xd4] ss:$8 sps:$4 sm:$0xff]  }
  0x82   :  { %5860 = vmatmul.mubr.msk.bf16.gmra.mrb[4].mxu0 %vm439_vm13, %v5844_v44  ;;  %v723_v5 = vrot.slane %v262_v57, 5  ;;  %v323_v8 = vsel %vm7218_vm14, %v318_v38, %v7246_v6  ;;  %v5886_v10 = vcombine.low %v7282_v49, %v7295_v3  ;;  %v716_v11 = vrot.slane %v714_v60, 4  ;;  %v6535_v6 = vld [vmem:[#allocation5 + $0x54] ss:$8 sps:$4 sm:$0xff]   ;;  %v6544_v38 = vld [vmem:[#allocation5 + $0xe4] ss:$8 sps:$4 sm:$0xff]  }
  0x83   :  { %622 = vmatpush1.bf16.msra.mxu0 %v6524_v37  ;;  %504 = vmatprep.mubr.bf16.mxu0 %v8959_v0  ;;  %v347_v9 = vor.u32 %v346_v59, %v342_v58  ;;  %v352_v12 = vrot.slane %v350_v2, 5  ;;  %v7306_v15 = vsel %vm7255_vm15, %v5884_v43, %v714_v60  ;;  %v719_v16 = vrot.slane %v717_v63, 4  ;;  %v6539_v37 = vld [vmem:[#allocation5 + $0xd0] ss:$8 sps:$4 sm:$0xff]   ;;  %v6542_v42 = vld [vmem:[#allocation5 + $0xe0] ss:$8 sps:$4 sm:$0xff]  }
  0x84   :  { %623 = vmatprep.subr.bf16.mxu0 %v6529_v45  ;;  %v722_v17 = vrot.slane %v720_v4, 4  ;;  %v718_v22 = vsel %vm7255_vm15, %v716_v11, %v717_v63  ;;  %v5845_v23 = vcombine.low %v323_v8, %v333_v41  ;;  %v343_v30 = vsel %vm7218_vm14, %v338_v54, %v342_v58  ;;  %v6547_v44 = vld [vmem:[#allocation5 + $0xf4] ss:$8 sps:$4 sm:$0xff]   ;;  %v6545_v45 = vld [vmem:[#allocation5 + $0xf0] ss:$8 sps:$4 sm:$0xff]  }
  0x85   :  { %v348_v20 = vrot.slane %v347_v9, 4  ;;  %v5887_v25 = vcombine.low %v7306_v15, %v718_v22  ;;  %v721_v7 = vsel %vm7255_vm15, %v719_v16, %v720_v4  ;;  %v5863_v35 = vcombine.low %v7202_v21, %v7192_v13  ;;  %v6550_v13 = vld [vmem:[#allocation5 + $0x104] ss:$8 sps:$4 sm:$0xff]   ;;  %v6548_v21 = vld [vmem:[#allocation5 + $0x100] ss:$8 sps:$4 sm:$0xff]   ;;  %v6558_v2 = vld [vmem:[#allocation8 + $0x50] sm:$0xff]  }
  0x86   :  { %v724_v26 = vsel %vm7255_vm15, %v722_v17, %v723_v5  ;;  %v5864_v43 = vcombine.low %v7194_v14, %v7211_v31  ;;  %v5865_v47 = vcombine.low %v7235_v61, %v7230_v53  ;;  %v6553_v51 = vld [vmem:[#allocation5 + $0x114] ss:$8 sps:$4 sm:$0xff]   ;;  %v6551_v52 = vld [vmem:[#allocation5 + $0x110] ss:$8 sps:$4 sm:$0xff]   ;;  %v5866_v14 = vcombine.low %v7237_v62, %v7274_v46  ;;  %v6554_v31 = vld [vmem:[#allocation8 + $0x40] sm:$0xff]  }
  0x87   :  { %624 = vmatpush1.bf16.msra.mxu0 %v6527_v50  ;;  %v5888_v27 = vcombine.low %v721_v7, %v724_v26  ;;  %v353_v32 = vsel %vm7218_vm14, %v348_v20, %v352_v12  ;;  %v6555_v53 = vld [vmem:[#allocation8] sm:$0xff]   ;;  %6225 = vmatprep.subr.bf16.mxu1 %v6554_v31  ;;  %v6556_v61 = vld [vmem:[#allocation8 + $0x48] sm:$0xff]   ;;  %v913_v39 = vlaneseq  ;;  %v911_v49 = vld [vmem:[%s8936_s2] sm:$0x3]  ;;  %v6960_v56 = vmov 1983009808  }
  0x88   :  { %625 = vmatprep.subr.bf16.mxu0 %v6532_v1  ;;  %v5846_v33 = vcombine.low %v343_v30, %v353_v32  ;;  %6226 = vmatpush3.bf16.msra.mxu1 %v6555_v53  ;;  %v6557_v62 = vld [vmem:[#allocation8 + $0x8] sm:$0xff]   ;;  %v939_v54 = vld [vmem:[%s8937_s3] sm:$0x3]  ;;  %v1002_v50 = vunpack.c.l.s4 %v6960_v56  ;;  %v6562_v32 = vld [vmem:[#allocation8 + $0x60] sm:$0xff]   ;;  %vm2136_vm2 = vcmask 1041409   ;;  %vm2138_vm4 = vcmask 1042434  }
  0x89   :  { %6227 = vmatprep.subr.bf16.mxu1 %v6556_v61  ;;  %v7352_v46 = vshrl.u32 %v913_v39, 7  ;;  %v6559_v8 = vld [vmem:[#allocation8 + $0x10] sm:$0xff]   ;;  %v6565_v61 = vld [vmem:[#allocation8 + $0x28] sm:$0xff]   ;;  %vm2140_vm5 = vcmask 1043459   ;;  %vm2142_vm6 = vcmask 1044484   ;;  %vm2144_vm8 = vcmask 1045509  }
  0x8a   :  { %5861 = vmatmul.mubr.msk.bf16.gmra.mrb[8].mxu0 %vm439_vm13, %v5845_v23  ;;  %v1003_v3 = vunpack.c.0.s8 %v1002_v50  ;;  %vm2146_vm9 = vcmask 1046534   ;;  %vm2148_vm10 = vcmask 1047559   ;;  %vm2534_vm11 = vcmask 1040384  }
  0x8b   :  { %626 = vmatpush1.bf16.msra.mxu0 %v6530_v18  ;;  %514 = vmatprep.mubr.bf16.mxu0 %v8959_v0  ;;  %9016 = vst [vmem:[#allocation21_spill] sm:$0xff] %v7352_v46  ;;  %v7355_v48 = vsub.s32 0, %v7352_v46  ;;  %v7361_v41 = vsub.s32 1, %v7352_v46  ;;  %v6560_v18 = vld [vmem:[#allocation8 + $0x58] sm:$0xff]   ;;  %vm8023_vm12 = vmand %vm2534_vm11, %vm114_vm1  ;;  %vm2601_vm1 = vcmask 1043456  }
  0x8c   :  { %627 = vmatprep.subr.bf16.mxu0 %v6535_v6  ;;  %6228 = vmatpush3.bf16.msra.mxu1 %v6557_v62  ;;  %v7386_v20 = vsub.s32 %v1003_v3, %v7352_v46  ;;  %v6561_v6 = vld [vmem:[#allocation8 + $0x18] sm:$0xff]  }
  0x8d   :  { %9017 = vst [vmem:[#allocation22_spill] sm:$0xff] %v7355_v48  ;;  %9018 = vst [vmem:[#allocation23_spill] sm:$0xff] %v7361_v41  ;;  %v7370_v57 = vrot.slane %v911_v49, %v7361_v41  ;;  %v7373_v58 = vrot.slane %v939_v54, %v7355_v48  ;;  %v7376_v60 = vrot.slane %v939_v54, %v7361_v41  ;;  %6229 = vmatprep.subr.bf16.mxu1 %v6558_v2 }
  0x8e   :  { %9019 = vst [vmem:[#allocation24_spill] sm:$0xff] %v7386_v20 }
  0x8f   :  { %628 = vmatpush1.bf16.msra.mxu0 %v6533_v28 }
  0x90   :  { %822 = vmatprep.subr.bf16.mxu0 %v6538_v29  ;;  %6230 = vmatpush3.bf16.msra.mxu1 %v6559_v8 }
  0x91   :  { %6231 = vmatprep.subr.bf16.mxu1 %v6560_v18 }
  0x92   :  { %5862 = vmatmul.mubr.msk.bf16.gmra.mrb[12].mxu0 %vm439_vm13, %v5846_v33 }
  0x93   :  { %649 = vmatprep.mubr.bf16.mxu0 %v8959_v0 }
  0x94   :  { %6232 = vmatpush3.bf16.msra.mxu1 %v6561_v6 }
  0x95   :  { %6233 = vmatprep.subr.bf16.mxu1 %v6562_v32 }
  0x9a   :  { %5879 = vmatmul.mubr.msk.bf16.vlgmr.msra.gmra.mrb[0].mxu0 %vm439_vm13, %v5863_v35 }
  0x9b   :  { %823 = vmatpush1.bf16.msra.mxu0 %v6536_v34  ;;  %659 = vmatprep.mubr.bf16.mxu0 %v8959_v0 }
  0x9c   :  { %824 = vmatprep.subr.bf16.mxu0 %v6541_v36 }
  0x9f   :  { %825 = vmatpush1.bf16.msra.mxu0 %v6539_v37 }
  0xa0   :  { %826 = vmatprep.subr.bf16.mxu0 %v6544_v38  ;;  %v6563_v38 = vld [vmem:[#allocation8 + $0x20] sm:$0xff]  }
  0xa1   :  { %6234 = vmatpush3.bf16.msra.mxu1 %v6563_v38 }
  0xa2   :  { %5880 = vmatmul.mubr.msk.bf16.gmra.mrb[4].mxu0 %vm439_vm13, %v5864_v43 }
  0xa3   :  { %827 = vmatpush1.bf16.msra.mxu0 %v6542_v42  ;;  %669 = vmatprep.mubr.bf16.mxu0 %v8959_v0 }
  0xa4   :  { %828 = vmatprep.subr.bf16.mxu0 %v6547_v44 }
  0xa7   :  { %829 = vmatpush1.bf16.msra.mxu0 %v6545_v45 }
  0xa8   :  { %830 = vmatprep.subr.bf16.mxu0 %v6550_v13 }
  0xaa   :  { %5881 = vmatmul.mubr.msk.bf16.gmra.mrb[8].mxu0 %vm439_vm13, %v5865_v47 }
  0xab   :  { %831 = vmatpush1.bf16.msra.mxu0 %v6548_v21  ;;  %679 = vmatprep.mubr.bf16.mxu0 %v8959_v0 }
  0xac   :  { %832 = vmatprep.subr.bf16.mxu0 %v6553_v51  ;;  %v6564_v51 = vld [vmem:[#allocation8 + $0x68] sm:$0xff]  }
  0xad   :  { %6235 = vmatprep.subr.bf16.mxu1 %v6564_v51 }
  0xae   :  { %6236 = vmatpush3.bf16.msra.mxu1 %v6565_v61 }
  0xaf   :  { %833 = vmatpush1.bf16.msra.mxu0 %v6551_v52 }
  0xb2   :  { %5882 = vmatmul.mubr.msk.bf16.gmra.mrb[12].mxu0 %vm439_vm13, %v5866_v14 }
  0xb3   :  { %854 = vmatprep.mubr.bf16.mxu0 %v8959_v0 }
  0xba   :  { %5901 = vmatmul.mubr.msk.bf16.vlgmr.msra.gmra.mrb[0].mxu0 %vm439_vm13, %v5885_v55  ;;  %v7367_v55 = vrot.slane %v911_v49, %v7355_v48 }
  0xbb   :  { %864 = vmatprep.mubr.bf16.mxu0 %v8959_v0 }
  0xc2   :  { %5902 = vmatmul.mubr.msk.bf16.gmra.mrb[4].mxu0 %vm439_vm13, %v5886_v10 }
  0xc3   :  { %874 = vmatprep.mubr.bf16.mxu0 %v8959_v0 }
  0xca   :  { %5903 = vmatmul.mubr.msk.bf16.gmra.mrb[8].mxu0 %vm439_vm13, %v5887_v25 }
  0xcb   :  { %884 = vmatprep.mubr.bf16.mxu0 %v8959_v0 }
  0xd2   :  { %5904 = vmatmul.mubr.msk.bf16.gmra.mrb[12].mxu0 %vm439_vm13, %v5888_v27  ;;  %vm8030_vm13 = vmand %vm2534_vm11, %vm122_vm3 }
  0xd3   :  { %vm8092_vm11 = vmand %vm2601_vm1, %vm122_vm3  ;;  %vm6963_vm3 = vmmov 0  }
 0x18d   :  { %v856_v59 = vpop.f32.mrb[0].mxu0 }
 0x18e   :  { %v923_v63 = vmul.f32 %v7367_v55, %v856_v59  ;;  %v858_v1 = vpop.f32.mrb[1].mxu0 }
 0x18f   :  { %v924_v4 = vmul.f32 %v7370_v57, %v858_v1  ;;  %v860_v5 = vpop.f32.mrb[2].mxu0 }
 0x190   :  { %v951_v9 = vadd.f32 %v7373_v58, %v923_v63  ;;  %v925_v10 = vmul.f32 %v7367_v55, %v860_v5  ;;  %v862_v11 = vpop.f32.mrb[3].mxu0 }
 0x191   :  { %v952_v12 = vadd.f32 %v7376_v60, %v924_v4  ;;  %v926_v15 = vmul.f32 %v7370_v57, %v862_v11 }
 0x192   :  { %v967_v16 = vmax.f32 %v951_v9, 0.0  ;;  %v953_v17 = vadd.f32 %v7373_v58, %v925_v10  ;;  %v6566_v9 = vld [vmem:[#allocation8 + $0x70] sm:$0xff]  }
 0x193   :  { %v968_v22 = vmax.f32 %v952_v12, 0.0  ;;  %v954_v23 = vadd.f32 %v7376_v60, %v926_v15  ;;  %6237 = vmatprep.subr.bf16.mxu1 %v6566_v9 }
 0x194   :  { %v969_v25 = vmax.f32 %v953_v17, 0.0  ;;  %v6567_v17 = vld [vmem:[#allocation8 + $0x30] sm:$0xff]  }
 0x195   :  { %v999_v7 = vcombine.low %v967_v16, %v968_v22  ;;  %v1000_v26 = vcombine.high %v967_v16, %v968_v22  ;;  %v970_v27 = vmax.f32 %v954_v23, 0.0  ;;  %v866_v28 = vpop.f32.mrb[4].mxu0  ;;  %6238 = vmatpush3.bf16.msra.mxu1 %v6567_v17 }
 0x196   :  { %v927_v29 = vmul.f32 %v7367_v55, %v866_v28  ;;  %v868_v30 = vpop.f32.mrb[5].mxu0 }
 0x197   :  { %v1007_v33 = vrot.slane %v999_v7, %v7386_v20  ;;  %v1014_v34 = vrot.slane %v1000_v26, %v7386_v20  ;;  %v1017_v35 = vcombine.low %v969_v25, %v970_v27  ;;  %v1018_v36 = vcombine.high %v969_v25, %v970_v27  ;;  %v7392_v37 = vpop.f32.mrb[6].mxu0 }
 0x198   :  { %v7394_v42 = vpop.f32.mrb[7].mxu0  ;;  %v7399_v21 = vadd.f32 %v7373_v58, %v927_v29  ;;  %v7402_v47 = vmul.f32 %v7370_v57, %v868_v30 }
 0x199   :  { %v1015_v43 = vcombine.high %v1007_v33, %v1007_v33  ;;  %v1016_v44 = vcombine.high %v1014_v34, %v1014_v34  ;;  %v1149_v45 = vrot.slane %v1007_v33, %v7386_v20  ;;  %v1165_v13 = vrot.slane %v1014_v34, %v7386_v20  ;;  %v6568_v34 = vld [vmem:[#allocation8 + $0x78] sm:$0xff]  }
 0x19a   :  { %v7409_v49 = vrot.slane %v1017_v35, %v7386_v20  ;;  %v7412_v54 = vrot.slane %v1018_v36, %v7386_v20  ;;  %6239 = vmatprep.subr.bf16.mxu1 %v6568_v34 }
 0x19b   :  { %v1150_v52 = vcombine.high %v1149_v45, %v1149_v45  ;;  %v1157_v14 = vrot.slane %v1015_v43, %v7386_v20  ;;  %v1166_v31 = vcombine.high %v1165_v13, %v1165_v13  ;;  %v1173_v53 = vrot.slane %v1016_v44, %v7386_v20  ;;  %v6569_v44 = vld [vmem:[#allocation8 + $0x38] sm:$0xff]  }
 0x19c   :  { %v1464_v62 = vsel %vm1463_vm0, %v1149_v45, -inf  ;;  %v1492_v39 = vsel %vm1463_vm0, %v1165_v13, -inf  ;;  %6240 = vmatpush3.bf16.msra.mxu1 %v6569_v44  ;;  %v1197_v44 = vrot.slane %v7412_v54, %v7386_v20 }
 0x19d   :  { %v1158_v56 = vcombine.high %v1157_v14, %v1157_v14  ;;  %v1174_v50 = vcombine.high %v1173_v53, %v1173_v53  ;;  %v1465_v59 = vrot.slane %v1464_v62, 4  ;;  %v1471_v63 = vsel %vm1463_vm0, %v1150_v52, -inf  ;;  %v7415_v1 = vpop.f32.mrb[8].mxu0 }
 0x19e   :  { %v1472_v2 = vrot.slane %v1471_v63, 4  ;;  %v1478_v3 = vsel %vm1463_vm0, %v1157_v14, -inf  ;;  %v1493_v4 = vrot.slane %v1492_v39, 4  ;;  %v1499_v5 = vsel %vm1463_vm0, %v1166_v31, -inf  ;;  %v7419_v8 = vpop.f32.mrb[9].mxu0 }
 0x19f   :  { %v1466_v10 = vmax.f32 %v1464_v62, %v1465_v59  ;;  %v1479_v11 = vrot.slane %v1478_v3, 4  ;;  %v1485_v12 = vsel %vm1463_vm0, %v1158_v56, -inf  ;;  %v1500_v15 = vrot.slane %v1499_v5, 4  ;;  %v7422_v16 = vpop.f32.mrb[10].mxu0 }
 0x1a0   :  { %v1473_v18 = vmax.f32 %v1471_v63, %v1472_v2  ;;  %v1486_v22 = vrot.slane %v1485_v12, 4  ;;  %v1494_v23 = vmax.f32 %v1492_v39, %v1493_v4  ;;  %v1506_v6 = vsel %vm1463_vm0, %v1173_v53, -inf  ;;  %v7425_v25 = vpop.f32.mrb[11].mxu0 }
 0x1a1   :  { %v1467_v7 = vrot.slane %v1466_v10, 2  ;;  %v1480_v26 = vmax.f32 %v1478_v3, %v1479_v11  ;;  %v1501_v27 = vmax.f32 %v1499_v5, %v1500_v15  ;;  %v1507_v28 = vrot.slane %v1506_v6, 4 }
 0x1a2   :  { %v1474_v29 = vrot.slane %v1473_v18, 2  ;;  %v1487_v30 = vmax.f32 %v1485_v12, %v1486_v22  ;;  %v1495_v32 = vrot.slane %v1494_v23, 2  ;;  %v1513_v33 = vsel %vm1463_vm0, %v1174_v50, -inf }
 0x1a3   :  { %v1468_v35 = vmax.f32 %v1466_v10, %v1467_v7  ;;  %v1481_v36 = vrot.slane %v1480_v26, 2  ;;  %v1502_v38 = vrot.slane %v1501_v27, 2  ;;  %v1508_v43 = vmax.f32 %v1506_v6, %v1507_v28 }
 0x1a4   :  { %v1475_v45 = vmax.f32 %v1473_v18, %v1474_v29  ;;  %v1488_v13 = vrot.slane %v1487_v30, 2  ;;  %v1496_v51 = vmax.f32 %v1494_v23, %v1495_v32  ;;  %v1514_v52 = vrot.slane %v1513_v33, 4 }
 0x1a5   :  { %v1469_v14 = vrot.slane %v1468_v35, 1  ;;  %v1482_v31 = vmax.f32 %v1480_v26, %v1481_v36  ;;  %v1503_v53 = vmax.f32 %v1501_v27, %v1502_v38  ;;  %v1509_v61 = vrot.slane %v1508_v43, 2  ;;  %v7428_v62 = vpop.f32.mrb[12].mxu0 }
 0x1a6   :  { %v1476_v39 = vrot.slane %v1475_v45, 1  ;;  %v1489_v56 = vmax.f32 %v1487_v30, %v1488_v13  ;;  %v1497_v50 = vrot.slane %v1496_v51, 1  ;;  %v1515_v59 = vmax.f32 %v1513_v33, %v1514_v52  ;;  %v7430_v63 = vpop.f32.mrb[13].mxu0 }
 0x1a7   :  { %v1470_v2 = vmax.f32 %v1468_v35, %v1469_v14  ;;  %v1483_v3 = vrot.slane %v1482_v31, 1  ;;  %v1504_v4 = vrot.slane %v1503_v53, 1  ;;  %v1510_v5 = vmax.f32 %v1508_v43, %v1509_v61  ;;  %v7432_v9 = vpop.f32.mrb[14].mxu0 }
 0x1a8   :  { %v1477_v10 = vmax.f32 %v1475_v45, %v1476_v39  ;;  %v1490_v11 = vrot.slane %v1489_v56, 1  ;;  %v1498_v12 = vmax.f32 %v1496_v51, %v1497_v50  ;;  %v1516_v15 = vrot.slane %v1515_v59, 2  ;;  %v7434_v17 = vpop.f32.mrb[15].mxu0 }
 0x1a9   :  { %v1484_v18 = vmax.f32 %v1482_v31, %v1483_v3  ;;  %v7436_v22 = vmax.f32 %v1503_v53, %v1504_v4  ;;  %v1511_v23 = vrot.slane %v1510_v5, 1  ;;  %v1033_v6 = vcombine.high %v7409_v49, %v7409_v49 }
 0x1aa   :  { %v1912_v7 = vpack.c.bf16 %v1470_v2, %v1470_v2  ;;  %v1034_v26 = vcombine.high %v7412_v54, %v7412_v54  ;;  %v929_v27 = vmul.f32 %v7367_v55, %v7392_v37  ;;  %v7444_v28 = vmax.f32 %v1489_v56, %v1490_v11 }
 0x1ab   :  { %v7446_v29 = vmax.f32 %v1515_v59, %v1516_v15  ;;  %v971_v30 = vmax.f32 %v7399_v21, 0.0  ;;  %v956_v32 = vadd.f32 %v7376_v60, %v7402_v47  ;;  %v7451_v33 = vmax.f32 %v1510_v5, %v1511_v23 }
 0x1ac   :  { %v1913_v34 = vpack.c.bf16 %v1477_v10, %v1477_v10  ;;  %v1916_v35 = vpack.c.bf16 %v1498_v12, %v1498_v12  ;;  %v1181_v36 = vrot.slane %v7409_v49, %v7386_v20  ;;  %v1914_v38 = vpack.c.bf16 %v1484_v18, %v1484_v18 }
 0x1ad   :  { %9020 = vst [vmem:[#allocation25_spill] sm:$0xff] %v7451_v33  ;;  %v1189_v43 = vrot.slane %v1033_v6, %v7386_v20  ;;  %v7460_v21 = vunpack.c.l.b16 %v1912_v7  ;;  %v7463_v47 = vrot.slane %v1034_v26, %v7386_v20  ;;  %v1198_v52 = vcombine.high %v1197_v44, %v1197_v44 }
 0x1ae   :  { %v1182_v45 = vcombine.high %v1181_v36, %v1181_v36  ;;  %v1520_v13 = vsel %vm1463_vm0, %v1181_v36, -inf  ;;  %v1548_v61 = vsel %vm1463_vm0, %v1197_v44, -inf  ;;  %v972_v39 = vmax.f32 %v956_v32, 0.0 }
 0x1af   :  { %9021 = vst [vmem:[#allocation26_spill] sm:$0xff] %v7460_v21  ;;  %v1190_v51 = vcombine.high %v1189_v43, %v1189_v43  ;;  %v1521_v49 = vrot.slane %v1520_v13, 4  ;;  %v1534_v14 = vsel %vm1463_vm0, %v1189_v43, -inf  ;;  %v1549_v59 = vrot.slane %v1548_v61, 4 }
 0x1b0   :  { %v1527_v31 = vsel %vm1463_vm0, %v1182_v45, -inf  ;;  %v1535_v53 = vrot.slane %v1534_v14, 4  ;;  %v1555_v5 = vsel %vm1463_vm0, %v1198_v52, -inf  ;;  %v7473_v10 = vunpack.c.l.b16 %v1913_v34 }
 0x1b1   :  { %v1522_v54 = vmax.f32 %v1520_v13, %v1521_v49  ;;  %v1528_v56 = vrot.slane %v1527_v31, 4  ;;  %v1541_v50 = vsel %vm1463_vm0, %v1190_v51, -inf  ;;  %v7475_v11 = vunpack.c.l.b16 %v1916_v35 }
 0x1b2   :  { %v1536_v3 = vmax.f32 %v1534_v14, %v1535_v53  ;;  %v1542_v4 = vrot.slane %v1541_v50, 4  ;;  %v7481_v23 = vunpack.c.l.b16 %v1914_v38  ;;  %v7485_v6 = vsel %vm1463_vm0, %v7463_v47, -inf }
 0x1b3   :  { %9022 = vst [vmem:[#allocation27_spill] sm:$0xff] %v7475_v11  ;;  %v1523_v12 = vrot.slane %v1522_v54, 2  ;;  %v7477_v15 = vmax.f32 %v1527_v31, %v1528_v56  ;;  %v1035_v7 = vcombine.low %v971_v30, %v972_v39  ;;  %v7487_v36 = vmax.f32 %v1548_v61, %v1549_v59 }
 0x1b4   :  { %9023 = vst [vmem:[#allocation28_spill] sm:$0xff] %v7481_v23  ;;  %v1537_v32 = vrot.slane %v1536_v3, 2  ;;  %v1556_v34 = vrot.slane %v1555_v5, 4  ;;  %v7491_v43 = vmax.f32 %v1541_v50, %v1542_v4  ;;  %v1036_v44 = vcombine.high %v971_v30, %v972_v39  ;;  %v6570_v4 = vld [vmem:[#allocation8 + $0xc0] sm:$0xff]  }
 0x1b5   :  { %v1524_v26 = vmax.f32 %v1522_v54, %v1523_v12  ;;  %v1043_v45 = vrot.slane %v1035_v7, %v7386_v20  ;;  %v7497_v52 = vadd.f32 %v7373_v58, %v929_v27  ;;  %v930_v53 = vmul.f32 %v7370_v57, %v7394_v42  ;;  %6253 = vmatprep.subr.bf16.mxu1 %v6570_v4 }
 0x1b6   :  { %v1050_v49 = vrot.slane %v1036_v44, %v7386_v20  ;;  %v7505_v30 = vmax.f32 %v1536_v3, %v1537_v32  ;;  %v7508_v54 = vmax.f32 %v1555_v5, %v1556_v34  ;;  %v7519_v3 = vmul.f32 %v7367_v55, %v7415_v1 }
 0x1b7   :  { %v1525_v38 = vrot.slane %v1524_v26, 1  ;;  %v1051_v14 = vcombine.high %v1043_v45, %v1043_v45  ;;  %v1213_v31 = vrot.slane %v1043_v45, %v7386_v20  ;;  %v7515_v42 = vadd.f32 %v7376_v60, %v930_v53 }
 0x1b8   :  { %9025 = vst [vmem:[#allocation30_spill] sm:$0xff] %v7505_v30  ;;  %v1052_v56 = vcombine.high %v1050_v49, %v1050_v49  ;;  %v1229_v59 = vrot.slane %v1050_v49, %v7386_v20 }
 0x1b9   :  { %v7503_v61 = vmax.f32 %v1524_v26, %v1525_v38  ;;  %v1214_v50 = vcombine.high %v1213_v31, %v1213_v31  ;;  %v1221_v27 = vrot.slane %v1051_v14, %v7386_v20  ;;  %v1576_v12 = vsel %vm1463_vm0, %v1213_v31, -inf }
 0x1ba   :  { %v1230_v26 = vcombine.high %v1229_v59, %v1229_v59  ;;  %v1237_v32 = vrot.slane %v1052_v56, %v7386_v20  ;;  %v1577_v34 = vrot.slane %v1576_v12, 4  ;;  %v1604_v38 = vsel %vm1463_vm0, %v1229_v59, -inf }
 0x1bb   :  { %9024 = vst [vmem:[#allocation29_spill] sm:$0xff] %v7503_v61  ;;  %v1222_v5 = vcombine.high %v1221_v27, %v1221_v27  ;;  %v1583_v44 = vsel %vm1463_vm0, %v1214_v50, -inf  ;;  %v1590_v45 = vsel %vm1463_vm0, %v1221_v27, -inf  ;;  %v974_v49 = vmax.f32 %v7515_v42, 0.0 }
 0x1bc   :  { %v1238_v14 = vcombine.high %v1237_v32, %v1237_v32  ;;  %v1578_v31 = vmax.f32 %v1576_v12, %v1577_v34  ;;  %v1584_v53 = vrot.slane %v1583_v44, 4  ;;  %v1591_v0 = vrot.slane %v1590_v45, 4 }
 0x1bd   :  { %v1597_v1 = vsel %vm1463_vm0, %v1222_v5, -inf  ;;  %v1605_v18 = vrot.slane %v1604_v38, 4  ;;  %v1611_v37 = vsel %vm1463_vm0, %v1230_v26, -inf  ;;  %v1618_v56 = vsel %vm1463_vm0, %v1237_v32, -inf }
 0x1be   :  { %v1579_v4 = vrot.slane %v1578_v31, 2  ;;  %v1585_v2 = vmax.f32 %v1583_v44, %v1584_v53  ;;  %v1592_v50 = vmax.f32 %v1590_v45, %v1591_v0  ;;  %v1598_v35 = vrot.slane %v1597_v1, 4 }
 0x1bf   :  { %v1606_v27 = vmax.f32 %v1604_v38, %v1605_v18  ;;  %v1612_v7 = vrot.slane %v1611_v37, 4  ;;  %v1619_v59 = vrot.slane %v1618_v56, 4  ;;  %v1625_v42 = vsel %vm1463_vm0, %v1238_v14, -inf }
 0x1c0   :  { %v1580_v39 = vmax.f32 %v1578_v31, %v1579_v4  ;;  %v1586_v12 = vrot.slane %v1585_v2, 2  ;;  %v1593_v34 = vrot.slane %v1592_v50, 2  ;;  %v1599_v13 = vmax.f32 %v1597_v1, %v1598_v35 }
 0x1c1   :  { %v1607_v51 = vrot.slane %v1606_v27, 2  ;;  %v1613_v5 = vmax.f32 %v1611_v37, %v1612_v7  ;;  %v1620_v46 = vmax.f32 %v1618_v56, %v1619_v59  ;;  %v1626_v41 = vrot.slane %v1625_v42, 4 }
 0x1c2   :  { %v1581_v26 = vrot.slane %v1580_v39, 1  ;;  %v1587_v48 = vmax.f32 %v1585_v2, %v1586_v12  ;;  %v1594_v32 = vmax.f32 %v1592_v50, %v1593_v34  ;;  %v1600_v40 = vrot.slane %v1599_v13, 2 }
 0x1c3   :  { %v1608_v44 = vmax.f32 %v1606_v27, %v1607_v51  ;;  %v1614_v0 = vrot.slane %v1613_v5, 2  ;;  %v1621_v45 = vrot.slane %v1620_v46, 2  ;;  %v1627_v18 = vmax.f32 %v1625_v42, %v1626_v41 }
 0x1c4   :  { %v1582_v38 = vmax.f32 %v1580_v39, %v1581_v26  ;;  %v1588_v53 = vrot.slane %v1587_v48, 1  ;;  %v1595_v19 = vrot.slane %v1594_v32, 1  ;;  %v1601_v14 = vmax.f32 %v1599_v13, %v1600_v40 }
 0x1c5   :  { %v1609_v31 = vrot.slane %v1608_v44, 1  ;;  %v1615_v4 = vmax.f32 %v1613_v5, %v1614_v0  ;;  %v1622_v24 = vmax.f32 %v1620_v46, %v1621_v45  ;;  %v1628_v35 = vrot.slane %v1627_v18, 2 }
 0x1c6   :  { %v1589_v1 = vmax.f32 %v1587_v48, %v1588_v53  ;;  %v1596_v37 = vmax.f32 %v1594_v32, %v1595_v19  ;;  %v1602_v7 = vrot.slane %v1601_v14, 1  ;;  %v1928_v56 = vpack.c.bf16 %v1582_v38, %v1582_v38 }
 0x1c7   :  { %v9026_v2 = vrot.slane %v7485_v6, 4  ;;  %v1610_v51 = vmax.f32 %v1608_v44, %v1609_v31  ;;  %v1616_v27 = vrot.slane %v1615_v4, 1  ;;  %v1623_v41 = vrot.slane %v1622_v24, 1 }
 0x1c8   :  { %v9028_v39 = vrot.slane %v7477_v15, 2  ;;  %v7540_v13 = vmax.f32 %v1601_v14, %v1602_v7  ;;  %v1929_v46 = vpack.c.bf16 %v1589_v1, %v1589_v1  ;;  %v932_v19 = vmul.f32 %v7370_v57, %v7419_v8 }
 0x1c9   :  { %v7533_v50 = vmax.f32 %v7485_v6, %v9026_v2  ;;  %v9029_v48 = vrot.slane %v7487_v36, 2  ;;  %v1930_v6 = vpack.c.bf16 %v1596_v37, %v1596_v37  ;;  %v9031_v42 = vmax.f32 %v7497_v52, 0.0 }
 0x1ca   :  { %v7538_v40 = vmax.f32 %v7477_v15, %v9028_v39  ;;  %v959_v34 = vadd.f32 %v7373_v58, %v7519_v3  ;;  %v7555_v5 = vmax.f32 %v1627_v18, %v1628_v35  ;;  %v7557_v26 = vunpack.c.l.b16 %v1928_v56 }
 0x1cb   :  { %9027 = vst [vmem:[#allocation31_spill] sm:$0xff] %v7533_v50  ;;  %v7547_v59 = vmax.f32 %v7487_v36, %v9029_v48  ;;  %v1053_v12 = vcombine.low %v9031_v42, %v974_v49  ;;  %v9033_v8 = vmov %v9031_v42  ;;  %v7561_v44 = vmax.f32 %v1615_v4, %v1616_v27 }
 0x1cc   :  { %9032 = vst [vmem:[#allocation33_spill] sm:$0xff] %v7557_v26  ;;  %v1054_v32 = vcombine.high %v9033_v8, %v974_v49  ;;  %v7563_v36 = vmax.f32 %v1622_v24, %v1623_v41  ;;  %v1932_v0 = vpack.c.bf16 %v1610_v51, %v1610_v51  ;;  %v7568_v38 = vunpack.c.l.b16 %v1929_v46 }
 0x1cd   :  { %9030 = vst [vmem:[#allocation32_spill] sm:$0xff] %v7547_v59  ;;  %v1061_v45 = vrot.slane %v1053_v12, %v7386_v20  ;;  %v960_v53 = vadd.f32 %v7376_v60, %v932_v19  ;;  %v7572_v14 = vunpack.c.l.b16 %v1930_v6  ;;  %v975_v31 = vmax.f32 %v959_v34, 0.0 }
 0x1ce   :  { %9034 = vst [vmem:[#allocation34_spill] sm:$0xff] %v7563_v36  ;;  %v1068_v18 = vrot.slane %v1054_v32, %v7386_v20  ;;  %v933_v35 = vmul.f32 %v7367_v55, %v7422_v16  ;;  %v934_v1 = vmul.f32 %v7370_v57, %v7425_v25 }
 0x1cf   :  { %9035 = vst [vmem:[#allocation35_spill] sm:$0xff] %v7572_v14  ;;  %v1069_v52 = vcombine.high %v1061_v45, %v1061_v45  ;;  %v1245_v49 = vrot.slane %v1061_v45, %v7386_v20  ;;  %v976_v2 = vmax.f32 %v960_v53, 0.0 }
 0x1d0   :  { %v1070_v24 = vcombine.high %v1068_v18, %v1068_v18  ;;  %v1261_v4 = vrot.slane %v1068_v18, %v7386_v20 }
 0x1d1   :  { %v1246_v37 = vcombine.high %v1245_v49, %v1245_v49  ;;  %v1253_v7 = vrot.slane %v1069_v52, %v7386_v20  ;;  %v1632_v56 = vsel %vm1463_vm0, %v1245_v49, -inf }
 0x1d2   :  { %v1262_v51 = vcombine.high %v1261_v4, %v1261_v4  ;;  %v7583_v27 = vrot.slane %v1070_v24, %v7386_v20  ;;  %v1633_v41 = vrot.slane %v1632_v56, 4  ;;  %v1660_v39 = vsel %vm1463_vm0, %v1261_v4, -inf }
 0x1d3   :  { %v1254_v46 = vcombine.high %v1253_v7, %v1253_v7  ;;  %v1639_v19 = vsel %vm1463_vm0, %v1246_v37, -inf  ;;  %v1646_v16 = vsel %vm1463_vm0, %v1253_v7, -inf  ;;  %v1661_v48 = vrot.slane %v1660_v39, 4 }
 0x1d4   :  { %v1634_v6 = vmax.f32 %v1632_v56, %v1633_v41  ;;  %v1640_v42 = vrot.slane %v1639_v19, 4  ;;  %v1647_v12 = vrot.slane %v1646_v16, 4  ;;  %v1667_v45 = vsel %vm1463_vm0, %v1262_v51, -inf }
 0x1d5   :  { %v1653_v8 = vsel %vm1463_vm0, %v1254_v46, -inf  ;;  %v1662_v32 = vmax.f32 %v1660_v39, %v1661_v48  ;;  %v7600_v49 = vsel %vm1463_vm0, %v7583_v27, -inf  ;;  %v1071_v4 = vcombine.low %v975_v31, %v976_v2 }
 0x1d6   :  { %v1635_v18 = vrot.slane %v1634_v6, 2  ;;  %v7594_v53 = vmax.f32 %v1639_v19, %v1640_v42  ;;  %v7596_v52 = vmax.f32 %v1646_v16, %v1647_v12  ;;  %v1654_v24 = vrot.slane %v1653_v8, 4 }
 0x1d7   :  { %v961_v37 = vadd.f32 %v7373_v58, %v933_v35  ;;  %v962_v7 = vadd.f32 %v7376_v60, %v934_v1  ;;  %v7604_v56 = vunpack.c.l.b16 %v1932_v0  ;;  %v1663_v39 = vrot.slane %v1662_v32, 2 }
 0x1d8   :  { %v1636_v41 = vmax.f32 %v1634_v6, %v1635_v18  ;;  %v1668_v51 = vrot.slane %v1667_v45, 4  ;;  %v1072_v16 = vcombine.high %v975_v31, %v976_v2  ;;  %v7611_v48 = vmul.f32 %v7367_v55, %v7428_v62 }
 0x1d9   :  { %9036 = vst [vmem:[#allocation36_spill] sm:$0xff] %v7604_v56  ;;  %v1079_v0 = vrot.slane %v1071_v4, %v7386_v20  ;;  %v7616_v6 = vmax.f32 %v1653_v8, %v1654_v24  ;;  %v977_v18 = vmax.f32 %v961_v37, 0.0  ;;  %v978_v34 = vmax.f32 %v962_v7, 0.0 }
 0x1da   :  { %v1637_v42 = vrot.slane %v1636_v41, 1  ;;  %v1086_v12 = vrot.slane %v1072_v16, %v7386_v20  ;;  %v7619_v15 = vmax.f32 %v1662_v32, %v1663_v39  ;;  %v7621_v31 = vmax.f32 %v1667_v45, %v1668_v51 }
 0x1db   :  { %v1087_v2 = vcombine.high %v1079_v0, %v1079_v0  ;;  %v1277_v62 = vrot.slane %v1079_v0, %v7386_v20  ;;  %v7625_v46 = vcombine.low %v977_v18, %v978_v34  ;;  %v7627_v1 = vcombine.high %v977_v18, %v978_v34 }
 0x1dc   :  { %9037 = vst [vmem:[#allocation37_spill] sm:$0xff] %v7619_v15  ;;  %v1088_v25 = vcombine.high %v1086_v12, %v1086_v12  ;;  %v1293_v3 = vrot.slane %v1086_v12, %v7386_v20  ;;  %v7629_v8 = vmax.f32 %v1636_v41, %v1637_v42 }
 0x1dd   :  { %v1278_v24 = vcombine.high %v1277_v62, %v1277_v62  ;;  %v1285_v4 = vrot.slane %v1087_v2, %v7386_v20  ;;  %v1688_v32 = vsel %vm1463_vm0, %v1277_v62, -inf }
 0x1de   :  { %v1294_v37 = vcombine.high %v1293_v3, %v1293_v3  ;;  %v1301_v45 = vrot.slane %v1088_v25, %v7386_v20  ;;  %v1689_v7 = vrot.slane %v1688_v32, 4  ;;  %v1716_v39 = vsel %vm1463_vm0, %v1293_v3, -inf }
 0x1df   :  { %v1286_v51 = vcombine.high %v1285_v4, %v1285_v4  ;;  %v1695_v16 = vsel %vm1463_vm0, %v1278_v24, -inf  ;;  %v1702_v0 = vsel %vm1463_vm0, %v1285_v4, -inf  ;;  %v1717_v34 = vrot.slane %v1716_v39, 4 }
 0x1e0   :  { %v1302_v12 = vcombine.high %v1301_v45, %v1301_v45  ;;  %v1690_v41 = vmax.f32 %v1688_v32, %v1689_v7  ;;  %v1696_v42 = vrot.slane %v1695_v16, 4  ;;  %v1703_v18 = vrot.slane %v1702_v0, 4 }
 0x1e1   :  { %v1709_v2 = vsel %vm1463_vm0, %v1286_v51, -inf  ;;  %v1718_v19 = vmax.f32 %v1716_v39, %v1717_v34  ;;  %v1723_v62 = vsel %vm1463_vm0, %v1294_v37, -inf  ;;  %v1730_v25 = vsel %vm1463_vm0, %v1301_v45, -inf }
 0x1e2   :  { %v1691_v35 = vrot.slane %v1690_v41, 2  ;;  %v1697_v56 = vmax.f32 %v1695_v16, %v1696_v42  ;;  %v1704_v3 = vmax.f32 %v1702_v0, %v1703_v18  ;;  %v1710_v14 = vrot.slane %v1709_v2, 4 }
 0x1e3   :  { %v1719_v26 = vrot.slane %v1718_v19, 2  ;;  %v1724_v24 = vrot.slane %v1723_v62, 4  ;;  %v1731_v11 = vrot.slane %v1730_v25, 4  ;;  %v1737_v4 = vsel %vm1463_vm0, %v1302_v12, -inf }
 0x1e4   :  { %v1692_v23 = vmax.f32 %v1690_v41, %v1691_v35  ;;  %v1698_v32 = vrot.slane %v1697_v56, 2  ;;  %v1705_v7 = vrot.slane %v1704_v3, 2  ;;  %v1711_v21 = vmax.f32 %v1709_v2, %v1710_v14 }
 0x1e5   :  { %v1720_v36 = vmax.f32 %v1718_v19, %v1719_v26  ;;  %v1725_v51 = vmax.f32 %v1723_v62, %v1724_v24  ;;  %v1732_v39 = vmax.f32 %v1730_v25, %v1731_v11  ;;  %v1738_v34 = vrot.slane %v1737_v4, 4 }
 0x1e6   :  { %v1693_v37 = vrot.slane %v1692_v23, 1  ;;  %v1699_v61 = vmax.f32 %v1697_v56, %v1698_v32  ;;  %v1706_v45 = vmax.f32 %v1704_v3, %v1705_v7  ;;  %v1712_v33 = vrot.slane %v1711_v21, 2 }
 0x1e7   :  { %v1721_v16 = vrot.slane %v1720_v36, 1  ;;  %v1726_v0 = vrot.slane %v1725_v51, 2  ;;  %v1733_v42 = vrot.slane %v1732_v39, 2  ;;  %v1739_v18 = vmax.f32 %v1737_v4, %v1738_v34 }
 0x1e8   :  { %v1694_v15 = vmax.f32 %v1692_v23, %v1693_v37  ;;  %v1700_v50 = vrot.slane %v1699_v61, 1  ;;  %v1707_v59 = vrot.slane %v1706_v45, 1  ;;  %v1713_v12 = vmax.f32 %v1711_v21, %v1712_v33 }
 0x1e9   :  { %v1722_v35 = vmax.f32 %v1720_v36, %v1721_v16  ;;  %v1727_v41 = vmax.f32 %v1725_v51, %v1726_v0  ;;  %v1734_v30 = vmax.f32 %v1732_v39, %v1733_v42  ;;  %v1740_v14 = vrot.slane %v1739_v18, 2 }
 0x1ea   :  { %v1701_v26 = vmax.f32 %v1699_v61, %v1700_v50  ;;  %v1708_v19 = vmax.f32 %v1706_v45, %v1707_v59  ;;  %v1714_v11 = vrot.slane %v1713_v12, 1  ;;  %v1944_v2 = vpack.c.bf16 %v1694_v15, %v1694_v15 }
 0x1eb   :  { %v1728_v62 = vrot.slane %v1727_v41, 1  ;;  %v1735_v56 = vrot.slane %v1734_v30, 1  ;;  %v7641_v25 = vmax.f32 %v1739_v18, %v1740_v14  ;;  %v1948_v3 = vpack.c.bf16 %v1722_v35, %v1722_v35 }
 0x1ec   :  { %v9038_v24 = vrot.slane %v7594_v53, 2  ;;  %v9039_v33 = vrot.slane %v7600_v49, 4  ;;  %v1715_v36 = vmax.f32 %v1713_v12, %v1714_v11  ;;  %v1945_v61 = vpack.c.bf16 %v1701_v26, %v1701_v26 }
 0x1ed   :  { %v9040_v50 = vrot.slane %v7596_v52, 2  ;;  %v1729_v15 = vmax.f32 %v1727_v41, %v1728_v62  ;;  %v963_v4 = vadd.f32 %v7373_v58, %v7611_v48  ;;  %v1946_v7 = vpack.c.bf16 %v1708_v19, %v1708_v19 }
 0x1ee   :  { %v7646_v23 = vmax.f32 %v7594_v53, %v9038_v24  ;;  %v7651_v21 = vmax.f32 %v7600_v49, %v9039_v33  ;;  %v936_v53 = vmul.f32 %v7370_v57, %v7430_v63  ;;  %v7664_v49 = vunpack.c.l.b16 %v1944_v2 }
 0x1ef   :  { %v7656_v59 = vmax.f32 %v7596_v52, %v9040_v50  ;;  %v1097_v51 = vrot.slane %v7625_v46, %v7386_v20  ;;  %v7668_v39 = vmax.f32 %v1734_v30, %v1735_v56  ;;  %v7671_v34 = vunpack.c.l.b16 %v1948_v3 }
 0x1f0   :  { %9041 = vst [vmem:[#allocation38_spill] sm:$0xff] %v7664_v49  ;;  %v1104_v48 = vrot.slane %v7627_v1, %v7386_v20  ;;  %v1947_v37 = vpack.c.bf16 %v1715_v36, %v1715_v36  ;;  %v7675_v63 = vunpack.c.l.b16 %v1945_v61  ;;  %v1949_v0 = vpack.c.bf16 %v1729_v15, %v1729_v15 }
 0x1f1   :  { %9042 = vst [vmem:[#allocation39_spill] sm:$0xff] %v7668_v39  ;;  %9043 = vst [vmem:[#allocation40_spill] sm:$0xff] %v7671_v34  ;;  %v1105_v45 = vcombine.high %v1097_v51, %v1097_v51  ;;  %v1309_v16 = vrot.slane %v1097_v51, %v7386_v20  ;;  %v979_v46 = vmax.f32 %v963_v4, 0.0  ;;  %v964_v41 = vadd.f32 %v7376_v60, %v936_v53 }
 0x1f2   :  { %v1106_v42 = vcombine.high %v1104_v48, %v1104_v48  ;;  %v1325_v18 = vrot.slane %v1104_v48, %v7386_v20 }
 0x1f3   :  { %v1310_v30 = vcombine.high %v1309_v16, %v1309_v16  ;;  %v1317_v12 = vrot.slane %v1105_v45, %v7386_v20  ;;  %v1744_v35 = vsel %vm1463_vm0, %v1309_v16, -inf }
 0x1f4   :  { %v1326_v14 = vcombine.high %v1325_v18, %v1325_v18  ;;  %v1333_v1 = vrot.slane %v1106_v42, %v7386_v20  ;;  %v1745_v26 = vrot.slane %v1744_v35, 4  ;;  %v1772_v19 = vsel %vm1463_vm0, %v1325_v18, -inf }
 0x1f5   :  { %v1318_v11 = vcombine.high %v1317_v12, %v1317_v12  ;;  %v1751_v2 = vsel %vm1463_vm0, %v1310_v30, -inf  ;;  %v1758_v62 = vsel %vm1463_vm0, %v1317_v12, -inf  ;;  %v1773_v56 = vrot.slane %v1772_v19, 4 }
 0x1f6   :  { %v1334_v3 = vcombine.high %v1333_v1, %v1333_v1  ;;  %v1746_v24 = vmax.f32 %v1744_v35, %v1745_v26  ;;  %v1752_v33 = vrot.slane %v1751_v2, 4  ;;  %v1759_v36 = vrot.slane %v1758_v62, 4 }
 0x1f7   :  { %v1765_v61 = vsel %vm1463_vm0, %v1318_v11, -inf  ;;  %v1774_v50 = vmax.f32 %v1772_v19, %v1773_v56  ;;  %v1779_v15 = vsel %vm1463_vm0, %v1326_v14, -inf  ;;  %v1786_v4 = vsel %vm1463_vm0, %v1333_v1, -inf }
 0x1f8   :  { %v1747_v53 = vrot.slane %v1746_v24, 2  ;;  %v1753_v51 = vmax.f32 %v1751_v2, %v1752_v33  ;;  %v1760_v48 = vmax.f32 %v1758_v62, %v1759_v36  ;;  %v1766_v45 = vrot.slane %v1765_v61, 4 }
 0x1f9   :  { %v1775_v16 = vrot.slane %v1774_v50, 2  ;;  %v1780_v42 = vrot.slane %v1779_v15, 4  ;;  %v980_v18 = vmax.f32 %v964_v41, 0.0  ;;  %v937_v30 = vmul.f32 %v7367_v55, %v7432_v9 }
 0x1fa   :  { %v7691_v12 = vunpack.c.l.b16 %v1946_v7  ;;  %v1748_v35 = vmax.f32 %v1746_v24, %v1747_v53  ;;  %v1754_v26 = vrot.slane %v1753_v51, 2  ;;  %v1787_v11 = vrot.slane %v1786_v4, 4 }
 0x1fb   :  { %v1761_v19 = vrot.slane %v1760_v48, 2  ;;  %v7695_v1 = vmax.f32 %v1765_v61, %v1766_v45  ;;  %v7698_v2 = vsel %vm1463_vm0, %v1334_v3, -inf  ;;  %v7700_v62 = vunpack.c.l.b16 %v1947_v37 }
 0x1fc   :  { %9044 = vst [vmem:[#allocation41_spill] sm:$0xff] %v7691_v12  ;;  %v7702_v41 = vunpack.c.l.b16 %v1949_v0  ;;  %v1749_v56 = vrot.slane %v1748_v35, 1  ;;  %v7704_v55 = vmax.f32 %v1779_v15, %v1780_v42  ;;  %v7706_v9 = vmax.f32 %v1774_v50, %v1775_v16 }
 0x1fd   :  { %v1107_v7 = vcombine.low %v979_v46, %v980_v18  ;;  %v1108_v24 = vcombine.high %v979_v46, %v980_v18  ;;  %v965_v33 = vadd.f32 %v7373_v58, %v937_v30  ;;  %v7709_v36 = vmax.f32 %v1753_v51, %v1754_v26 }
 0x1fe   :  { %9045 = vst [vmem:[#allocation42_spill] sm:$0xff] %v7706_v9  ;;  %v7711_v61 = vmax.f32 %v1786_v4, %v1787_v11  ;;  %v938_v37 = vmul.f32 %v7370_v57, %v7434_v17  ;;  %v7716_v0 = vmax.f32 %v1760_v48, %v1761_v19  ;;  %v7721_v46 = vmax.f32 %v1748_v35, %v1749_v56 }
 0x1ff   :  { %v1115_v50 = vrot.slane %v1107_v7, %v7386_v20  ;;  %v1122_v53 = vrot.slane %v1108_v24, %v7386_v20  ;;  %v981_v51 = vmax.f32 %v965_v33, 0.0 }
 0x200   :  { %9046 = vst [vmem:[#allocation43_spill] sm:$0xff] %v7711_v61  ;;  %9047 = vst [vmem:[#allocation44_spill] sm:$0xff] %v7721_v46  ;;  %v966_v4 = vadd.f32 %v7376_v60, %v938_v37 }
 0x201   :  { %v1123_v45 = vcombine.high %v1115_v50, %v1115_v50  ;;  %v1124_v16 = vcombine.high %v1122_v53, %v1122_v53  ;;  %v1341_v42 = vrot.slane %v1115_v50, %v7386_v20  ;;  %v1357_v57 = vrot.slane %v1122_v53, %v7386_v20 }
 0x202   :  { %v982_v17 = vmax.f32 %v966_v4, 0.0 }
 0x203   :  { %v1342_v35 = vcombine.high %v1341_v42, %v1341_v42  ;;  %v1349_v26 = vrot.slane %v1123_v45, %v7386_v20  ;;  %v1358_v11 = vcombine.high %v1357_v57, %v1357_v57  ;;  %v1365_v19 = vrot.slane %v1124_v16, %v7386_v20 }
 0x204   :  { %v1800_v60 = vsel %vm1463_vm0, %v1341_v42, -inf  ;;  %v1828_v56 = vsel %vm1463_vm0, %v1357_v57, -inf  ;;  %v7734_v7 = vcombine.low %v981_v51, %v982_v17  ;;  %v7736_v24 = vcombine.high %v981_v51, %v982_v17 }
 0x205   :  { %v1350_v33 = vcombine.high %v1349_v26, %v1349_v26  ;;  %v1366_v37 = vcombine.high %v1365_v19, %v1365_v19  ;;  %v1801_v50 = vrot.slane %v1800_v60, 4  ;;  %v1807_v53 = vsel %vm1463_vm0, %v1342_v35, -inf }
 0x206   :  { %v1808_v4 = vrot.slane %v1807_v53, 4  ;;  %v1814_v14 = vsel %vm1463_vm0, %v1349_v26, -inf  ;;  %v1829_v45 = vrot.slane %v1828_v56, 4  ;;  %v1835_v3 = vsel %vm1463_vm0, %v1358_v11, -inf }
 0x207   :  { %v1802_v16 = vmax.f32 %v1800_v60, %v1801_v50  ;;  %v1815_v58 = vrot.slane %v1814_v14, 4  ;;  %v1821_v42 = vsel %vm1463_vm0, %v1350_v33, -inf  ;;  %v1836_v57 = vrot.slane %v1835_v3, 4 }
 0x208   :  { %v1809_v15 = vmax.f32 %v1807_v53, %v1808_v4  ;;  %v1822_v52 = vrot.slane %v1821_v42, 4  ;;  %v1830_v51 = vmax.f32 %v1828_v56, %v1829_v45  ;;  %v1842_v17 = vsel %vm1463_vm0, %v1365_v19, -inf }
 0x209   :  { %v1803_v32 = vrot.slane %v1802_v16, 2  ;;  %v1816_v18 = vmax.f32 %v1814_v14, %v1815_v58  ;;  %v1837_v30 = vmax.f32 %v1835_v3, %v1836_v57  ;;  %v1843_v35 = vrot.slane %v1842_v17, 4 }
 0x20a   :  { %v1810_v48 = vrot.slane %v1809_v15, 2  ;;  %v1823_v34 = vmax.f32 %v1821_v42, %v1822_v52  ;;  %v1831_v26 = vrot.slane %v1830_v51, 2  ;;  %v1849_v12 = vsel %vm1463_vm0, %v1366_v37, -inf }
 0x20b   :  { %v1804_v11 = vmax.f32 %v1802_v16, %v1803_v32  ;;  %v1817_v60 = vrot.slane %v1816_v18, 2  ;;  %v1838_v50 = vrot.slane %v1837_v30, 2  ;;  %v1844_v49 = vmax.f32 %v1842_v17, %v1843_v35 }
 0x20c   :  { %v1811_v33 = vmax.f32 %v1809_v15, %v1810_v48  ;;  %v1824_v39 = vrot.slane %v1823_v34, 2  ;;  %v1832_v53 = vmax.f32 %v1830_v51, %v1831_v26  ;;  %v1850_v4 = vrot.slane %v1849_v12, 4 }
 0x20d   :  { %v1805_v56 = vrot.slane %v1804_v11, 1  ;;  %v1818_v45 = vmax.f32 %v1816_v18, %v1817_v60  ;;  %v1839_v19 = vmax.f32 %v1837_v30, %v1838_v50  ;;  %v1845_v61 = vrot.slane %v1844_v49, 2 }
 0x20e   :  { %v1812_v14 = vrot.slane %v1811_v33, 1  ;;  %v1825_v3 = vmax.f32 %v1823_v34, %v1824_v39  ;;  %v1833_v58 = vrot.slane %v1832_v53, 1  ;;  %v1851_v57 = vmax.f32 %v1849_v12, %v1850_v4 }
 0x20f   :  { %v7744_v52 = vmax.f32 %v1804_v11, %v1805_v56  ;;  %v1819_v42 = vrot.slane %v1818_v45, 1  ;;  %v1840_v37 = vrot.slane %v1839_v19, 1  ;;  %v1846_v32 = vmax.f32 %v1844_v49, %v1845_v61 }
 0x210   :  { %v1813_v16 = vmax.f32 %v1811_v33, %v1812_v14  ;;  %v1826_v9 = vrot.slane %v1825_v3, 1  ;;  %v7746_v17 = vmax.f32 %v1832_v53, %v1833_v58  ;;  %v1852_v15 = vrot.slane %v1851_v57, 2 }
 0x211   :  { %9048 = vst [vmem:[#allocation45_spill] sm:$0xff] %v7744_v52  ;;  %v7749_v51 = vmax.f32 %v1818_v45, %v1819_v42  ;;  %v1841_v18 = vmax.f32 %v1839_v19, %v1840_v37  ;;  %v1847_v30 = vrot.slane %v1846_v32, 1  ;;  %v1558_v12 = vrot.slane %v7508_v54, 2 }
 0x212   :  { %9049 = vst [vmem:[#allocation46_spill] sm:$0xff] %v7746_v17  ;;  %v1827_v35 = vmax.f32 %v1825_v3, %v1826_v9  ;;  %v7751_v39 = vmax.f32 %v1851_v57, %v1852_v15  ;;  %v1961_v34 = vpack.c.bf16 %v1813_v16, %v1813_v16  ;;  %v9050_v26 = vrot.slane %v7446_v29, 1 }
 0x213   :  { %v1965_v61 = vpack.c.bf16 %v1841_v18, %v1841_v18  ;;  %v9051_v60 = vrot.slane %v7491_v43, 2  ;;  %v7764_v33 = vmax.f32 %v1846_v32, %v1847_v30  ;;  %v9052_v4 = vrot.slane %v7538_v40, 1 }
 0x214   :  { %v7759_v11 = vmax.f32 %v7446_v29, %v9050_v26  ;;  %v1963_v19 = vpack.c.bf16 %v1827_v35, %v1827_v35  ;;  %v7780_v14 = vunpack.c.l.b16 %v1961_v34  ;;  %v1140_v58 = vrot.slane %v7736_v24, %v7386_v20 }
 0x215   :  { %v1545_v50 = vmax.f32 %v7491_v43, %v9051_v60  ;;  %v7773_v56 = vmax.f32 %v7538_v40, %v9052_v4  ;;  %v1133_v43 = vrot.slane %v7734_v7, %v7386_v20  ;;  %v7782_v3 = vunpack.c.l.b16 %v1965_v61 }
 0x216   :  { %v1559_v57 = vmax.f32 %v7508_v54, %v1558_v12  ;;  %v9053_v32 = vcombine.high %v7463_v47, %v7463_v47  ;;  %v1142_v15 = vcombine.high %v1140_v58, %v1140_v58  ;;  %v1389_v7 = vrot.slane %v1140_v58, %v7386_v20 }
 0x217   :  { %v1141_v40 = vcombine.high %v1133_v43, %v1133_v43  ;;  %v1373_v42 = vrot.slane %v1133_v43, %v7386_v20  ;;  %v1546_v37 = vrot.slane %v1545_v50, 1  ;;  %v1630_v30 = vrot.slane %v7555_v5, 1 }
 0x218   :  { %v1569_v16 = vsel %vm1463_vm0, %v9053_v32, -inf  ;;  %v1560_v18 = vrot.slane %v1559_v57, 1  ;;  %v1390_v12 = vcombine.high %v1389_v7, %v1389_v7  ;;  %v1397_v61 = vrot.slane %v1142_v15, %v7386_v20 }
 0x219   :  { %v1374_v35 = vcombine.high %v1373_v42, %v1373_v42  ;;  %v1381_v24 = vrot.slane %v1141_v40, %v7386_v20  ;;  %v1856_v54 = vsel %vm1463_vm0, %v1373_v42, -inf  ;;  %v1570_v34 = vrot.slane %v1569_v16, 4 }
 0x21a   :  { %v1857_v26 = vrot.slane %v1856_v54, 4  ;;  %v1884_v47 = vsel %vm1463_vm0, %v1389_v7, -inf  ;;  %v1398_v32 = vcombine.high %v1397_v61, %v1397_v61  ;;  %v1891_v45 = vsel %vm1463_vm0, %v1390_v12, -inf }
 0x21b   :  { %v1382_v60 = vcombine.high %v1381_v24, %v1381_v24  ;;  %v1863_v4 = vsel %vm1463_vm0, %v1374_v35, -inf  ;;  %v1870_v43 = vsel %vm1463_vm0, %v1381_v24, -inf  ;;  %v1885_v58 = vrot.slane %v1884_v47, 4 }
 0x21c   :  { %v1858_v49 = vmax.f32 %v1856_v54, %v1857_v26  ;;  %v1864_v53 = vrot.slane %v1863_v4, 4  ;;  %v1871_v9 = vrot.slane %v1870_v43, 4  ;;  %v1898_v15 = vsel %vm1463_vm0, %v1397_v61, -inf }
 0x21d   :  { %v1877_v40 = vsel %vm1463_vm0, %v1382_v60, -inf  ;;  %v1886_v42 = vmax.f32 %v1884_v47, %v1885_v58  ;;  %v1892_v35 = vrot.slane %v1891_v45, 4  ;;  %v1899_v17 = vrot.slane %v1898_v15, 4 }
 0x21e   :  { %v1859_v29 = vrot.slane %v1858_v49, 2  ;;  %v1865_v48 = vmax.f32 %v1863_v4, %v1864_v53  ;;  %v1872_v7 = vmax.f32 %v1870_v43, %v1871_v9  ;;  %v1878_v20 = vrot.slane %v1877_v40, 4 }
 0x21f   :  { %v1887_v46 = vrot.slane %v1886_v42, 2  ;;  %v7804_v24 = vsel %vm1463_vm0, %v1398_v32, -inf  ;;  %v7810_v47 = vunpack.c.l.b16 %v1963_v19  ;;  %v7814_v61 = vmax.f32 %v1891_v45, %v1892_v35 }
 0x220   :  { %v7806_v54 = vmax.f32 %v1858_v49, %v1859_v29  ;;  %v1866_v26 = vrot.slane %v1865_v48, 2  ;;  %v1873_v52 = vrot.slane %v1872_v7, 2  ;;  %v7808_v60 = vmax.f32 %v1877_v40, %v1878_v20 }
 0x221   :  { %v7812_v12 = vmax.f32 %v1886_v42, %v1887_v46  ;;  %v1547_v9 = vmax.f32 %v1545_v50, %v1546_v37  ;;  %v7819_v43 = vmax.f32 %v1898_v15, %v1899_v17  ;;  %v1894_v19 = vrot.slane %v7814_v61, 2 }
 0x222   :  { %v7817_v4 = vmax.f32 %v1865_v48, %v1866_v26  ;;  %v7822_v29 = vmax.f32 %v1872_v7, %v1873_v52  ;;  %v1880_v20 = vrot.slane %v7808_v60, 2  ;;  %v1571_v58 = vmax.f32 %v1569_v16, %v1570_v34 }
 0x223   :  { %v1561_v46 = vmax.f32 %v1559_v57, %v1560_v18  ;;  %v1631_v45 = vmax.f32 %v7555_v5, %v1630_v30  ;;  %v1644_v50 = vrot.slane %v7646_v23, 1  ;;  %v1656_v37 = vrot.slane %v7616_v6, 2 }
 0x224   :  { %v1868_v48 = vrot.slane %v7817_v4, 1  ;;  %v1572_v17 = vrot.slane %v1571_v58, 2  ;;  %v1670_v32 = vrot.slane %v7621_v31, 2  ;;  %v9054_v52 = vcombine.high %v7583_v27, %v7583_v27 }
 0x225   :  { %v1645_v42 = vmax.f32 %v7646_v23, %v1644_v50  ;;  %v1657_v57 = vmax.f32 %v7616_v6, %v1656_v37  ;;  %v1919_v5 = vpack.c.bf16 %v7759_v11, %v7759_v11  ;;  %v1921_v34 = vpack.c.bf16 %v7773_v56, %v7773_v56 }
 0x226   :  { %v1681_v40 = vsel %vm1463_vm0, %v9054_v52, -inf  ;;  %v1573_v18 = vmax.f32 %v1571_v58, %v1572_v17  ;;  %v1671_v30 = vmax.f32 %v7621_v31, %v1670_v32  ;;  %v1923_v15 = vpack.c.bf16 %v1547_v9, %v1547_v9 }
 0x227   :  { %v1682_v16 = vrot.slane %v1681_v40, 4  ;;  %v1658_v7 = vrot.slane %v1657_v57, 1  ;;  %v1925_v27 = vpack.c.bf16 %v1561_v46, %v1561_v46  ;;  %v1935_v26 = vpack.c.bf16 %v1631_v45, %v1631_v45 }
 0x228   :  { %v1574_v52 = vrot.slane %v1573_v18, 1  ;;  %v1672_v53 = vrot.slane %v1671_v30, 1  ;;  %v1937_v23 = vpack.c.bf16 %v1645_v42, %v1645_v42  ;;  %v9055_v6 = vpack.c.bf16 %v7444_v28, %v7444_v28 }
 0x229   :  { %v1683_v35 = vmax.f32 %v1681_v40, %v1682_v16  ;;  %v1659_v37 = vmax.f32 %v1657_v57, %v1658_v7  ;;  %v9056_v31 = vpack.c.bf16 %v7436_v22, %v7436_v22  ;;  %v2079_v17 = vunpack.c.l.b16 %v1919_v5 }
 0x22a   :  { %v2075_v50 = vunpack.c.l.b16 %v9055_v6  ;;  %v1575_v56 = vmax.f32 %v1573_v18, %v1574_v52  ;;  %v1673_v9 = vmax.f32 %v1671_v30, %v1672_v53  ;;  %v2081_v32 = vunpack.c.l.b16 %v1921_v34 }
 0x22b   :  { %v1684_v11 = vrot.slane %v1683_v35, 2  ;;  %v2077_v58 = vunpack.c.l.b16 %v9056_v31  ;;  %v2083_v40 = vunpack.c.l.b16 %v1923_v15  ;;  %v1939_v45 = vpack.c.bf16 %v1659_v37, %v1659_v37  ;;  %v9059_v15 = vld [vmem:[#allocation30_spill] sm:$0xff] }
 0x22c   :  { %v2085_v16 = vunpack.c.l.b16 %v1925_v27  ;;  %v9057_v42 = vpack.c.bf16 %v7540_v13, %v7540_v13  ;;  %v1927_v28 = vpack.c.bf16 %v1575_v56, %v1575_v56  ;;  %v1941_v6 = vpack.c.bf16 %v1673_v9, %v1673_v9 }
 0x22d   :  { %v1685_v46 = vmax.f32 %v1683_v35, %v1684_v11  ;;  %v9058_v57 = vpack.c.bf16 %v7561_v44, %v7561_v44  ;;  %v2095_v22 = vunpack.c.l.b16 %v1935_v26  ;;  %v2097_v5 = vunpack.c.l.b16 %v1937_v23  ;;  %v9060_v23 = vld [vmem:[#allocation32_spill] sm:$0xff] }
 0x22e   :  { %v2091_v49 = vunpack.c.l.b16 %v9057_v42  ;;  %v2099_v18 = vunpack.c.l.b16 %v1939_v45  ;;  %v2087_v53 = vunpack.c.l.b16 %v1927_v28  ;;  %v2101_v30 = vunpack.c.l.b16 %v1941_v6 }
 0x22f   :  { %v2093_v7 = vunpack.c.l.b16 %v9058_v57  ;;  %v1686_v31 = vrot.slane %v1685_v46, 1  ;;  %v2150_v13 = vsel %vm2136_vm2, %v2075_v50, %v7473_v10  ;;  %v1539_v35 = vrot.slane %v9059_v15, 1 }
 0x230   :  { %v2164_v44 = vsel %vm2136_vm2, %v2091_v49, %v7568_v38  ;;  %v2151_v26 = vsel %vm2138_vm4, %v2077_v58, %v2150_v13  ;;  %v1553_v37 = vrot.slane %v9060_v23, 1 }
 0x231   :  { %v1687_v34 = vmax.f32 %v1685_v46, %v1686_v31  ;;  %v2165_v52 = vsel %vm2138_vm4, %v2093_v7, %v2164_v44  ;;  %v2152_v11 = vsel %vm2140_vm5, %v2079_v17, %v2151_v26  ;;  %v1540_v9 = vmax.f32 %v9059_v15, %v1539_v35  ;;  %v9061_v46 = vld [vmem:[#allocation31_spill] sm:$0xff]  ;;  %v9062_v7 = vld [vmem:[#allocation37_spill] sm:$0xff] }
 0x232   :  { %v2166_v56 = vsel %vm2140_vm5, %v2095_v22, %v2165_v52  ;;  %v1565_v10 = vrot.slane %v9061_v46, 2  ;;  %v2153_v38 = vsel %vm2142_vm6, %v2081_v32, %v2152_v11  ;;  %v1554_v45 = vmax.f32 %v9060_v23, %v1553_v37  ;;  %v9065_v37 = vld [vmem:[#allocation29_spill] sm:$0xff] }
 0x233   :  { %v1943_v27 = vpack.c.bf16 %v1687_v34, %v1687_v34  ;;  %v2167_v49 = vsel %vm2142_vm6, %v2097_v5, %v2166_v56  ;;  %v2154_v58 = vsel %vm2144_vm8, %v2083_v40, %v2153_v38  ;;  %v1651_v17 = vrot.slane %v7656_v59, 1 }
 0x234   :  { %v2168_v42 = vsel %vm2144_vm8, %v2099_v18, %v2167_v49  ;;  %v1566_v28 = vmax.f32 %v9061_v46, %v1565_v10  ;;  %v2155_v6 = vsel %vm2146_vm9, %v2085_v16, %v2154_v58  ;;  %v1665_v22 = vrot.slane %v9062_v7, 1 }
 0x235   :  { %v2103_v50 = vunpack.c.l.b16 %v1943_v27  ;;  %v2169_v57 = vsel %vm2146_vm9, %v2101_v30, %v2168_v42  ;;  %v1677_v32 = vrot.slane %v7651_v21, 2  ;;  %v2156_v31 = vsel %vm2148_vm10, %v2087_v53, %v2155_v6  ;;  %v9063_v27 = vld [vmem:[#allocation25_spill] sm:$0xff] }
 0x236   :  { %v1567_v34 = vrot.slane %v1566_v28, 1  ;;  %v1652_v40 = vmax.f32 %v7656_v59, %v1651_v17  ;;  %v1666_v13 = vmax.f32 %v9062_v7, %v1665_v22  ;;  %v1922_v16 = vpack.c.bf16 %v1540_v9, %v1540_v9  ;;  %v9071_v17 = vld [vmem:[#allocation28_spill] sm:$0xff]  ;;  %v9072_v7 = vld [vmem:[#allocation27_spill] sm:$0xff] }
 0x237   :  { %v2170_v5 = vsel %vm2148_vm10, %v2103_v50, %v2169_v57  ;;  %v1678_v44 = vmax.f32 %v7651_v21, %v1677_v32  ;;  %v1924_v30 = vpack.c.bf16 %v1554_v45, %v1554_v45  ;;  %v9064_v26 = vpack.c.bf16 %v9063_v27, %v9063_v27  ;;  %v9067_v21 = vld [vmem:[#allocation34_spill] sm:$0xff]  ;;  %v9073_v32 = vld [vmem:[#allocation33_spill] sm:$0xff] }
 0x238   :  { %v7880_v18 = vpack.c.b16 %v2170_v5, %v2156_v31  ;;  %v1568_v15 = vmax.f32 %v1566_v28, %v1567_v34  ;;  %v1938_v35 = vpack.c.bf16 %v1652_v40, %v1652_v40  ;;  %v1940_v23 = vpack.c.bf16 %v1666_v13, %v1666_v13  ;;  %v9070_v28 = vld [vmem:[#allocation26_spill] sm:$0xff]  ;;  %v9074_v31 = vld [vmem:[#allocation35_spill] sm:$0xff] }
 0x239   :  { %v2078_v52 = vunpack.c.l.b16 %v9064_v26  ;;  %v1679_v53 = vrot.slane %v1678_v44, 1  ;;  %v9066_v59 = vpack.c.bf16 %v9065_v37, %v9065_v37  ;;  %v2082_v56 = vunpack.c.l.b16 %v1922_v16 }
 0x23a   :  { %2335 = vmatprep.mubr.bf16.mxu1 %v7880_v18  ;;  %v1926_v46 = vpack.c.bf16 %v1568_v15, %v1568_v15  ;;  %v2084_v10 = vunpack.c.l.b16 %v1924_v30  ;;  %v9068_v9 = vpack.c.bf16 %v9067_v21, %v9067_v21  ;;  %v9069_v38 = vpack.c.bf16 %v7629_v8, %v7629_v8 }
 0x23b   :  { %v2080_v11 = vunpack.c.l.b16 %v9066_v59  ;;  %v1680_v45 = vmax.f32 %v1678_v44, %v1679_v53  ;;  %v2098_v58 = vunpack.c.l.b16 %v1938_v35  ;;  %v2100_v42 = vunpack.c.l.b16 %v1940_v23  ;;  %v9076_v44 = vld [vmem:[#allocation36_spill] sm:$0xff] }
 0x23c   :  { %v2094_v50 = vunpack.c.l.b16 %v9068_v9  ;;  %v2096_v49 = vunpack.c.l.b16 %v9069_v38  ;;  %v2137_v6 = vsel %vm2136_vm2, %v9071_v17, %v9070_v28  ;;  %v2086_v57 = vunpack.c.l.b16 %v1926_v46  ;;  %v6571_v28 = vld [vmem:[#allocation8 + $0x80] sm:$0xff]  }
 0x23d   :  { %v2139_v22 = vsel %vm2138_vm4, %v9072_v7, %v2137_v6  ;;  %v2157_v5 = vsel %vm2136_vm2, %v9074_v31, %v9073_v32  ;;  %v9075_v34 = vrot.slane %v7641_v25, 1  ;;  %v1942_v40 = vpack.c.bf16 %v1680_v45, %v1680_v45  ;;  %v6572_v6 = vld [vmem:[#allocation8 + $0xc8] sm:$0xff]  }
 0x23e   :  { %v2141_v13 = vsel %vm2140_vm5, %v2078_v52, %v2139_v22  ;;  %v2158_v16 = vsel %vm2138_vm4, %v9076_v44, %v2157_v5  ;;  %v9077_v15 = vrot.slane %v7709_v36, 1  ;;  %v9078_v26 = vrot.slane %v7695_v1, 2 }
 0x23f   :  { %v1743_v8 = vmax.f32 %v7641_v25, %v9075_v34  ;;  %v2143_v35 = vsel %vm2142_vm6, %v2080_v11, %v2141_v13  ;;  %v2159_v27 = vsel %vm2140_vm5, %v2094_v50, %v2158_v16  ;;  %v9079_v25 = vrot.slane %v7704_v55, 2  ;;  %v6573_v13 = vld [vmem:[#allocation8 + $0x88] sm:$0xff]  }
 0x240   :  { %v1757_v30 = vmax.f32 %v7709_v36, %v9077_v15  ;;  %v1769_v53 = vmax.f32 %v7695_v1, %v9078_v26  ;;  %v2102_v52 = vunpack.c.l.b16 %v1942_v40  ;;  %v2145_v37 = vsel %vm2144_vm8, %v2082_v56, %v2143_v35 }
 0x241   :  { %v1783_v23 = vmax.f32 %v7704_v55, %v9079_v25  ;;  %v2160_v59 = vsel %vm2142_vm6, %v2096_v49, %v2159_v27  ;;  %v9080_v46 = vrot.slane %v7698_v2, 4  ;;  %v2147_v11 = vsel %vm2146_vm9, %v2084_v10, %v2145_v37  ;;  %v6575_v37 = vld [vmem:[#allocation8 + $0x90] sm:$0xff]  }
 0x242   :  { %v2161_v21 = vsel %vm2144_vm8, %v2098_v58, %v2160_v59  ;;  %v1770_v9 = vrot.slane %v1769_v53, 1  ;;  %v2149_v1 = vsel %vm2148_vm10, %v2086_v57, %v2147_v11  ;;  %v9081_v45 = vrot.slane %v7751_v39, 1 }
 0x243   :  { %v1795_v36 = vmax.f32 %v7698_v2, %v9080_v46  ;;  %v1784_v50 = vrot.slane %v1783_v23, 1  ;;  %v2162_v38 = vsel %vm2146_vm9, %v2100_v42, %v2161_v21  ;;  %v1869_v10 = vmax.f32 %v7817_v4, %v1868_v48  ;;  %v6576_v21 = vld [vmem:[#allocation8 + $0xd8] sm:$0xff]  }
 0x244   :  { %v1855_v56 = vmax.f32 %v7751_v39, %v9081_v45  ;;  %v2163_v49 = vsel %vm2148_vm10, %v2102_v52, %v2162_v38  ;;  %v1771_v17 = vmax.f32 %v1769_v53, %v1770_v9  ;;  %v1881_v42 = vmax.f32 %v7808_v60, %v1880_v20 }
 0x245   :  { %v1796_v55 = vrot.slane %v1795_v36, 2  ;;  %v1785_v2 = vmax.f32 %v1783_v23, %v1784_v50  ;;  %v7938_v58 = vpack.c.b16 %v2163_v49, %v2149_v1  ;;  %v1895_v39 = vmax.f32 %v7814_v61, %v1894_v19  ;;  %v6574_v61 = vld [vmem:[#allocation8 + $0xd0] sm:$0xff]  }
 0x246   :  { %v9082_v7 = vrot.slane %v7804_v24, 4  ;;  %v1951_v32 = vpack.c.bf16 %v1743_v8, %v1743_v8  ;;  %v1953_v31 = vpack.c.bf16 %v1757_v30, %v1757_v30  ;;  %v1955_v5 = vpack.c.bf16 %v1771_v17, %v1771_v17 }
 0x247   :  { %v1797_v57 = vmax.f32 %v1795_v36, %v1796_v55  ;;  %2336 = vmatmul.mubr.bf16.vlgmr.msra.gmra.mrb[0].mxu1 %v7938_v58  ;;  %v1882_v48 = vrot.slane %v1881_v42, 1  ;;  %v1896_v34 = vrot.slane %v1895_v39, 1  ;;  %v1957_v40 = vpack.c.bf16 %v1785_v2, %v1785_v2  ;;  %v6577_v2 = vld [vmem:[#allocation8 + $0x98] sm:$0xff]  }
 0x248   :  { %v1907_v22 = vmax.f32 %v7804_v24, %v9082_v7  ;;  %6254 = vmatpush3.bf16.msra.mxu1 %v6571_v28  ;;  %v1967_v20 = vpack.c.bf16 %v1855_v56, %v1855_v56  ;;  %v1969_v44 = vpack.c.bf16 %v1869_v10, %v1869_v10  ;;  %v2111_v16 = vunpack.c.l.b16 %v1951_v32  ;;  %v9083_v56 = vld [vmem:[#allocation42_spill] sm:$0xff]  ;;  %v9084_v28 = vld [vmem:[#allocation43_spill] sm:$0xff] }
 0x249   :  { %v1798_v4 = vrot.slane %v1797_v57, 1  ;;  %6255 = vmatprep.subr.bf16.mxu1 %v6572_v6  ;;  %v1883_v15 = vmax.f32 %v1881_v42, %v1882_v48  ;;  %v1897_v24 = vmax.f32 %v1895_v39, %v1896_v34  ;;  %v2113_v8 = vunpack.c.l.b16 %v1953_v31  ;;  %v6578_v7 = vld [vmem:[#allocation8 + $0xe0] sm:$0xff]  }
 0x24a   :  { %v1908_v60 = vrot.slane %v1907_v22, 2  ;;  %v2115_v35 = vunpack.c.l.b16 %v1955_v5  ;;  %v2117_v27 = vunpack.c.l.b16 %v1957_v40  ;;  %v2127_v26 = vunpack.c.l.b16 %v1967_v20 }
 0x24b   :  { %v1799_v19 = vmax.f32 %v1797_v57, %v1798_v4  ;;  %v1971_v25 = vpack.c.bf16 %v1883_v15, %v1883_v15  ;;  %v1973_v23 = vpack.c.bf16 %v1897_v24, %v1897_v24  ;;  %v2129_v52 = vunpack.c.l.b16 %v1969_v44 }
 0x24c   :  { %v1909_v30 = vmax.f32 %v1907_v22, %v1908_v60  ;;  %6256 = vmatpush3.bf16.msra.mxu1 %v6573_v13  ;;  %v2178_v46 = vsel %vm2136_vm2, %v7700_v62, %v7675_v63  ;;  %v2192_v36 = vsel %vm2136_vm2, %v7810_v47, %v7780_v14  ;;  %v1763_v11 = vrot.slane %v7716_v0, 1 }
 0x24d   :  { %v1959_v53 = vpack.c.bf16 %v1799_v19, %v1799_v19  ;;  %6257 = vmatprep.subr.bf16.mxu1 %v6574_v61  ;;  %v2131_v50 = vunpack.c.l.b16 %v1971_v25  ;;  %v2133_v1 = vunpack.c.l.b16 %v1973_v23  ;;  %v2179_v38 = vsel %vm2138_vm4, %v7702_v41, %v2178_v46  ;;  %v6579_v61 = vld [vmem:[#allocation8 + $0xa0] sm:$0xff]   ;;  %v9093_v46 = vld [vmem:[#allocation44_spill] sm:$0xff] }
 0x24e   :  { %v1910_v59 = vrot.slane %v1909_v30, 1  ;;  %v2180_v45 = vsel %vm2140_vm5, %v2111_v16, %v2179_v38  ;;  %v2193_v63 = vsel %vm2138_vm4, %v7782_v3, %v2192_v36  ;;  %v1764_v62 = vmax.f32 %v7716_v0, %v1763_v11 }
 0x24f   :  { %v2119_v9 = vunpack.c.l.b16 %v1959_v53  ;;  %v2181_v14 = vsel %vm2142_vm6, %v2113_v8, %v2180_v45  ;;  %v2194_v47 = vsel %vm2140_vm5, %v2127_v26, %v2193_v63  ;;  %v1777_v49 = vrot.slane %v9083_v56, 1  ;;  %v6580_v8 = vld [vmem:[#allocation8 + $0xe8] sm:$0xff]  }
 0x250   :  { %v1911_v55 = vmax.f32 %v1909_v30, %v1910_v59  ;;  %v1789_v17 = vrot.slane %v9084_v28, 2  ;;  %6258 = vmatpush3.bf16.msra.mxu1 %v6575_v37  ;;  %v2182_v41 = vsel %vm2144_vm8, %v2115_v35, %v2181_v14  ;;  %v2195_v6 = vsel %vm2142_vm6, %v2129_v52, %v2194_v47  ;;  %v9087_v30 = vld [vmem:[#allocation45_spill] sm:$0xff]  ;;  %v9091_v37 = vld [vmem:[#allocation39_spill] sm:$0xff]  ;;  %v9097_v14 = vld [vmem:[#allocation40_spill] sm:$0xff] }
 0x251   :  { %v1875_v57 = vrot.slane %v7822_v29, 1  ;;  %v9085_v3 = vrot.slane %v7806_v54, 1  ;;  %6259 = vmatprep.subr.bf16.mxu1 %v6576_v21  ;;  %v2183_v42 = vsel %vm2146_vm9, %v2117_v27, %v2182_v41  ;;  %v2196_v39 = vsel %vm2144_vm8, %v2131_v50, %v2195_v6  ;;  %v9089_v27 = vld [vmem:[#allocation46_spill] sm:$0xff]  ;;  %v9096_v50 = vld [vmem:[#allocation41_spill] sm:$0xff] }
 0x252   :  { %v1975_v10 = vpack.c.bf16 %v1911_v55, %v1911_v55  ;;  %v1790_v22 = vmax.f32 %v9084_v28, %v1789_v17  ;;  %v2184_v31 = vsel %vm2148_vm10, %v2119_v9, %v2183_v42  ;;  %v2197_v5 = vsel %vm2146_vm9, %v2133_v1, %v2196_v39  ;;  %v9095_v9 = vld [vmem:[#allocation38_spill] sm:$0xff] }
 0x253   :  { %v1862_v0 = vmax.f32 %v7806_v54, %v9085_v3  ;;  %v1778_v4 = vmax.f32 %v9083_v56, %v1777_v49  ;;  %v1876_v34 = vmax.f32 %v7822_v29, %v1875_v57  ;;  %v1889_v54 = vrot.slane %v7812_v12, 1  ;;  %v6581_v55 = vld [vmem:[#allocation8 + $0xa8] sm:$0xff]   ;;  %v6582_v56 = vld [vmem:[#allocation8 + $0xf0] sm:$0xff]  }
 0x254   :  { %v2135_v32 = vunpack.c.l.b16 %v1975_v10  ;;  %v1791_v48 = vrot.slane %v1790_v22, 1  ;;  %v1901_v40 = vrot.slane %v7819_v43, 2  ;;  %v1966_v13 = vpack.c.bf16 %v7764_v33, %v7764_v33  ;;  %6260 = vmatpush3.bf16.msra.mxu1 %v6577_v2 }
 0x255   :  { %v9086_v60 = vpack.c.bf16 %v7749_v51, %v7749_v51  ;;  %v1954_v16 = vpack.c.bf16 %v1764_v62, %v1764_v62  ;;  %6261 = vmatprep.subr.bf16.mxu1 %v6578_v7  ;;  %v1890_v29 = vmax.f32 %v7812_v12, %v1889_v54  ;;  %v9088_v33 = vpack.c.bf16 %v9087_v30, %v9087_v30  ;;  %v6583_v7 = vld [vmem:[#allocation8 + $0xb0] sm:$0xff]   ;;  %v2546_v30 = vld [vmem:[#allocation3 + $0x14] sm:$0x1] }
 0x256   :  { %v2198_v44 = vsel %vm2148_vm10, %v2135_v32, %v2197_v5  ;;  %v1792_v15 = vmax.f32 %v1790_v22, %v1791_v48  ;;  %v1902_v24 = vmax.f32 %v7819_v43, %v1901_v40  ;;  %v9090_v51 = vpack.c.bf16 %v9089_v27, %v9089_v27  ;;  %v6584_v5 = vld [vmem:[#allocation8 + $0xf8] sm:$0xff]  }
 0x257   :  { %v2122_v20 = vunpack.c.l.b16 %v9086_v60  ;;  %v2202_v19 = vpack.c.b16 %v2198_v44, %v2184_v31  ;;  %v2120_v35 = vunpack.c.l.b16 %v9088_v33  ;;  %v1968_v53 = vpack.c.bf16 %v1862_v0, %v1862_v0  ;;  %v6585_v40 = vld [vmem:[#allocation8 + $0xb8] sm:$0xff]  }
 0x258   :  { %v2124_v26 = vunpack.c.l.b16 %v9090_v51  ;;  %v1956_v25 = vpack.c.bf16 %v1778_v4, %v1778_v4  ;;  %v1903_v23 = vrot.slane %v1902_v24, 1  ;;  %v1970_v52 = vpack.c.bf16 %v1876_v34, %v1876_v34  ;;  %6262 = vmatpush3.bf16.msra.mxu1 %v6579_v61  ;;  %v2536_v60 = vld [vmem:[#allocation3] sm:$0x1]  ;;  %v6594_v27 = vld [vmem:[%s8939_s5 + $0xa4] ss:$8 sps:$4 sm:$0xff]  }
 0x259   :  { %2343 = vmatprep.mubr.bf16.mxu1 %v2202_v19  ;;  %v9092_v59 = vpack.c.bf16 %v9091_v37, %v9091_v37  ;;  %v9094_v43 = vpack.c.bf16 %v9093_v46, %v9093_v46  ;;  %v1958_v11 = vpack.c.bf16 %v1792_v15, %v1792_v15  ;;  %v1972_v21 = vpack.c.bf16 %v1890_v29, %v1890_v29  ;;  %v6586_v61 = vld [vmem:[%s8939_s5 + $0x80] ss:$8 sps:$4 sm:$0xff]   ;;  %v6591_v15 = vld [vmem:[%s8939_s5 + $0x94] ss:$8 sps:$4 sm:$0xff]   ;;  %v6606_v37 = vld [vmem:[%s8939_s5 + $0xe4] ss:$8 sps:$4 sm:$0xff]  }
 0x25a   :  { %v2171_v1 = vsel %vm2136_vm2, %v9096_v50, %v9095_v9  ;;  %v2185_v38 = vsel %vm2136_vm2, %v2122_v20, %v2120_v35  ;;  %v1904_v45 = vmax.f32 %v1902_v24, %v1903_v23  ;;  %v2114_v63 = vunpack.c.l.b16 %v1954_v16  ;;  %6263 = vmatprep.subr.bf16.mxu1 %v6580_v8  ;;  %v2539_v29 = vld [vmem:[#allocation3 + $0xc] sm:$0x1]  ;;  %v6589_v8 = vld [vmem:[%s8939_s5 + $0x90] ss:$8 sps:$4 sm:$0xff]   ;;  %v6592_v35 = vld [vmem:[%s8939_s5 + $0xa0] ss:$8 sps:$4 sm:$0xff]  }
 0x25b   :  { %v2110_v12 = vunpack.c.l.b16 %v9092_v59  ;;  %v2112_v36 = vunpack.c.l.b16 %v9094_v43  ;;  %v2126_v62 = vunpack.c.l.b16 %v1966_v13  ;;  %v2172_v47 = vsel %vm2138_vm4, %v9097_v14, %v2171_v1  ;;  %v6597_v51 = vld [vmem:[%s8939_s5 + $0xb4] ss:$8 sps:$4 sm:$0xff]   ;;  %v6604_v59 = vld [vmem:[%s8939_s5 + $0xe0] ss:$8 sps:$4 sm:$0xff]   ;;  %v6607_v46 = vld [vmem:[%s8939_s5 + $0xf0] ss:$8 sps:$4 sm:$0xff]  }
 0x25c   :  { %v2116_v49 = vunpack.c.l.b16 %v1956_v25  ;;  %v2128_v28 = vunpack.c.l.b16 %v1968_v53  ;;  %v2186_v2 = vsel %vm2138_vm4, %v2124_v26, %v2185_v38  ;;  %v1974_v10 = vpack.c.bf16 %v1904_v45, %v1904_v45  ;;  %6264 = vmatpush3.bf16.msra.mxu1 %v6581_v55  ;;  %v6595_v26 = vld [vmem:[%s8939_s5 + $0xb0] ss:$8 sps:$4 sm:$0xff]   ;;  %v6600_v53 = vld [vmem:[%s8939_s5 + $0xc4] ss:$8 sps:$4 sm:$0xff]   ;;  %v6598_v25 = vld [vmem:[%s8939_s5 + $0xc0] ss:$8 sps:$4 sm:$0xff]  }
 0x25d   :  { %v2173_v17 = vsel %vm2140_vm5, %v2110_v12, %v2172_v47  ;;  %v2130_v41 = vunpack.c.l.b16 %v1970_v52  ;;  %v2187_v57 = vsel %vm2140_vm5, %v2126_v62, %v2186_v2  ;;  %v2118_v3 = vunpack.c.l.b16 %v1958_v11  ;;  %6265 = vmatprep.subr.bf16.mxu1 %v6582_v56  ;;  %v6603_v23 = vld [vmem:[%s8939_s5 + $0xd4] ss:$8 sps:$4 sm:$0xff]   ;;  %v6601_v52 = vld [vmem:[%s8939_s5 + $0xd0] ss:$8 sps:$4 sm:$0xff]   ;;  %v6612_v43 = vld [vmem:[%s8939_s5 + $0x4] ss:$8 sps:$4 sm:$0xff]  }
 0x25e   :  { %v2174_v6 = vsel %vm2142_vm6, %v2112_v36, %v2173_v17  ;;  %v2132_v0 = vunpack.c.l.b16 %v1972_v21  ;;  %v2188_v39 = vsel %vm2142_vm6, %v2128_v28, %v2187_v57  ;;  %v2134_v22 = vunpack.c.l.b16 %v1974_v10  ;;  %v6609_v12 = vld [vmem:[%s8939_s5 + $0xf4] ss:$8 sps:$4 sm:$0xff]  }
 0x25f   :  { %v2175_v42 = vsel %vm2144_vm8, %v2114_v63, %v2174_v6  ;;  %v2189_v31 = vsel %vm2144_vm8, %v2130_v41, %v2188_v39  ;;  %v9098_v13 = vmov 0   ;;  %v2537_v44 = vsel %vm8023_vm12, 0, %v2536_v60 }
 0x260   :  { %v2176_v32 = vsel %vm2146_vm9, %v2116_v49, %v2175_v42  ;;  %v2190_v48 = vsel %vm2146_vm9, %v2132_v0, %v2189_v31  ;;  %6266 = vmatpush3.bf16.msra.mxu1 %v6583_v7  ;;  %2538 = vst [vmem:[#allocation3] sm:$0x1] %v2537_v44  ;;  %v2540_v24 = vsel %vm8023_vm12, 0, %v2539_v29  ;;  %v2547_v33 = vsel %vm8030_vm13, 0, %v2546_v30 }
 0x261   :  { %v2177_v4 = vsel %vm2148_vm10, %v2118_v3, %v2176_v32  ;;  %v2191_v34 = vsel %vm2148_vm10, %v2134_v22, %v2190_v48  ;;  %6267 = vmatprep.subr.bf16.mxu1 %v6584_v5  ;;  %2541 = vst [vmem:[#allocation3 + $0xc] sm:$0x1] %v2540_v24  ;;  %2548 = vst [vmem:[#allocation3 + $0x14] sm:$0x1] %v2547_v33 }
 0x262   :  { %v2201_v54 = vpack.c.b16 %v2191_v34, %v2177_v4 }
 0x264   :  { %2344 = vmatmul.mubr.bf16.gmra.mrb[4].mxu1 %v2201_v54 }
 0x265   :  { %2513 = vmatprep.mubr.bf16.mxu1 %v7880_v18  ;;  %6268 = vmatpush3.bf16.msra.mxu1 %v6585_v40  ;;  %v6703_v18 = vld [vmem:[%s8943_s9 + $0xb4] ss:$8 sps:$4 sm:$0xff]  }
 0x267   :  { %v2603_v4 = vld [vmem:[#allocation3] sm:$0xf] }
 0x26c   :  { %2514 = vmatmul.mubr.bf16.vlgmr.msra.gmra.mrb[8].mxu1 %v7938_v58  ;;  %v2543_v58 = vld [vmem:[#allocation3 + $0x8] sm:$0x1] }
 0x26d   :  { %2521 = vmatprep.mubr.bf16.mxu1 %v2202_v19  ;;  %v2544_v16 = vsel %vm8030_vm13, 0, %v2543_v58  ;;  %v6588_v19 = vld [vmem:[%s8939_s5 + $0x84] ss:$8 sps:$4 sm:$0xff]  }
 0x26e   :  { %2545 = vst [vmem:[#allocation3 + $0x8] sm:$0x1] %v2544_v16  ;;  %2792 = vmatprep.subr.bf16.mxu1 %v6588_v19 }
 0x26f   :  { %2793 = vmatpush1.bf16.msra.mxu1 %v6586_v61 }
 0x270   :  { %2794 = vmatprep.subr.bf16.mxu1 %v6591_v15 }
 0x273   :  { %2795 = vmatpush1.bf16.msra.mxu1 %v6589_v8  ;;  %v6615_v8 = vld [vmem:[%s8939_s5 + $0x14] ss:$8 sps:$4 sm:$0xff]  }
 0x274   :  { %2522 = vmatmul.mubr.bf16.gmra.mrb[12].mxu1 %v2201_v54  ;;  %2796 = vmatprep.subr.bf16.mxu1 %v6594_v27 }
 0x275   :  { %2824 = vmatprep.mubr.bf16.mxu1 %v9098_v13  ;;  %v2607_v58 = vld [vmem:[#allocation3 + $0x8] sm:$0x1] }
 0x277   :  { %2797 = vmatpush1.bf16.msra.mxu1 %v6592_v35 }
 0x278   :  { %2798 = vmatprep.subr.bf16.mxu1 %v6597_v51 }
 0x27b   :  { %2799 = vmatpush1.bf16.msra.mxu1 %v6595_v26 }
 0x27c   :  { %2800 = vmatprep.subr.bf16.mxu1 %v6600_v53  ;;  %v2610_v53 = vld [vmem:[#allocation3 + $0xc] sm:$0xf] }
 0x27f   :  { %2801 = vmatpush1.bf16.msra.mxu1 %v6598_v25 }
 0x280   :  { %2802 = vmatprep.subr.bf16.mxu1 %v6603_v23 }
 0x283   :  { %2803 = vmatpush1.bf16.msra.mxu1 %v6601_v52 }
 0x284   :  { %2804 = vmatprep.subr.bf16.mxu1 %v6606_v37 }
 0x287   :  { %2805 = vmatpush1.bf16.msra.mxu1 %v6604_v59 }
 0x288   :  { %2806 = vmatprep.subr.bf16.mxu1 %v6609_v12 }
 0x28b   :  { %2807 = vmatpush1.bf16.msra.mxu1 %v6607_v46  ;;  %v2614_v46 = vld [vmem:[#allocation3 + $0x14] sm:$0x1] }
 0x28c   :  { %2937 = vmatprep.subr.bf16.mxu1 %v6612_v43 }
 0x31a   :  { %v6241_v36 = vpop.f32.mrb[0].mxu1 }
 0x31b   :  { %v6242_v11 = vpop.f32.mrb[1].mxu1 }
 0x31c   :  { %v6243_v21 = vadd.f32 %v6242_v11, %v6241_v36  ;;  %v6244_v9 = vpop.f32.mrb[2].mxu1 }
 0x31d   :  { %v6245_v50 = vpop.f32.mrb[3].mxu1 }
 0x31e   :  { %v6246_v1 = vadd.f32 %v6245_v50, %v6244_v9 }
 0x337   :  { %v6247_v38 = vpop.f32.mrb[4].mxu1 }
 0x338   :  { %v6248_v55 = vpop.f32.mrb[5].mxu1 }
 0x339   :  { %v6249_v45 = vadd.f32 %v6248_v55, %v6247_v38  ;;  %v6250_v63 = vpop.f32.mrb[6].mxu1 }
 0x33a   :  { %v6251_v62 = vpop.f32.mrb[7].mxu1 }
 0x33b   :  { %v6252_v14 = vadd.f32 %v6251_v62, %v6250_v63 }
 0x33f   :  { %v6269_v47 = vpop.f32.mrb[8].mxu1 }
 0x340   :  { %v6270_v56 = vpop.f32.mrb[9].mxu1 }
 0x341   :  { %v6271_v49 = vadd.f32 %v6270_v56, %v6269_v47  ;;  %v6272_v28 = vpop.f32.mrb[10].mxu1 }
 0x342   :  { %v6273_v17 = vpop.f32.mrb[11].mxu1 }
 0x343   :  { %v2530_v2 = vmax.f32 %v6243_v21, %v6271_v49  ;;  %v6274_v10 = vadd.f32 %v6273_v17, %v6272_v28 }
 0x345   :  { %v6219_v41 = vpack.c.bf16 %v2530_v2, %v2530_v2  ;;  %v2531_v6 = vmax.f32 %v6246_v1, %v6274_v10 }
 0x347   :  { %v2562_v57 = vshrl.u32 %v6219_v41, 16  ;;  %v6220_v3 = vpack.c.bf16 %v2531_v6, %v2531_v6  ;;  %v6275_v0 = vpop.f32.mrb[12].mxu1  ;;  %v2565_v7 = vshll.u32 %v6219_v41, 16 }
 0x348   :  { %v6276_v42 = vpop.f32.mrb[13].mxu1 }
 0x349   :  { %v2564_v39 = vrot.slane %v2562_v57, 7  ;;  %v2570_v22 = vshrl.u32 %v6220_v3, 16  ;;  %v6277_v32 = vadd.f32 %v6276_v42, %v6275_v0  ;;  %v6278_v31 = vpop.f32.mrb[14].mxu1  ;;  %v2573_v40 = vshll.u32 %v6220_v3, 16 }
 0x34a   :  { %v6279_v48 = vpop.f32.mrb[15].mxu1 }
 0x34b   :  { %v2567_v34 = vor.u32 %v2565_v7, %v2564_v39  ;;  %v2572_v54 = vrot.slane %v2570_v22, 7  ;;  %v2532_v60 = vmax.f32 %v6249_v45, %v6277_v32  ;;  %v2568_v44 = vrot.slane %v2564_v39, 4 }
 0x34c   :  { %v6280_v16 = vadd.f32 %v6279_v48, %v6278_v31 }
 0x34d   :  { %v2604_v61 = vsel %vm8092_vm11, %v2567_v34, %v2603_v4  ;;  %v2575_v19 = vor.u32 %v2573_v40, %v2572_v54  ;;  %v2577_v15 = vrot.slane %v2572_v54, 4  ;;  %v6221_v29 = vpack.c.bf16 %v2532_v60, %v2532_v60 }
 0x34e   :  { %2605 = vst [vmem:[#allocation3] sm:$0xf] %v2604_v61  ;;  %v2533_v24 = vmax.f32 %v6252_v14, %v6280_v16 }
 0x34f   :  { %v2576_v30 = vsel %vm7145_vm7, %v2568_v44, %v2575_v19  ;;  %v2608_v33 = vsel %vm8023_vm12, %v2577_v15, %v2607_v58  ;;  %v2579_v35 = vshrl.u32 %v6221_v29, 16  ;;  %v2582_v26 = vshll.u32 %v6221_v29, 16  ;;  %v6610_v44 = vld [vmem:[%s8939_s5] ss:$8 sps:$4 sm:$0xff]  }
 0x350   :  { %2606 = vst [vmem:[#allocation3 + $0x4] sm:$0xf] %v2576_v30  ;;  %2609 = vst [vmem:[#allocation3 + $0x8] sm:$0x1] %v2608_v33  ;;  %v6222_v27 = vpack.c.bf16 %v2533_v24, %v2533_v24  ;;  %v6722_v58 = vld [vmem:[%s8943_s9 + $0x20] ss:$8 sps:$4 sm:$0xff]  }
 0x351   :  { %v2581_v51 = vrot.slane %v2579_v35, 7 }
 0x352   :  { %v2587_v25 = vshrl.u32 %v6222_v27, 16  ;;  %v2590_v37 = vshll.u32 %v6222_v27, 16 }
 0x353   :  { %v2584_v23 = vor.u32 %v2582_v26, %v2581_v51  ;;  %v2585_v59 = vrot.slane %v2581_v51, 4 }
 0x354   :  { %v2589_v52 = vrot.slane %v2587_v25, 7 }
 0x355   :  { %v2611_v12 = vsel %vm8092_vm11, %v2584_v23, %v2610_v53  ;;  %v8104_v43 = vld [vmem:[#allocation3] sm:$0xf]  ;;  %v6613_v23 = vld [vmem:[%s8939_s5 + $0x10] ss:$8 sps:$4 sm:$0xff]  }
 0x356   :  { %2612 = vst [vmem:[#allocation3 + $0xc] sm:$0xf] %v2611_v12  ;;  %v2592_v36 = vor.u32 %v2590_v37, %v2589_v52  ;;  %v2594_v11 = vrot.slane %v2589_v52, 4  ;;  %v2640_v21 = vshrl.u32 %v8104_v43, 16  ;;  %v2643_v9 = vshll.u32 %v8104_v43, 16 }
 0x357   :  { %v8108_v50 = vld [vmem:[#allocation3 + $0x4] sm:$0xf]  ;;  %v2637_v55 = vld [vmem:[#allocation3 + $0x8] sm:$0x1]  ;;  %v2990_v47 = vld [vmem:[#allocation3] sm:$0xe] }
 0x358   :  { %v2593_v1 = vsel %vm7145_vm7, %v2585_v59, %v2592_v36  ;;  %v2615_v38 = vsel %vm8023_vm12, %v2594_v11, %v2614_v46  ;;  %v2642_v45 = vrot.slane %v2640_v21, 4  ;;  %v2645_v63 = vrot.slane %v2643_v9, 5  ;;  %v6618_v59 = vld [vmem:[%s8939_s5 + $0x24] ss:$8 sps:$4 sm:$0xff]   ;;  %v6616_v9 = vld [vmem:[%s8939_s5 + $0x20] ss:$8 sps:$4 sm:$0xff]  }
 0x359   :  { %2613 = vst [vmem:[#allocation3 + $0x10] sm:$0xf] %v2593_v1  ;;  %2616 = vst [vmem:[#allocation3 + $0x14] sm:$0x1] %v2615_v38  ;;  %v2649_v62 = vshll.u32 %v8108_v50, 16  ;;  %v2653_v14 = vshrl.u32 %v8108_v50, 16 }
 0x35a   :  { %v2646_v56 = vor.u32 %v2645_v63, %v2642_v45  ;;  %v2998_v49 = vrot.slane %v8108_v50, 5  ;;  %v2659_v2 = vshll.u32 %v2637_v55, 16  ;;  %v5993_v10 = vrot.slane %v2990_v47, 9  ;;  %v6621_v45 = vld [vmem:[%s8939_s5 + $0x34] ss:$8 sps:$4 sm:$0xff]  }
 0x35b   :  { %v2651_v28 = vrot.slane %v2649_v62, 5  ;;  %v2655_v17 = vrot.slane %v2653_v14, 4  ;;  %v3001_v6 = vrot.slane %v2637_v55, 5  ;;  %v6619_v63 = vld [vmem:[%s8939_s5 + $0x30] ss:$8 sps:$4 sm:$0xff]   ;;  %vm5781_vm7 = vcmask 523264  }
 0x35c   :  { %v3000_v41 = vrot.slane %v2998_v49, 4  ;;  %v2647_v57 = vrot.slane %v2646_v56, 4  ;;  %v8123_v22 = vsel %vm7255_vm15, %v5993_v10, %v2998_v49  ;;  %v2661_v4 = vrot.slane %v2659_v2, 5  ;;  %v6624_v62 = vld [vmem:[%s8939_s5 + $0x44] ss:$8 sps:$4 sm:$0xff]  }
 0x35d   :  { %v2656_v3 = vor.u32 %v2655_v17, %v2651_v28  ;;  %v8117_v0 = vld [vmem:[#allocation3 + $0xc] sm:$0xf]  ;;  %v6622_v14 = vld [vmem:[%s8939_s5 + $0x40] ss:$8 sps:$4 sm:$0xff]   ;;  %v6625_v56 = vld [vmem:[%s8939_s5 + $0x50] ss:$8 sps:$4 sm:$0xff]  }
 0x35e   :  { %v2664_v42 = vshrl.u32 %v8117_v0, 16  ;;  %v2667_v39 = vshll.u32 %v8117_v0, 16  ;;  %v8127_v32 = vsel %vm7255_vm15, %v3000_v41, %v3001_v6  ;;  %v2652_v16 = vsel %vm7218_vm14, %v2647_v57, %v2651_v28  ;;  %v2991_v29 = vld [vmem:[#allocation3 + $0xc] sm:$0xe]  ;;  %v6630_v49 = vld [vmem:[%s8939_s5 + $0x64] ss:$8 sps:$4 sm:$0xff]  }
 0x35f   :  { %v2657_v31 = vrot.slane %v2656_v3, 4  ;;  %v6011_v48 = vcombine.low %v8123_v22, %v8127_v32  ;;  %v5994_v26 = vrot.slane %v2991_v29, 9  ;;  %v6627_v47 = vld [vmem:[%s8939_s5 + $0x54] ss:$8 sps:$4 sm:$0xff]   ;;  %v6628_v28 = vld [vmem:[%s8939_s5 + $0x60] ss:$8 sps:$4 sm:$0xff]   ;;  %v5975_v6 = vcombine.low %v8104_v43, %v8108_v50 }
 0x360   :  { %v8131_v34 = vld [vmem:[#allocation3 + $0x10] sm:$0xf]  ;;  %v2638_v54 = vld [vmem:[#allocation3 + $0x14] sm:$0x1]  ;;  %v2666_v40 = vrot.slane %v2664_v42, 4  ;;  %v2669_v60 = vrot.slane %v2667_v39, 5 }
 0x361   :  { %v2662_v61 = vsel %vm7218_vm14, %v2657_v31, %v2661_v4  ;;  %v2673_v19 = vshll.u32 %v8131_v34, 16  ;;  %v2677_v15 = vshrl.u32 %v8131_v34, 16  ;;  %v3005_v33 = vrot.slane %v8131_v34, 5  ;;  %v6633_v17 = vld [vmem:[%s8939_s5 + $0x74] ss:$8 sps:$4 sm:$0xff]   ;;  %v6666_v22 = vld [vmem:[#allocation10 + $0x58] sm:$0xff]  }
 0x362   :  { %v5957_v24 = vcombine.low %v2652_v16, %v2662_v61  ;;  %v2670_v30 = vor.u32 %v2669_v60, %v2666_v40  ;;  %v2683_v51 = vshll.u32 %v2638_v54, 16  ;;  %v3008_v25 = vrot.slane %v2638_v54, 5  ;;  %v6631_v2 = vld [vmem:[%s8939_s5 + $0x70] ss:$8 sps:$4 sm:$0xff]   ;;  %v6637_v10 = vld [vmem:[%s8939_s5 + $0x104] ss:$8 sps:$4 sm:$0xff]  }
 0x363   :  { %v2675_v35 = vrot.slane %v2673_v19, 5  ;;  %v2679_v27 = vrot.slane %v2677_v15, 4  ;;  %v3007_v53 = vrot.slane %v3005_v33, 4  ;;  %v8155_v12 = vsel %vm7255_vm15, %v5994_v26, %v3005_v33  ;;  %v6635_v41 = vld [vmem:[%s8939_s5 + $0x100] ss:$8 sps:$4 sm:$0xff]   ;;  %v6660_v61 = vld [vmem:[#allocation10 + $0x40] sm:$0xff]  }
 0x364   :  { %2825 = vmatmul.mubr.bf16.vlgmr.msra.gmra.mrb[16].mxu1 %v5957_v24  ;;  %v2671_v52 = vrot.slane %v2670_v30, 4  ;;  %v2685_v11 = vrot.slane %v2683_v51, 5  ;;  %v6640_v57 = vld [vmem:[%s8939_s5 + $0x114] ss:$8 sps:$4 sm:$0xff]   ;;  %v6638_v3 = vld [vmem:[%s8939_s5 + $0x110] ss:$8 sps:$4 sm:$0xff]   ;;  %v5976_v50 = vcombine.low %v8117_v0, %v8131_v34  ;;  %6281 = vmatprep.subr.bf16.mxu0 %v6660_v61 }
 0x365   :  { %2938 = vmatpush1.bf16.msra.mxu1 %v6610_v44  ;;  %2834 = vmatprep.mubr.bf16.mxu1 %v9098_v13  ;;  %v2680_v37 = vor.u32 %v2679_v27, %v2675_v35  ;;  %v8159_v46 = vsel %vm7255_vm15, %v3007_v53, %v3008_v25  ;;  %v6644_v42 = vld [vmem:[%s8939_s5 + $0x124] ss:$8 sps:$4 sm:$0xff]   ;;  %v6642_v43 = vld [vmem:[%s8939_s5 + $0x120] ss:$8 sps:$4 sm:$0xff]   ;;  %v6647_v39 = vld [vmem:[%s8939_s5 + $0x134] ss:$8 sps:$4 sm:$0xff]  }
 0x366   :  { %2939 = vmatprep.subr.bf16.mxu1 %v6615_v8  ;;  %v6012_v21 = vcombine.low %v8155_v12, %v8159_v46  ;;  %v2676_v1 = vsel %vm7218_vm14, %v2671_v52, %v2675_v35  ;;  %v6645_v31 = vld [vmem:[%s8939_s5 + $0x130] ss:$8 sps:$4 sm:$0xff]   ;;  %v6650_v4 = vld [vmem:[%s8939_s5 + $0x144] ss:$8 sps:$4 sm:$0xff]   ;;  %v6648_v0 = vld [vmem:[%s8939_s5 + $0x140] ss:$8 sps:$4 sm:$0xff]  }
 0x367   :  { %v2681_v36 = vrot.slane %v2680_v37, 4  ;;  %v6653_v34 = vld [vmem:[%s8939_s5 + $0x154] ss:$8 sps:$4 sm:$0xff]   ;;  %v6651_v54 = vld [vmem:[%s8939_s5 + $0x150] ss:$8 sps:$4 sm:$0xff]   ;;  %v6664_v24 = vld [vmem:[#allocation10 + $0x50] sm:$0xff]  }
 0x368   :  { %v6656_v40 = vld [vmem:[%s8939_s5 + $0x164] ss:$8 sps:$4 sm:$0xff]   ;;  %v6654_v60 = vld [vmem:[%s8939_s5 + $0x160] ss:$8 sps:$4 sm:$0xff]   ;;  %v6659_v44 = vld [vmem:[%s8939_s5 + $0x174] ss:$8 sps:$4 sm:$0xff]  }
 0x369   :  { %2940 = vmatpush1.bf16.msra.mxu1 %v6613_v23  ;;  %v2686_v38 = vsel %vm7218_vm14, %v2681_v36, %v2685_v11  ;;  %v6657_v16 = vld [vmem:[%s8939_s5 + $0x170] ss:$8 sps:$4 sm:$0xff]   ;;  %v6665_v8 = vld [vmem:[#allocation10 + $0x10] sm:$0xff]   ;;  %v6667_v32 = vld [vmem:[#allocation10 + $0x18] sm:$0xff]  }
 0x36a   :  { %2941 = vmatprep.subr.bf16.mxu1 %v6618_v59  ;;  %v5958_v55 = vcombine.low %v2676_v1, %v2686_v38  ;;  %v6661_v19 = vld [vmem:[#allocation10] sm:$0xff]   ;;  %v6662_v15 = vld [vmem:[#allocation10 + $0x48] sm:$0xff]   ;;  %v6672_v27 = vld [vmem:[#allocation10 + $0x70] sm:$0xff]  }
 0x36b   :  { %6282 = vmatpush3.bf16.msra.mxu0 %v6661_v19  ;;  %v6663_v29 = vld [vmem:[#allocation10 + $0x8] sm:$0xff]   ;;  %v6669_v30 = vld [vmem:[#allocation10 + $0x20] sm:$0xff]   ;;  %v6673_v51 = vld [vmem:[#allocation10 + $0x30] sm:$0xff]  }
 0x36c   :  { %2835 = vmatmul.mubr.bf16.gmra.mrb[20].mxu1 %v5958_v55  ;;  %6283 = vmatprep.subr.bf16.mxu0 %v6662_v15  ;;  %v6670_v33 = vld [vmem:[#allocation10 + $0x68] sm:$0xff]   ;;  %v6674_v26 = vld [vmem:[#allocation10 + $0x78] sm:$0xff]   ;;  %v6676_v25 = vld [vmem:[#allocation10 + $0xc0] sm:$0xff]  }
 0x36d   :  { %2942 = vmatpush1.bf16.msra.mxu1 %v6616_v9  ;;  %2969 = vmatprep.mubr.bf16.mxu1 %v9098_v13  ;;  %v6671_v35 = vld [vmem:[#allocation10 + $0x28] sm:$0xff]   ;;  %v6675_v53 = vld [vmem:[#allocation10 + $0x38] sm:$0xff]   ;;  %v3176_v23 = vld [vmem:[%s8940_s6] sm:$0x3] }
 0x36e   :  { %2943 = vmatprep.subr.bf16.mxu1 %v6621_v45  ;;  %v3196_v52 = vld [vmem:[%s8941_s7] sm:$0x3]  ;;  %v9108_v37 = vld [vmem:[#allocation22_spill] sm:$0xff] }
 0x36f   :  { %6284 = vmatpush3.bf16.msra.mxu0 %v6663_v29  ;;  %v3181_v59 = vrot.slane %v3176_v23, %v9108_v37  ;;  %v9109_v12 = vld [vmem:[#allocation23_spill] sm:$0xff]  ;;  %v8273_v36 = vrot.slane %v3196_v52, %v9108_v37 }
 0x370   :  { %6285 = vmatprep.subr.bf16.mxu0 %v6664_v24  ;;  %v8270_v46 = vrot.slane %v3176_v23, %v9109_v12 }
 0x371   :  { %2944 = vmatpush1.bf16.msra.mxu1 %v6619_v63 }
 0x372   :  { %2945 = vmatprep.subr.bf16.mxu1 %v6624_v62 }
 0x373   :  { %6286 = vmatpush3.bf16.msra.mxu0 %v6665_v8 }
 0x374   :  { %6287 = vmatprep.subr.bf16.mxu0 %v6666_v22 }
 0x375   :  { %2946 = vmatpush1.bf16.msra.mxu1 %v6622_v14 }
 0x376   :  { %2947 = vmatprep.subr.bf16.mxu1 %v6627_v47 }
 0x377   :  { %6288 = vmatpush3.bf16.msra.mxu0 %v6667_v32 }
 0x379   :  { %2948 = vmatpush1.bf16.msra.mxu1 %v6625_v56 }
 0x37a   :  { %2949 = vmatprep.subr.bf16.mxu1 %v6630_v49 }
 0x37d   :  { %2950 = vmatpush1.bf16.msra.mxu1 %v6628_v28 }
 0x37e   :  { %2951 = vmatprep.subr.bf16.mxu1 %v6633_v17 }
 0x381   :  { %2952 = vmatpush1.bf16.msra.mxu1 %v6631_v2 }
 0x382   :  { %3115 = vmatprep.subr.bf16.mxu1 %v6637_v10 }
 0x384   :  { %2970 = vmatmul.mubr.bf16.vlgmr.msra.gmra.mrb[16].mxu1 %v5975_v6 }
 0x385   :  { %3116 = vmatpush1.bf16.msra.mxu1 %v6635_v41  ;;  %2979 = vmatprep.mubr.bf16.mxu1 %v9098_v13 }
 0x386   :  { %3117 = vmatprep.subr.bf16.mxu1 %v6640_v57 }
 0x389   :  { %3118 = vmatpush1.bf16.msra.mxu1 %v6638_v3 }
 0x38a   :  { %3119 = vmatprep.subr.bf16.mxu1 %v6644_v42 }
 0x38c   :  { %2980 = vmatmul.mubr.bf16.gmra.mrb[20].mxu1 %v5976_v50 }
 0x38d   :  { %3120 = vmatpush1.bf16.msra.mxu1 %v6642_v43  ;;  %3147 = vmatprep.mubr.bf16.mxu1 %v9098_v13  ;;  %v9110_v43 = vld [vmem:[#allocation24_spill] sm:$0xff] }
 0x38e   :  { %3121 = vmatprep.subr.bf16.mxu1 %v6647_v39 }
 0x391   :  { %3122 = vmatpush1.bf16.msra.mxu1 %v6645_v31 }
 0x392   :  { %3123 = vmatprep.subr.bf16.mxu1 %v6650_v4 }
 0x395   :  { %3124 = vmatpush1.bf16.msra.mxu1 %v6648_v0 }
 0x396   :  { %3125 = vmatprep.subr.bf16.mxu1 %v6653_v34 }
 0x399   :  { %3126 = vmatpush1.bf16.msra.mxu1 %v6651_v54 }
 0x39a   :  { %3127 = vmatprep.subr.bf16.mxu1 %v6656_v40 }
 0x39d   :  { %3128 = vmatpush1.bf16.msra.mxu1 %v6654_v60 }
 0x39e   :  { %3129 = vmatprep.subr.bf16.mxu1 %v6659_v44 }
 0x3a1   :  { %3130 = vmatpush1.bf16.msra.mxu1 %v6657_v16 }
 0x3a4   :  { %3148 = vmatmul.mubr.bf16.vlgmr.msra.gmra.mrb[16].mxu1 %v6011_v48  ;;  %v6668_v48 = vld [vmem:[#allocation10 + $0x60] sm:$0xff]  }
 0x3a5   :  { %3157 = vmatprep.mubr.bf16.mxu1 %v9098_v13  ;;  %6289 = vmatprep.subr.bf16.mxu0 %v6668_v48 }
 0x3a6   :  { %6290 = vmatpush3.bf16.msra.mxu0 %v6669_v30 }
 0x3a7   :  { %6291 = vmatprep.subr.bf16.mxu0 %v6670_v33 }
 0x3aa   :  { %6292 = vmatpush3.bf16.msra.mxu0 %v6671_v35 }
 0x3ab   :  { %6293 = vmatprep.subr.bf16.mxu0 %v6672_v27 }
 0x3ac   :  { %3158 = vmatmul.mubr.bf16.gmra.mrb[20].mxu1 %v6012_v21  ;;  %v8276_v21 = vrot.slane %v3196_v52, %v9109_v12 }
 0x3ae   :  { %6294 = vmatpush3.bf16.msra.mxu0 %v6673_v51 }
 0x3af   :  { %6295 = vmatprep.subr.bf16.mxu0 %v6674_v26 }
 0x3b2   :  { %6296 = vmatpush3.bf16.msra.mxu0 %v6675_v53 }
 0x3b3   :  { %6303 = vmatprep.subr.bf16.mxu0 %v6676_v25 }
 0x477   :  { %v3149_v11 = vpop.f32.mrb[16].mxu1 }
 0x478   :  { %v3188_v9 = vmul.f32 %v3181_v59, %v3149_v11  ;;  %v3151_v1 = vpop.f32.mrb[17].mxu1 }
 0x479   :  { %v3189_v38 = vmul.f32 %v8270_v46, %v3151_v1  ;;  %v3153_v55 = vpop.f32.mrb[18].mxu1 }
 0x47a   :  { %v3208_v45 = vadd.f32 %v8273_v36, %v3188_v9  ;;  %v3190_v63 = vmul.f32 %v3181_v59, %v3153_v55  ;;  %v3155_v62 = vpop.f32.mrb[19].mxu1 }
 0x47b   :  { %v3209_v14 = vadd.f32 %v8276_v21, %v3189_v38  ;;  %v3191_v47 = vmul.f32 %v8270_v46, %v3155_v62 }
 0x47c   :  { %v3216_v56 = vmax.f32 %v3208_v45, 0.0  ;;  %v3210_v49 = vadd.f32 %v8273_v36, %v3190_v63 }
 0x47d   :  { %v3217_v28 = vmax.f32 %v3209_v14, 0.0  ;;  %v3211_v17 = vadd.f32 %v8276_v21, %v3191_v47 }
 0x47e   :  { %v3218_v2 = vmax.f32 %v3210_v49, 0.0 }
 0x47f   :  { %v3232_v10 = vcombine.low %v3216_v56, %v3217_v28  ;;  %v3233_v41 = vcombine.high %v3216_v56, %v3217_v28  ;;  %v3219_v6 = vmax.f32 %v3211_v17, 0.0  ;;  %v3159_v57 = vpop.f32.mrb[20].mxu1 }
 0x480   :  { %v3192_v3 = vmul.f32 %v3181_v59, %v3159_v57  ;;  %v3161_v42 = vpop.f32.mrb[21].mxu1 }
 0x481   :  { %v3240_v50 = vrot.slane %v3232_v10, %v9110_v43  ;;  %v3247_v39 = vrot.slane %v3233_v41, %v9110_v43  ;;  %v3250_v31 = vcombine.low %v3218_v2, %v3219_v6  ;;  %v3251_v4 = vcombine.high %v3218_v2, %v3219_v6  ;;  %v3163_v0 = vpop.f32.mrb[22].mxu1 }
 0x482   :  { %v8287_v34 = vadd.f32 %v8273_v36, %v3192_v3  ;;  %v8289_v54 = vpop.f32.mrb[23].mxu1  ;;  %v8300_v15 = vmul.f32 %v8270_v46, %v3161_v42  ;;  %v8302_v29 = vmul.f32 %v3181_v59, %v3163_v0 }
 0x483   :  { %v3248_v40 = vcombine.high %v3240_v50, %v3240_v50  ;;  %v3249_v60 = vcombine.high %v3247_v39, %v3247_v39  ;;  %v3310_v44 = vrot.slane %v3240_v50, %v9110_v43  ;;  %v3326_v16 = vrot.slane %v3247_v39, %v9110_v43 }
 0x484   :  { %v8294_v61 = vrot.slane %v3250_v31, %v9110_v43  ;;  %v8297_v19 = vrot.slane %v3251_v4, %v9110_v43 }
 0x485   :  { %v3311_v24 = vcombine.high %v3310_v44, %v3310_v44  ;;  %v3318_v8 = vrot.slane %v3248_v40, %v9110_v43  ;;  %v3327_v22 = vcombine.high %v3326_v16, %v3326_v16  ;;  %v3334_v32 = vrot.slane %v3249_v60, %v9110_v43 }
 0x486   :  { %v3464_v48 = vsel %vm1463_vm0, %v3310_v44, -inf  ;;  %v3492_v30 = vsel %vm1463_vm0, %v3326_v16, -inf  ;;  %v3266_v33 = vcombine.high %v8294_v61, %v8294_v61  ;;  %v3267_v35 = vcombine.high %v8297_v19, %v8297_v19 }
 0x487   :  { %v3319_v27 = vcombine.high %v3318_v8, %v3318_v8  ;;  %v3335_v51 = vcombine.high %v3334_v32, %v3334_v32  ;;  %v3465_v26 = vrot.slane %v3464_v48, 4  ;;  %v3471_v53 = vsel %vm1463_vm0, %v3311_v24, -inf }
 0x488   :  { %v3472_v25 = vrot.slane %v3471_v53, 4  ;;  %v3478_v23 = vsel %vm1463_vm0, %v3318_v8, -inf  ;;  %v3493_v52 = vrot.slane %v3492_v30, 4  ;;  %v3499_v59 = vsel %vm1463_vm0, %v3327_v22, -inf }
 0x489   :  { %v3466_v11 = vmax.f32 %v3464_v48, %v3465_v26  ;;  %v3479_v9 = vrot.slane %v3478_v23, 4  ;;  %v3485_v1 = vsel %vm1463_vm0, %v3319_v27, -inf  ;;  %v3500_v38 = vrot.slane %v3499_v59, 4 }
 0x48a   :  { %v3473_v55 = vmax.f32 %v3471_v53, %v3472_v25  ;;  %v3486_v45 = vrot.slane %v3485_v1, 4  ;;  %v3494_v63 = vmax.f32 %v3492_v30, %v3493_v52  ;;  %v3506_v62 = vsel %vm1463_vm0, %v3334_v32, -inf }
 0x48b   :  { %v3467_v14 = vrot.slane %v3466_v11, 2  ;;  %v3480_v47 = vmax.f32 %v3478_v23, %v3479_v9  ;;  %v3501_v56 = vmax.f32 %v3499_v59, %v3500_v38  ;;  %v3507_v49 = vrot.slane %v3506_v62, 4 }
 0x48c   :  { %v3474_v28 = vrot.slane %v3473_v55, 2  ;;  %v3487_v17 = vmax.f32 %v3485_v1, %v3486_v45  ;;  %v3495_v2 = vrot.slane %v3494_v63, 2  ;;  %v3513_v10 = vsel %vm1463_vm0, %v3335_v51, -inf }
 0x48d   :  { %v3468_v41 = vmax.f32 %v3466_v11, %v3467_v14  ;;  %v3481_v6 = vrot.slane %v3480_v47, 2  ;;  %v3502_v57 = vrot.slane %v3501_v56, 2  ;;  %v3508_v3 = vmax.f32 %v3506_v62, %v3507_v49 }
 0x48e   :  { %v3475_v42 = vmax.f32 %v3473_v55, %v3474_v28  ;;  %v3488_v50 = vrot.slane %v3487_v17, 2  ;;  %v3496_v39 = vmax.f32 %v3494_v63, %v3495_v2  ;;  %v3514_v31 = vrot.slane %v3513_v10, 4 }
 0x48f   :  { %v3469_v4 = vrot.slane %v3468_v41, 1  ;;  %v3482_v0 = vmax.f32 %v3480_v47, %v3481_v6  ;;  %v3503_v40 = vmax.f32 %v3501_v56, %v3502_v57  ;;  %v3509_v60 = vrot.slane %v3508_v3, 2 }
 0x490   :  { %v3476_v44 = vrot.slane %v3475_v42, 1  ;;  %v3489_v16 = vmax.f32 %v3487_v17, %v3488_v50  ;;  %v3497_v24 = vrot.slane %v3496_v39, 1  ;;  %v3515_v8 = vmax.f32 %v3513_v10, %v3514_v31 }
 0x491   :  { %v3470_v22 = vmax.f32 %v3468_v41, %v3469_v4  ;;  %v3483_v32 = vrot.slane %v3482_v0, 1  ;;  %v3504_v48 = vrot.slane %v3503_v40, 1  ;;  %v3510_v30 = vmax.f32 %v3508_v3, %v3509_v60 }
 0x492   :  { %v3477_v27 = vmax.f32 %v3475_v42, %v3476_v44  ;;  %v3490_v51 = vrot.slane %v3489_v16, 1  ;;  %v3498_v26 = vmax.f32 %v3496_v39, %v3497_v24  ;;  %v3516_v53 = vrot.slane %v3515_v8, 2 }
 0x493   :  { %v3484_v25 = vmax.f32 %v3482_v0, %v3483_v32  ;;  %v3505_v23 = vmax.f32 %v3503_v40, %v3504_v48  ;;  %v3511_v52 = vrot.slane %v3510_v30, 1  ;;  %v3688_v59 = vpack.c.bf16 %v3470_v22, %v3470_v22 }
 0x494   :  { %v3491_v11 = vmax.f32 %v3489_v16, %v3490_v51  ;;  %v8318_v9 = vmax.f32 %v3515_v8, %v3516_v53  ;;  %v3689_v1 = vpack.c.bf16 %v3477_v27, %v3477_v27  ;;  %v3692_v38 = vpack.c.bf16 %v3498_v26, %v3498_v26 }
 0x495   :  { %v3512_v55 = vmax.f32 %v3510_v30, %v3511_v52  ;;  %v3690_v45 = vpack.c.bf16 %v3484_v25, %v3484_v25  ;;  %v3693_v63 = vpack.c.bf16 %v3505_v23, %v3505_v23  ;;  %v3220_v62 = vmax.f32 %v8287_v34, 0.0 }
 0x496   :  { %v3518_v14 = vrot.slane %v8318_v9, 1  ;;  %v3691_v47 = vpack.c.bf16 %v3491_v11, %v3491_v11  ;;  %v3784_v56 = vunpack.c.l.b16 %v3688_v59  ;;  %v3213_v49 = vadd.f32 %v8276_v21, %v8300_v15 }
 0x497   :  { %v8324_v28 = vunpack.c.l.b16 %v3689_v1  ;;  %v3786_v17 = vunpack.c.l.b16 %v3690_v45  ;;  %v3788_v2 = vunpack.c.l.b16 %v3692_v38  ;;  %v3342_v10 = vrot.slane %v8294_v61, %v9110_v43 }
 0x498   :  { %v3694_v41 = vpack.c.bf16 %v3512_v55, %v3512_v55  ;;  %v3350_v6 = vrot.slane %v3266_v33, %v9110_v43  ;;  %v3358_v57 = vrot.slane %v8297_v19, %v9110_v43  ;;  %v3366_v15 = vrot.slane %v3267_v35, %v9110_v43 }
 0x499   :  { %v8338_v3 = vunpack.c.l.b16 %v3693_v63  ;;  %v3816_v42 = vsel %vm2136_vm2, %v3786_v17, %v3784_v56  ;;  %v3343_v50 = vcombine.high %v3342_v10, %v3342_v10  ;;  %v3520_v39 = vsel %vm1463_vm0, %v3342_v10, -inf }
 0x49a   :  { %v8343_v31 = vsel %vm2138_vm4, %v3788_v2, %v3816_v42  ;;  %v3351_v61 = vcombine.high %v3350_v6, %v3350_v6  ;;  %v3359_v33 = vcombine.high %v3358_v57, %v3358_v57  ;;  %v3367_v4 = vcombine.high %v3366_v15, %v3366_v15 }
 0x49b   :  { %v3521_v0 = vrot.slane %v3520_v39, 4  ;;  %v3527_v40 = vsel %vm1463_vm0, %v3343_v50, -inf  ;;  %v3534_v60 = vsel %vm1463_vm0, %v3350_v6, -inf  ;;  %v3548_v19 = vsel %vm1463_vm0, %v3358_v57, -inf }
 0x49c   :  { %v3528_v35 = vrot.slane %v3527_v40, 4  ;;  %v3535_v44 = vrot.slane %v3534_v60, 4  ;;  %v3541_v16 = vsel %vm1463_vm0, %v3351_v61, -inf  ;;  %v3549_v24 = vrot.slane %v3548_v19, 4 }
 0x49d   :  { %v3522_v8 = vmax.f32 %v3520_v39, %v3521_v0  ;;  %v3542_v22 = vrot.slane %v3541_v16, 4  ;;  %v3555_v32 = vsel %vm1463_vm0, %v3359_v33, -inf  ;;  %v3562_v48 = vsel %vm1463_vm0, %v3366_v15, -inf }
 0x49e   :  { %v3529_v30 = vmax.f32 %v3527_v40, %v3528_v35  ;;  %v3536_v27 = vmax.f32 %v3534_v60, %v3535_v44  ;;  %v3550_v51 = vmax.f32 %v3548_v19, %v3549_v24  ;;  %v3556_v26 = vrot.slane %v3555_v32, 4 }
 0x49f   :  { %v3523_v53 = vrot.slane %v3522_v8, 2  ;;  %v8351_v25 = vmax.f32 %v3541_v16, %v3542_v22  ;;  %v3563_v23 = vrot.slane %v3562_v48, 4  ;;  %v8354_v52 = vsel %vm1463_vm0, %v3367_v4, -inf }
 0x4a0   :  { %v8356_v59 = vunpack.c.l.b16 %v3691_v47  ;;  %v3530_v11 = vrot.slane %v3529_v30, 2  ;;  %v3537_v1 = vrot.slane %v3536_v27, 2  ;;  %v3551_v38 = vrot.slane %v3550_v51, 2 }
 0x4a1   :  { %v8358_v55 = vunpack.c.l.b16 %v3694_v41  ;;  %v3524_v45 = vmax.f32 %v3522_v8, %v3523_v53  ;;  %v8360_v63 = vmax.f32 %v3555_v32, %v3556_v26  ;;  %v3564_v56 = vmax.f32 %v3562_v48, %v3563_v23 }
 0x4a2   :  { %v3538_v17 = vmax.f32 %v3536_v27, %v3537_v1  ;;  %v3544_v2 = vrot.slane %v8351_v25, 2  ;;  %v3552_v10 = vmax.f32 %v3550_v51, %v3551_v38  ;;  %v3570_v6 = vrot.slane %v8354_v52, 4 }
 0x4a3   :  { %v3525_v57 = vrot.slane %v3524_v45, 1  ;;  %v3565_v15 = vrot.slane %v3564_v56, 2  ;;  %v3221_v42 = vmax.f32 %v3213_v49, 0.0  ;;  %v3214_v47 = vadd.f32 %v8273_v36, %v8302_v29 }
 0x4a4   :  { %v8366_v50 = vmax.f32 %v3529_v30, %v3530_v11  ;;  %v3539_v41 = vrot.slane %v3538_v17, 1  ;;  %v3553_v39 = vrot.slane %v3552_v10, 1  ;;  %v3195_v61 = vmul.f32 %v8270_v46, %v8289_v54 }
 0x4a5   :  { %v3526_v33 = vmax.f32 %v3524_v45, %v3525_v57  ;;  %v3566_v4 = vmax.f32 %v3564_v56, %v3565_v15  ;;  %v3268_v0 = vcombine.low %v3220_v62, %v3221_v42  ;;  %v3269_v40 = vcombine.high %v3220_v62, %v3221_v42 }
 0x4a6   :  { %v8374_v60 = vmax.f32 %v3538_v17, %v3539_v41  ;;  %v8376_v49 = vmax.f32 %v3552_v10, %v3553_v39  ;;  %v3222_v36 = vmax.f32 %v3214_v47, 0.0  ;;  %v3215_v29 = vadd.f32 %v8276_v21, %v3195_v61 }
 0x4a7   :  { %v3567_v19 = vrot.slane %v3566_v4, 1  ;;  %v3696_v35 = vpack.c.bf16 %v3526_v33, %v3526_v33  ;;  %v3276_v44 = vrot.slane %v3268_v0, %v9110_v43  ;;  %v3283_v46 = vrot.slane %v3269_v40, %v9110_v43 }
 0x4a8   :  { %v3532_v54 = vrot.slane %v8366_v50, 1  ;;  %v3558_v16 = vrot.slane %v8360_v63, 2  ;;  %v3698_v34 = vpack.c.bf16 %v8374_v60, %v8374_v60  ;;  %v3223_v62 = vmax.f32 %v3215_v29, 0.0 }
 0x4a9   :  { %v3700_v24 = vpack.c.bf16 %v8376_v49, %v8376_v49  ;;  %v3284_v8 = vcombine.high %v3276_v44, %v3276_v44  ;;  %v3285_v22 = vcombine.high %v3283_v46, %v3283_v46  ;;  %v8390_v21 = vmax.f32 %v8318_v9, %v3518_v14 }
 0x4aa   :  { %v8392_v32 = vmax.f32 %v3566_v4, %v3567_v19  ;;  %v8394_v48 = vunpack.c.l.b16 %v3696_v35  ;;  %v3374_v30 = vrot.slane %v3276_v44, %v9110_v43  ;;  %v3390_v27 = vrot.slane %v3283_v46, %v9110_v43 }
 0x4ab   :  { %v3382_v51 = vrot.slane %v3284_v8, %v9110_v43  ;;  %v3398_v26 = vrot.slane %v3285_v22, %v9110_v43  ;;  %v8400_v53 = vcombine.low %v3222_v36, %v3223_v62  ;;  %v8402_v23 = vcombine.high %v3222_v36, %v3223_v62 }
 0x4ac   :  { %v3375_v11 = vcombine.high %v3374_v30, %v3374_v30  ;;  %v3391_v1 = vcombine.high %v3390_v27, %v3390_v27  ;;  %v3576_v9 = vsel %vm1463_vm0, %v3374_v30, -inf  ;;  %v3604_v14 = vsel %vm1463_vm0, %v3390_v27, -inf }
 0x4ad   :  { %v3383_v38 = vcombine.high %v3382_v51, %v3382_v51  ;;  %v3399_v45 = vcombine.high %v3398_v26, %v3398_v26  ;;  %v3577_v56 = vrot.slane %v3576_v9, 4  ;;  %v3590_v17 = vsel %vm1463_vm0, %v3382_v51, -inf }
 0x4ae   :  { %v3583_v10 = vsel %vm1463_vm0, %v3375_v11, -inf  ;;  %v3591_v57 = vrot.slane %v3590_v17, 4  ;;  %v3605_v15 = vrot.slane %v3604_v14, 4  ;;  %v3611_v42 = vsel %vm1463_vm0, %v3391_v1, -inf }
 0x4af   :  { %v3578_v47 = vmax.f32 %v3576_v9, %v3577_v56  ;;  %v3584_v41 = vrot.slane %v3583_v10, 4  ;;  %v3597_v39 = vsel %vm1463_vm0, %v3383_v38, -inf  ;;  %v3612_v61 = vrot.slane %v3611_v42, 4 }
 0x4b0   :  { %v3592_v33 = vmax.f32 %v3590_v17, %v3591_v57  ;;  %v3598_v4 = vrot.slane %v3597_v39, 4  ;;  %v3606_v0 = vmax.f32 %v3604_v14, %v3605_v15  ;;  %v3618_v40 = vsel %vm1463_vm0, %v3398_v26, -inf }
 0x4b1   :  { %v3579_v36 = vrot.slane %v3578_v47, 2  ;;  %v3585_v29 = vmax.f32 %v3583_v10, %v3584_v41  ;;  %v3613_v19 = vmax.f32 %v3611_v42, %v3612_v61  ;;  %v3619_v35 = vrot.slane %v3618_v40, 4 }
 0x4b2   :  { %v3593_v44 = vrot.slane %v3592_v33, 2  ;;  %v3599_v46 = vmax.f32 %v3597_v39, %v3598_v4  ;;  %v3607_v62 = vrot.slane %v3606_v0, 2  ;;  %v3625_v8 = vsel %vm1463_vm0, %v3399_v45, -inf }
 0x4b3   :  { %v3580_v22 = vmax.f32 %v3578_v47, %v3579_v36  ;;  %v3586_v30 = vrot.slane %v3585_v29, 2  ;;  %v3614_v27 = vrot.slane %v3613_v19, 2  ;;  %v3620_v51 = vmax.f32 %v3618_v40, %v3619_v35 }
 0x4b4   :  { %v3594_v11 = vmax.f32 %v3592_v33, %v3593_v44  ;;  %v3600_v1 = vrot.slane %v3599_v46, 2  ;;  %v3608_v9 = vmax.f32 %v3606_v0, %v3607_v62  ;;  %v3626_v38 = vrot.slane %v3625_v8, 4 }
 0x4b5   :  { %v3581_v14 = vrot.slane %v3580_v22, 1  ;;  %v3587_v56 = vmax.f32 %v3585_v29, %v3586_v30  ;;  %v3615_v26 = vmax.f32 %v3613_v19, %v3614_v27  ;;  %v3621_v17 = vrot.slane %v3620_v51, 2 }
 0x4b6   :  { %v3595_v10 = vrot.slane %v3594_v11, 1  ;;  %v3601_v57 = vmax.f32 %v3599_v46, %v3600_v1  ;;  %v3609_v15 = vrot.slane %v3608_v9, 1  ;;  %v3627_v42 = vmax.f32 %v3625_v8, %v3626_v38 }
 0x4b7   :  { %v3582_v41 = vmax.f32 %v3580_v22, %v3581_v14  ;;  %v3588_v39 = vrot.slane %v3587_v56, 1  ;;  %v3616_v61 = vrot.slane %v3615_v26, 1  ;;  %v3622_v45 = vmax.f32 %v3620_v51, %v3621_v17 }
 0x4b8   :  { %v3596_v47 = vmax.f32 %v3594_v11, %v3595_v10  ;;  %v3602_v4 = vrot.slane %v3601_v57, 1  ;;  %v3610_v36 = vmax.f32 %v3608_v9, %v3609_v15  ;;  %v3628_v40 = vrot.slane %v3627_v42, 2 }
 0x4b9   :  { %v3589_v33 = vmax.f32 %v3587_v56, %v3588_v39  ;;  %v3617_v35 = vmax.f32 %v3615_v26, %v3616_v61  ;;  %v3623_v0 = vrot.slane %v3622_v45, 1  ;;  %v3704_v44 = vpack.c.bf16 %v3582_v41, %v3582_v41 }
 0x4ba   :  { %v3603_v62 = vmax.f32 %v3601_v57, %v3602_v4  ;;  %v8412_v29 = vmax.f32 %v3627_v42, %v3628_v40  ;;  %v3706_v19 = vpack.c.bf16 %v3596_v47, %v3596_v47  ;;  %v3708_v30 = vpack.c.bf16 %v3610_v36, %v3610_v36 }
 0x4bb   :  { %v8417_v46 = vunpack.c.l.b16 %v3698_v34  ;;  %v8419_v8 = vmax.f32 %v3622_v45, %v3623_v0  ;;  %v3705_v22 = vpack.c.bf16 %v3589_v33, %v3589_v33  ;;  %v3709_v27 = vpack.c.bf16 %v3617_v35, %v3617_v35 }
 0x4bc   :  { %v8424_v51 = vunpack.c.l.b16 %v3700_v24  ;;  %v3707_v11 = vpack.c.bf16 %v3603_v62, %v3603_v62  ;;  %v3800_v1 = vunpack.c.l.b16 %v3704_v44  ;;  %v3802_v9 = vunpack.c.l.b16 %v3706_v19 }
 0x4bd   :  { %v3630_v38 = vrot.slane %v8412_v29, 1  ;;  %v3710_v14 = vpack.c.bf16 %v8419_v8, %v8419_v8  ;;  %v3804_v60 = vunpack.c.l.b16 %v3708_v30  ;;  %v3294_v34 = vrot.slane %v8400_v53, %v9110_v43 }
 0x4be   :  { %v8431_v56 = vunpack.c.l.b16 %v3705_v22  ;;  %v8433_v26 = vunpack.c.l.b16 %v3709_v27  ;;  %v3830_v49 = vsel %vm2136_vm2, %v3802_v9, %v3800_v1  ;;  %v3301_v24 = vrot.slane %v8402_v23, %v9110_v43 }
 0x4bf   :  { %v8438_v17 = vunpack.c.l.b16 %v3707_v11  ;;  %v8441_v10 = vsel %vm2138_vm4, %v3804_v60, %v3830_v49  ;;  %v3302_v57 = vcombine.high %v3294_v34, %v3294_v34  ;;  %v3406_v15 = vrot.slane %v3294_v34, %v9110_v43 }
 0x4c0   :  { %v3303_v42 = vcombine.high %v3301_v24, %v3301_v24  ;;  %v3422_v53 = vrot.slane %v3301_v24, %v9110_v43  ;;  %v8448_v41 = vmax.f32 %v8366_v50, %v3532_v54  ;;  %v3545_v23 = vmax.f32 %v8351_v25, %v3544_v2 }
 0x4c1   :  { %v3407_v39 = vcombine.high %v3406_v15, %v3406_v15  ;;  %v3414_v61 = vrot.slane %v3302_v57, %v9110_v43  ;;  %v3632_v45 = vsel %vm1463_vm0, %v3406_v15, -inf  ;;  %v3559_v47 = vmax.f32 %v8360_v63, %v3558_v16 }
 0x4c2   :  { %v3423_v4 = vcombine.high %v3422_v53, %v3422_v53  ;;  %v3430_v36 = vrot.slane %v3303_v42, %v9110_v43  ;;  %v3633_v40 = vrot.slane %v3632_v45, 4  ;;  %v3660_v50 = vsel %vm1463_vm0, %v3422_v53, -inf }
 0x4c3   :  { %v3415_v54 = vcombine.high %v3414_v61, %v3414_v61  ;;  %v3639_v33 = vsel %vm1463_vm0, %v3407_v39, -inf  ;;  %v3646_v25 = vsel %vm1463_vm0, %v3414_v61, -inf  ;;  %v3661_v2 = vrot.slane %v3660_v50, 4 }
 0x4c4   :  { %v3431_v35 = vcombine.high %v3430_v36, %v3430_v36  ;;  %v3634_v0 = vmax.f32 %v3632_v45, %v3633_v40  ;;  %v3640_v44 = vrot.slane %v3639_v33, 4  ;;  %v3647_v62 = vrot.slane %v3646_v25, 4 }
 0x4c5   :  { %v3653_v19 = vsel %vm1463_vm0, %v3415_v54, -inf  ;;  %v3662_v30 = vmax.f32 %v3660_v50, %v3661_v2  ;;  %v3667_v63 = vsel %vm1463_vm0, %v3423_v4, -inf  ;;  %v3674_v16 = vsel %vm1463_vm0, %v3430_v36, -inf }
 0x4c6   :  { %v3635_v22 = vrot.slane %v3634_v0, 2  ;;  %v3641_v27 = vmax.f32 %v3639_v33, %v3640_v44  ;;  %v3648_v11 = vmax.f32 %v3646_v25, %v3647_v62  ;;  %v3654_v1 = vrot.slane %v3653_v19, 4 }
 0x4c7   :  { %v3663_v9 = vrot.slane %v3662_v30, 2  ;;  %v3668_v60 = vrot.slane %v3667_v63, 4  ;;  %v3675_v34 = vrot.slane %v3674_v16, 4  ;;  %v3571_v49 = vmax.f32 %v8354_v52, %v3570_v6 }
 0x4c8   :  { %v3636_v24 = vmax.f32 %v3634_v0, %v3635_v22  ;;  %v3642_v57 = vrot.slane %v3641_v27, 2  ;;  %v3649_v15 = vrot.slane %v3648_v11, 2  ;;  %v3655_v42 = vmax.f32 %v3653_v19, %v3654_v1 }
 0x4c9   :  { %v3664_v53 = vmax.f32 %v3662_v30, %v3663_v9  ;;  %v3669_v39 = vmax.f32 %v3667_v63, %v3668_v60  ;;  %v3676_v61 = vmax.f32 %v3674_v16, %v3675_v34  ;;  %v3681_v45 = vsel %vm1463_vm0, %v3431_v35, -inf }
 0x4ca   :  { %v3637_v4 = vrot.slane %v3636_v24, 1  ;;  %v3643_v36 = vmax.f32 %v3641_v27, %v3642_v57  ;;  %v3650_v40 = vmax.f32 %v3648_v11, %v3649_v15  ;;  %v3656_v50 = vrot.slane %v3655_v42, 2 }
 0x4cb   :  { %v3665_v54 = vrot.slane %v3664_v53, 1  ;;  %v3670_v33 = vrot.slane %v3669_v39, 2  ;;  %v3677_v25 = vrot.slane %v3676_v61, 2  ;;  %v3546_v2 = vrot.slane %v3545_v23, 1 }
 0x4cc   :  { %v3638_v44 = vmax.f32 %v3636_v24, %v3637_v4  ;;  %v3644_v62 = vrot.slane %v3643_v36, 1  ;;  %v3651_v52 = vrot.slane %v3650_v40, 1  ;;  %v3560_v6 = vrot.slane %v3559_v47, 1 }
 0x4cd   :  { %v8469_v0 = vmax.f32 %v3664_v53, %v3665_v54  ;;  %v3678_v19 = vmax.f32 %v3676_v61, %v3677_v25  ;;  %v3682_v30 = vrot.slane %v3681_v45, 4  ;;  %v3572_v63 = vrot.slane %v3571_v49, 2 }
 0x4ce   :  { %v8474_v35 = vunpack.c.l.b16 %v3710_v14  ;;  %v3652_v16 = vmax.f32 %v3650_v40, %v3651_v52  ;;  %v3712_v22 = vpack.c.bf16 %v3638_v44, %v3638_v44  ;;  %v3547_v27 = vmax.f32 %v3545_v23, %v3546_v2 }
 0x4cf   :  { %v3679_v11 = vrot.slane %v3678_v19, 1  ;;  %v3561_v1 = vmax.f32 %v3559_v47, %v3560_v6  ;;  %v3573_v9 = vmax.f32 %v3571_v49, %v3572_v63  ;;  %v3631_v60 = vmax.f32 %v8412_v29, %v3630_v38 }
 0x4d0   :  { %v3716_v34 = vpack.c.bf16 %v8469_v0, %v8469_v0  ;;  %v3645_v24 = vmax.f32 %v3643_v36, %v3644_v62  ;;  %v3657_v57 = vmax.f32 %v3655_v42, %v3656_v50  ;;  %v3671_v15 = vmax.f32 %v3669_v39, %v3670_v33 }
 0x4d1   :  { %v3714_v53 = vpack.c.bf16 %v3652_v16, %v3652_v16  ;;  %v3808_v8 = vunpack.c.l.b16 %v3712_v22  ;;  %v3574_v14 = vrot.slane %v3573_v9, 1  ;;  %v3683_v61 = vmax.f32 %v3681_v45, %v3682_v30 }
 0x4d2   :  { %v3680_v4 = vmax.f32 %v3678_v19, %v3679_v11  ;;  %v3658_v40 = vrot.slane %v3657_v57, 1  ;;  %v3672_v23 = vrot.slane %v3671_v15, 1  ;;  %v3695_v47 = vpack.c.bf16 %v8390_v21, %v8390_v21 }
 0x4d3   :  { %v3575_v49 = vmax.f32 %v3573_v9, %v3574_v14  ;;  %v3684_v54 = vrot.slane %v3683_v61, 2  ;;  %v3697_v29 = vpack.c.bf16 %v8448_v41, %v8448_v41  ;;  %v3699_v38 = vpack.c.bf16 %v3547_v27, %v3547_v27 }
 0x4d4   :  { %v3659_v25 = vmax.f32 %v3657_v57, %v3658_v40  ;;  %v3673_v36 = vmax.f32 %v3671_v15, %v3672_v23  ;;  %v3701_v42 = vpack.c.bf16 %v3561_v1, %v3561_v1  ;;  %v3711_v39 = vpack.c.bf16 %v3631_v60, %v3631_v60 }
 0x4d5   :  { %v3810_v50 = vunpack.c.l.b16 %v3714_v53  ;;  %v3685_v33 = vmax.f32 %v3683_v61, %v3684_v54  ;;  %v3703_v2 = vpack.c.bf16 %v3575_v49, %v3575_v49  ;;  %v3713_v45 = vpack.c.bf16 %v3645_v24, %v3645_v24 }
 0x4d6   :  { %v3715_v44 = vpack.c.bf16 %v3659_v25, %v3659_v25  ;;  %v3717_v62 = vpack.c.bf16 %v3673_v36, %v3673_v36  ;;  %v3791_v52 = vunpack.c.l.b16 %v3695_v47  ;;  %v3793_v6 = vunpack.c.l.b16 %v3697_v29 }
 0x4d7   :  { %v3686_v0 = vrot.slane %v3685_v33, 1  ;;  %v3795_v21 = vunpack.c.l.b16 %v3699_v38  ;;  %v3797_v19 = vunpack.c.l.b16 %v3701_v42  ;;  %v3799_v30 = vunpack.c.l.b16 %v3703_v2  ;;  %v6677_v42 = vld [vmem:[#allocation10 + $0x80] sm:$0xff]  }
 0x4d8   :  { %v3807_v63 = vunpack.c.l.b16 %v3711_v39  ;;  %v3809_v16 = vunpack.c.l.b16 %v3713_v45  ;;  %v3811_v41 = vunpack.c.l.b16 %v3715_v44  ;;  %v3823_v22 = vsel %vm2136_vm2, %v8356_v59, %v8324_v28  ;;  %v6684_v2 = vld [vmem:[#allocation10 + $0xe0] sm:$0xff]   ;;  %v6686_v44 = vld [vmem:[#allocation10 + $0xe8] sm:$0xff]  }
 0x4d9   :  { %v3687_v27 = vmax.f32 %v3685_v33, %v3686_v0  ;;  %v3824_v11 = vsel %vm2138_vm4, %v8338_v3, %v3823_v22  ;;  %v3837_v1 = vsel %vm2136_vm2, %v8438_v17, %v8431_v56  ;;  %v3702_v9 = vpack.c.bf16 %v8392_v32, %v8392_v32  ;;  %v6678_v33 = vld [vmem:[#allocation10 + $0xc8] sm:$0xff]   ;;  %v6685_v45 = vld [vmem:[#allocation10 + $0xa0] sm:$0xff]   ;;  %v6690_v0 = vld [vmem:[#allocation10 + $0xf8] sm:$0xff]  }
 0x4da   :  { %v3813_v60 = vunpack.c.l.b16 %v3717_v62  ;;  %v3825_v24 = vsel %vm2140_vm5, %v3791_v52, %v3824_v11  ;;  %v3838_v57 = vsel %vm2138_vm4, %v8433_v26, %v3837_v1  ;;  %v3818_v28 = vsel %vm2140_vm5, %v8358_v55, %v8343_v31  ;;  %v6687_v62 = vld [vmem:[#allocation10 + $0xa8] sm:$0xff]   ;;  %v6688_v52 = vld [vmem:[#allocation10 + $0xf0] sm:$0xff]   ;;  %v4160_v11 = vld [vmem:[#allocation4 + $0x8] sm:$0x1] }
 0x4db   :  { %v3719_v59 = vpack.c.bf16 %v3687_v27, %v3687_v27  ;;  %v3826_v3 = vsel %vm2142_vm6, %v3793_v6, %v3825_v24  ;;  %v3839_v15 = vsel %vm2140_vm5, %v3807_v63, %v3838_v57  ;;  %v3718_v53 = vpack.c.bf16 %v3680_v4, %v3680_v4  ;;  %v6689_v6 = vld [vmem:[#allocation10 + $0xb0] sm:$0xff]   ;;  %v6697_v27 = vld [vmem:[%s8943_s9 + $0x94] ss:$8 sps:$4 sm:$0xff]   ;;  %v4166_v1 = vld [vmem:[#allocation4 + $0xc] sm:$0x1] }
 0x4dc   :  { %v3827_v56 = vsel %vm2144_vm8, %v3795_v21, %v3826_v3  ;;  %v3840_v32 = vsel %vm2142_vm6, %v3809_v16, %v3839_v15  ;;  %v3798_v17 = vunpack.c.l.b16 %v3702_v9  ;;  %v3819_v14 = vsel %vm2142_vm6, %v8394_v48, %v3818_v28  ;;  %v6691_v21 = vld [vmem:[#allocation10 + $0xb8] sm:$0xff]   ;;  %v6695_v24 = vld [vmem:[%s8943_s9 + $0x90] ss:$8 sps:$4 sm:$0xff]  }
 0x4dd   :  { %v3815_v61 = vunpack.c.l.b16 %v3719_v59  ;;  %v3828_v26 = vsel %vm2146_vm9, %v3797_v19, %v3827_v56  ;;  %v3841_v40 = vsel %vm2144_vm8, %v3811_v41, %v3840_v32  ;;  %v3820_v31 = vsel %vm2144_vm8, %v8417_v46, %v3819_v14  ;;  %v4157_v19 = vld [vmem:[#allocation4] sm:$0x1]  ;;  %v6694_v41 = vld [vmem:[%s8943_s9 + $0x84] ss:$8 sps:$4 sm:$0xff]   ;;  %v6701_v59 = vld [vmem:[%s8943_s9 + $0xb0] ss:$8 sps:$4 sm:$0xff]  }
 0x4de   :  { %v3829_v55 = vsel %vm2148_vm10, %v3799_v30, %v3828_v26  ;;  %v3842_v4 = vsel %vm2146_vm9, %v3813_v60, %v3841_v40  ;;  %v3821_v23 = vsel %vm2146_vm9, %v8424_v51, %v3820_v31  ;;  %v3832_v47 = vsel %vm2140_vm5, %v8474_v35, %v8441_v10  ;;  %v6679_v10 = vld [vmem:[#allocation10 + $0x88] sm:$0xff]   ;;  %v6680_v35 = vld [vmem:[#allocation10 + $0xd0] sm:$0xff]  }
 0x4df   :  { %v3812_v48 = vunpack.c.l.b16 %v3716_v34  ;;  %v3843_v49 = vsel %vm2148_vm10, %v3815_v61, %v3842_v4  ;;  %v3822_v54 = vsel %vm2148_vm10, %v3798_v17, %v3821_v23  ;;  %v3833_v29 = vsel %vm2142_vm6, %v3808_v8, %v3832_v47  ;;  %v6681_v34 = vld [vmem:[#allocation10 + $0x90] sm:$0xff]   ;;  %v6682_v8 = vld [vmem:[#allocation10 + $0xd8] sm:$0xff]   ;;  %v6707_v56 = vld [vmem:[%s8943_s9 + $0xd0] ss:$8 sps:$4 sm:$0xff]  }
 0x4e0   :  { %v3845_v38 = vpack.c.b16 %v3843_v49, %v3829_v55  ;;  %v3814_v46 = vunpack.c.l.b16 %v3718_v53  ;;  %v3834_v25 = vsel %vm2144_vm8, %v3810_v50, %v3833_v29  ;;  %v6683_v50 = vld [vmem:[#allocation10 + $0x98] sm:$0xff]   ;;  %v4163_v30 = vld [vmem:[#allocation4 + $0x4] sm:$0x1]  ;;  %v4158_v63 = vsel %vm8023_vm12, 0, %v4157_v19  ;;  %v6709_v53 = vld [vmem:[%s8943_s9 + $0xd4] ss:$8 sps:$4 sm:$0xff]  }
 0x4e1   :  { %v3835_v36 = vsel %vm2146_vm9, %v3812_v48, %v3834_v25  ;;  %v4164_v16 = vsel %vm8030_vm13, 0, %v4163_v30  ;;  %4159 = vst [vmem:[#allocation4] sm:$0x1] %v4158_v63  ;;  %v6692_v22 = vld [vmem:[%s8943_s9 + $0x80] ss:$8 sps:$4 sm:$0xff]   ;;  %v4161_v9 = vsel %vm8023_vm12, 0, %v4160_v11 }
 0x4e2   :  { %3976 = vmatprep.mubr.bf16.mxu0 %v3845_v38  ;;  %v3836_v51 = vsel %vm2148_vm10, %v3814_v46, %v3835_v36  ;;  %4165 = vst [vmem:[#allocation4 + $0x4] sm:$0x1] %v4164_v16  ;;  %v4167_v60 = vsel %vm8030_vm13, 0, %v4166_v1  ;;  %4162 = vst [vmem:[#allocation4 + $0x8] sm:$0x1] %v4161_v9 }
 0x4e3   :  { %v3844_v39 = vpack.c.b16 %v3836_v51, %v3822_v54  ;;  %4168 = vst [vmem:[#allocation4 + $0xc] sm:$0x1] %v4167_v60  ;;  %v6700_v57 = vld [vmem:[%s8943_s9 + $0xa4] ss:$8 sps:$4 sm:$0xff]   ;;  %v6698_v28 = vld [vmem:[%s8943_s9 + $0xa0] ss:$8 sps:$4 sm:$0xff]  }
 0x4e4   :  { %v6706_v3 = vld [vmem:[%s8943_s9 + $0xc4] ss:$8 sps:$4 sm:$0xff]   ;;  %v6704_v15 = vld [vmem:[%s8943_s9 + $0xc0] ss:$8 sps:$4 sm:$0xff]   ;;  %v6715_v14 = vld [vmem:[%s8943_s9 + $0xf4] ss:$8 sps:$4 sm:$0xff]  }
 0x4e5   :  { %3977 = vmatmul.mubr.bf16.vlgmr.msra.gmra.mrb[16].mxu0 %v3844_v39  ;;  %v6712_v32 = vld [vmem:[%s8943_s9 + $0xe4] ss:$8 sps:$4 sm:$0xff]   ;;  %v6710_v17 = vld [vmem:[%s8943_s9 + $0xe0] ss:$8 sps:$4 sm:$0xff]   ;;  %v6713_v61 = vld [vmem:[%s8943_s9 + $0xf0] ss:$8 sps:$4 sm:$0xff]  }
 0x4e6   :  { %6304 = vmatpush3.bf16.msra.mxu0 %v6677_v42  ;;  %4146 = vmatprep.mubr.bf16.mxu0 %v3845_v38  ;;  %v6718_v26 = vld [vmem:[%s8943_s9 + $0x4] ss:$8 sps:$4 sm:$0xff]  }
 0x4e7   :  { %6305 = vmatprep.subr.bf16.mxu0 %v6678_v33 }
 0x4ea   :  { %6306 = vmatpush3.bf16.msra.mxu0 %v6679_v10 }
 0x4eb   :  { %6307 = vmatprep.subr.bf16.mxu0 %v6680_v35 }
 0x4ee   :  { %6308 = vmatpush3.bf16.msra.mxu0 %v6681_v34  ;;  %v4197_v34 = vld [vmem:[#allocation4] sm:$0xf] }
 0x4ef   :  { %6309 = vmatprep.subr.bf16.mxu0 %v6682_v8  ;;  %v4200_v8 = vld [vmem:[#allocation4 + $0x4] sm:$0x1] }
 0x4f2   :  { %6310 = vmatpush3.bf16.msra.mxu0 %v6683_v50 }
 0x4f3   :  { %6311 = vmatprep.subr.bf16.mxu0 %v6684_v2 }
 0x4f6   :  { %6312 = vmatpush3.bf16.msra.mxu0 %v6685_v45 }
 0x4f7   :  { %6313 = vmatprep.subr.bf16.mxu0 %v6686_v44 }
 0x4fa   :  { %6314 = vmatpush3.bf16.msra.mxu0 %v6687_v62  ;;  %v4203_v62 = vld [vmem:[#allocation4 + $0x8] sm:$0xf] }
 0x4fb   :  { %6315 = vmatprep.subr.bf16.mxu0 %v6688_v52  ;;  %v4206_v52 = vld [vmem:[#allocation4 + $0xc] sm:$0x1] }
 0x4fe   :  { %6316 = vmatpush3.bf16.msra.mxu0 %v6689_v6 }
 0x4ff   :  { %6317 = vmatprep.subr.bf16.mxu0 %v6690_v0 }
 0x502   :  { %6318 = vmatpush3.bf16.msra.mxu0 %v6691_v21 }
 0x503   :  { %4358 = vmatprep.subr.bf16.mxu0 %v6694_v41 }
 0x505   :  { %4147 = vmatmul.mubr.bf16.vlgmr.msra.gmra.mrb[20].mxu0 %v3844_v39 }
 0x506   :  { %4390 = vmatprep.mubr.bf16.mxu0 %v9098_v13  ;;  %4359 = vmatpush1.bf16.msra.mxu0 %v6692_v22 }
 0x507   :  { %4360 = vmatprep.subr.bf16.mxu0 %v6697_v27 }
 0x50a   :  { %4361 = vmatpush1.bf16.msra.mxu0 %v6695_v24 }
 0x50b   :  { %4362 = vmatprep.subr.bf16.mxu0 %v6700_v57 }
 0x50e   :  { %4363 = vmatpush1.bf16.msra.mxu0 %v6698_v28 }
 0x50f   :  { %4364 = vmatprep.subr.bf16.mxu0 %v6703_v18 }
 0x512   :  { %4365 = vmatpush1.bf16.msra.mxu0 %v6701_v59 }
 0x513   :  { %4366 = vmatprep.subr.bf16.mxu0 %v6706_v3 }
 0x516   :  { %4367 = vmatpush1.bf16.msra.mxu0 %v6704_v15 }
 0x517   :  { %4368 = vmatprep.subr.bf16.mxu0 %v6709_v53 }
 0x51a   :  { %4369 = vmatpush1.bf16.msra.mxu0 %v6707_v56 }
 0x51b   :  { %4370 = vmatprep.subr.bf16.mxu0 %v6712_v32 }
 0x51e   :  { %4371 = vmatpush1.bf16.msra.mxu0 %v6710_v17 }
 0x51f   :  { %4372 = vmatprep.subr.bf16.mxu0 %v6715_v14 }
 0x522   :  { %4373 = vmatpush1.bf16.msra.mxu0 %v6713_v61 }
 0x523   :  { %4487 = vmatprep.subr.bf16.mxu0 %v6718_v26 }
 0x5b8   :  { %v6297_v40 = vpop.f32.mrb[16].mxu0 }
 0x5b9   :  { %v6298_v31 = vpop.f32.mrb[17].mxu0 }
 0x5ba   :  { %v6299_v55 = vadd.f32 %v6298_v31, %v6297_v40  ;;  %v6300_v4 = vpop.f32.mrb[18].mxu0 }
 0x5bb   :  { %v6301_v23 = vpop.f32.mrb[19].mxu0 }
 0x5bc   :  { %v6302_v47 = vadd.f32 %v6301_v23, %v6300_v4 }
 0x5d8   :  { %v6319_v48 = vpop.f32.mrb[20].mxu0 }
 0x5d9   :  { %v6320_v49 = vpop.f32.mrb[21].mxu0 }
 0x5da   :  { %v6321_v54 = vadd.f32 %v6320_v49, %v6319_v48  ;;  %v6322_v29 = vpop.f32.mrb[22].mxu0 }
 0x5db   :  { %v6323_v38 = vpop.f32.mrb[23].mxu0 }
 0x5dc   :  { %v4155_v46 = vmax.f32 %v6299_v55, %v6321_v54  ;;  %v6324_v25 = vadd.f32 %v6323_v38, %v6322_v29  ;;  %v6721_v54 = vld [vmem:[%s8943_s9 + $0x14] ss:$8 sps:$4 sm:$0xff]   ;;  %v6719_v29 = vld [vmem:[%s8943_s9 + $0x10] ss:$8 sps:$4 sm:$0xff]   ;;  %v6724_v38 = vld [vmem:[%s8943_s9 + $0x24] ss:$8 sps:$4 sm:$0xff]  }
 0x5de   :  { %v6223_v36 = vpack.c.bf16 %v4155_v46, %v4155_v46  ;;  %v4156_v51 = vmax.f32 %v6302_v47, %v6324_v25  ;;  %v6716_v47 = vld [vmem:[%s8943_s9] ss:$8 sps:$4 sm:$0xff]   ;;  %v6727_v46 = vld [vmem:[%s8943_s9 + $0x34] ss:$8 sps:$4 sm:$0xff]   ;;  %v6725_v25 = vld [vmem:[%s8943_s9 + $0x30] ss:$8 sps:$4 sm:$0xff]  }
 0x5e0   :  { %v4178_v42 = vshrl.u32 %v6223_v36, 16  ;;  %v6224_v39 = vpack.c.bf16 %v4156_v51, %v4156_v51  ;;  %v4181_v10 = vshll.u32 %v6223_v36, 16  ;;  %v6730_v36 = vld [vmem:[%s8943_s9 + $0x44] ss:$8 sps:$4 sm:$0xff]   ;;  %v6728_v51 = vld [vmem:[%s8943_s9 + $0x40] ss:$8 sps:$4 sm:$0xff]  }
 0x5e2   :  { %v4180_v33 = vrot.slane %v4178_v42, 7  ;;  %v4186_v35 = vshrl.u32 %v6224_v39, 16  ;;  %v4189_v44 = vshll.u32 %v6224_v39, 16  ;;  %v6733_v42 = vld [vmem:[%s8943_s9 + $0x54] ss:$8 sps:$4 sm:$0xff]  }
 0x5e3   :  { %v6731_v39 = vld [vmem:[%s8943_s9 + $0x50] ss:$8 sps:$4 sm:$0xff]  }
 0x5e4   :  { %v4183_v50 = vor.u32 %v4181_v10, %v4180_v33  ;;  %v4184_v2 = vrot.slane %v4180_v33, 4  ;;  %v4188_v45 = vrot.slane %v4186_v35, 7  ;;  %v6736_v33 = vld [vmem:[%s8943_s9 + $0x64] ss:$8 sps:$4 sm:$0xff]   ;;  %v6734_v10 = vld [vmem:[%s8943_s9 + $0x60] ss:$8 sps:$4 sm:$0xff]  }
 0x5e5   :  { %v6739_v35 = vld [vmem:[%s8943_s9 + $0x74] ss:$8 sps:$4 sm:$0xff]  }
 0x5e6   :  { %v4198_v6 = vsel %vm8092_vm11, %v4183_v50, %v4197_v34  ;;  %v4201_v0 = vsel %vm8023_vm12, %v4184_v2, %v4200_v8  ;;  %v4191_v21 = vor.u32 %v4189_v44, %v4188_v45  ;;  %v4192_v19 = vrot.slane %v4188_v45, 4  ;;  %v6737_v34 = vld [vmem:[%s8943_s9 + $0x70] ss:$8 sps:$4 sm:$0xff]   ;;  %v6743_v8 = vld [vmem:[%s8943_s9 + $0x104] ss:$8 sps:$4 sm:$0xff]  }
 0x5e7   :  { %4199 = vst [vmem:[#allocation4] sm:$0xf] %v4198_v6  ;;  %4202 = vst [vmem:[#allocation4 + $0x4] sm:$0x1] %v4201_v0  ;;  %v6741_v50 = vld [vmem:[%s8943_s9 + $0x100] ss:$8 sps:$4 sm:$0xff]  }
 0x5e8   :  { %v4204_v30 = vsel %vm8092_vm11, %v4191_v21, %v4203_v62  ;;  %v4207_v63 = vsel %vm8023_vm12, %v4192_v19, %v4206_v52  ;;  %v6746_v45 = vld [vmem:[%s8943_s9 + $0x114] ss:$8 sps:$4 sm:$0xff]   ;;  %v6744_v44 = vld [vmem:[%s8943_s9 + $0x110] ss:$8 sps:$4 sm:$0xff]   ;;  %v6749_v62 = vld [vmem:[%s8943_s9 + $0x124] ss:$8 sps:$4 sm:$0xff]  }
 0x5e9   :  { %4205 = vst [vmem:[#allocation4 + $0x8] sm:$0xf] %v4204_v30  ;;  %4208 = vst [vmem:[#allocation4 + $0xc] sm:$0x1] %v4207_v63  ;;  %v6747_v52 = vld [vmem:[%s8943_s9 + $0x120] ss:$8 sps:$4 sm:$0xff]  }
 0x5ea   :  { %v6752_v6 = vld [vmem:[%s8943_s9 + $0x134] ss:$8 sps:$4 sm:$0xff]   ;;  %v6755_v0 = vld [vmem:[%s8943_s9 + $0x144] ss:$8 sps:$4 sm:$0xff]   ;;  %v6753_v21 = vld [vmem:[%s8943_s9 + $0x140] ss:$8 sps:$4 sm:$0xff]  }
 0x5eb   :  { %v6758_v19 = vld [vmem:[%s8943_s9 + $0x154] ss:$8 sps:$4 sm:$0xff]   ;;  %v6756_v30 = vld [vmem:[%s8943_s9 + $0x150] ss:$8 sps:$4 sm:$0xff]   ;;  %v6761_v63 = vld [vmem:[%s8943_s9 + $0x164] ss:$8 sps:$4 sm:$0xff]  }
 0x5ee   :  { %v8592_v16 = vld [vmem:[#allocation4] sm:$0xf]  ;;  %v4227_v22 = vld [vmem:[#allocation4 + $0x4] sm:$0x1] }
 0x5ef   :  { %v4530_v41 = vld [vmem:[#allocation4] sm:$0xe]  ;;  %v4230_v27 = vshrl.u32 %v8592_v16, 16  ;;  %v4233_v11 = vshll.u32 %v8592_v16, 16  ;;  %v4538_v18 = vrot.slane %v4227_v22, 5  ;;  %v4239_v56 = vshll.u32 %v4227_v22, 16 }
 0x5f0   :  { %v8596_v1 = vld [vmem:[#allocation4 + $0x8] sm:$0xf]  ;;  %v4228_v9 = vld [vmem:[#allocation4 + $0xc] sm:$0x1]  ;;  %v6113_v20 = vrot.slane %v4530_v41, 9 }
 0x5f1   :  { %v4531_v60 = vld [vmem:[#allocation4 + $0x8] sm:$0xe]  ;;  %v4232_v24 = vrot.slane %v4230_v27, 4  ;;  %v4235_v5 = vrot.slane %v4233_v11, 5  ;;  %v4244_v57 = vshrl.u32 %v8596_v1, 16  ;;  %v4247_v28 = vshll.u32 %v8596_v1, 16 }
 0x5f2   :  { %v6114_v15 = vrot.slane %v4531_v60, 9  ;;  %v4542_v53 = vrot.slane %v4228_v9, 5  ;;  %v4253_v17 = vshll.u32 %v4228_v9, 16  ;;  %v8602_v14 = vsel %vm7255_vm15, %v6113_v20, %v4538_v18  ;;  %v6764_v41 = vld [vmem:[%s8943_s9 + $0x174] ss:$8 sps:$4 sm:$0xff]   ;;  %v6769_v60 = vld [vmem:[#allocation11 + $0x50] sm:$0xff]  }
 0x5f3   :  { %v4236_v59 = vor.u32 %v4235_v5, %v4232_v24  ;;  %v4246_v3 = vrot.slane %v4244_v57, 4  ;;  %v4249_v32 = vrot.slane %v4247_v28, 5  ;;  %v4241_v55 = vrot.slane %v4239_v56, 5  ;;  %v6762_v22 = vld [vmem:[%s8943_s9 + $0x170] ss:$8 sps:$4 sm:$0xff]   ;;  %v6770_v24 = vld [vmem:[#allocation11 + $0x10] sm:$0xff]  }
 0x5f4   :  { %v8606_v61 = vsel %vm7255_vm15, %v6114_v15, %v4542_v53  ;;  %v4255_v23 = vrot.slane %v4253_v17, 5  ;;  %v6096_v2 = vcombine.low %v8592_v16, %v8596_v1  ;;  %v6759_v16 = vld [vmem:[%s8943_s9 + $0x160] ss:$8 sps:$4 sm:$0xff]   ;;  %v6765_v27 = vld [vmem:[#allocation11 + $0x40] sm:$0xff]   ;;  %v6767_v1 = vld [vmem:[#allocation11 + $0x48] sm:$0xff]  }
 0x5f5   :  { %v4237_v26 = vrot.slane %v4236_v59, 4  ;;  %v4250_v40 = vor.u32 %v4249_v32, %v4246_v3  ;;  %v6131_v31 = vcombine.low %v8602_v14, %v8606_v61  ;;  %v6766_v11 = vld [vmem:[#allocation11] sm:$0xff]   ;;  %6325 = vmatprep.subr.bf16.mxu1 %v6765_v27  ;;  %v6768_v9 = vld [vmem:[#allocation11 + $0x8] sm:$0xff]   ;;  %v6771_v5 = vld [vmem:[#allocation11 + $0x58] sm:$0xff]  }
 0x5f6   :  { %6326 = vmatpush3.bf16.msra.mxu1 %v6766_v11  ;;  %v6772_v57 = vld [vmem:[#allocation11 + $0x18] sm:$0xff]   ;;  %v6773_v20 = vld [vmem:[#allocation11 + $0x60] sm:$0xff]   ;;  %v6775_v18 = vld [vmem:[#allocation11 + $0x68] sm:$0xff]  }
 0x5f7   :  { %v4251_v4 = vrot.slane %v4250_v40, 4  ;;  %v4242_v48 = vsel %vm7218_vm14, %v4237_v26, %v4241_v55  ;;  %6327 = vmatprep.subr.bf16.mxu1 %v6767_v1  ;;  %v6774_v28 = vld [vmem:[#allocation11 + $0x20] sm:$0xff]   ;;  %v6776_v59 = vld [vmem:[#allocation11 + $0x28] sm:$0xff]   ;;  %v6777_v3 = vld [vmem:[#allocation11 + $0x70] sm:$0xff]  }
 0x5f8   :  { %v6778_v15 = vld [vmem:[#allocation11 + $0x30] sm:$0xff]   ;;  %v6779_v53 = vld [vmem:[#allocation11 + $0x78] sm:$0xff]   ;;  %v6781_v32 = vld [vmem:[#allocation11 + $0xc0] sm:$0xff]  }
 0x5f9   :  { %v4256_v7 = vsel %vm7218_vm14, %v4251_v4, %v4255_v23  ;;  %v6780_v56 = vld [vmem:[#allocation11 + $0x38] sm:$0xff]   ;;  %v4692_v17 = vld [vmem:[%s8944_s10] sm:$0x3] }
 0x5fa   :  { %v6079_v49 = vcombine.low %v4242_v48, %v4256_v7  ;;  %6328 = vmatpush3.bf16.msra.mxu1 %v6768_v9  ;;  %v4708_v14 = vld [vmem:[%s8945_s11] sm:$0x3]  ;;  %v4697_v61 = vrot.slane %v4692_v17, %v9108_v37  ;;  %v4701_v26 = vrot.slane %v4692_v17, %v9109_v12 }
 0x5fb   :  { %6329 = vmatprep.subr.bf16.mxu1 %v6769_v60  ;;  %v4713_v40 = vrot.slane %v4708_v14, %v9108_v37  ;;  %v4717_v55 = vrot.slane %v4708_v14, %v9109_v12 }
 0x5fc   :  { %4391 = vmatmul.mubr.bf16.vlgmr.msra.gmra.mrb[24].mxu0 %v6079_v49 }
 0x5fd   :  { %4488 = vmatpush1.bf16.msra.mxu0 %v6716_v47  ;;  %4519 = vmatprep.mubr.bf16.mxu0 %v9098_v13 }
 0x5fe   :  { %4489 = vmatprep.subr.bf16.mxu0 %v6721_v54  ;;  %6330 = vmatpush3.bf16.msra.mxu1 %v6770_v24 }
 0x5ff   :  { %6331 = vmatprep.subr.bf16.mxu1 %v6771_v5 }
 0x601   :  { %4490 = vmatpush1.bf16.msra.mxu0 %v6719_v29 }
 0x602   :  { %4491 = vmatprep.subr.bf16.mxu0 %v6724_v38  ;;  %6332 = vmatpush3.bf16.msra.mxu1 %v6772_v57 }
 0x603   :  { %6333 = vmatprep.subr.bf16.mxu1 %v6773_v20 }
 0x605   :  { %4492 = vmatpush1.bf16.msra.mxu0 %v6722_v58 }
 0x606   :  { %4493 = vmatprep.subr.bf16.mxu0 %v6727_v46  ;;  %6334 = vmatpush3.bf16.msra.mxu1 %v6774_v28 }
 0x607   :  { %6335 = vmatprep.subr.bf16.mxu1 %v6775_v18 }
 0x609   :  { %4494 = vmatpush1.bf16.msra.mxu0 %v6725_v25 }
 0x60a   :  { %4495 = vmatprep.subr.bf16.mxu0 %v6730_v36  ;;  %6336 = vmatpush3.bf16.msra.mxu1 %v6776_v59 }
 0x60b   :  { %6337 = vmatprep.subr.bf16.mxu1 %v6777_v3 }
 0x60d   :  { %4496 = vmatpush1.bf16.msra.mxu0 %v6728_v51 }
 0x60e   :  { %4497 = vmatprep.subr.bf16.mxu0 %v6733_v42  ;;  %6338 = vmatpush3.bf16.msra.mxu1 %v6778_v15 }
 0x60f   :  { %6339 = vmatprep.subr.bf16.mxu1 %v6779_v53 }
 0x611   :  { %4498 = vmatpush1.bf16.msra.mxu0 %v6731_v39 }
 0x612   :  { %4499 = vmatprep.subr.bf16.mxu0 %v6736_v33  ;;  %6340 = vmatpush3.bf16.msra.mxu1 %v6780_v56 }
 0x613   :  { %6347 = vmatprep.subr.bf16.mxu1 %v6781_v32 }
 0x615   :  { %4500 = vmatpush1.bf16.msra.mxu0 %v6734_v10 }
 0x616   :  { %4501 = vmatprep.subr.bf16.mxu0 %v6739_v35 }
 0x619   :  { %4502 = vmatpush1.bf16.msra.mxu0 %v6737_v34 }
 0x61a   :  { %4645 = vmatprep.subr.bf16.mxu0 %v6743_v8 }
 0x61c   :  { %4520 = vmatmul.mubr.bf16.vlgmr.msra.gmra.mrb[24].mxu0 %v6096_v2 }
 0x61d   :  { %4646 = vmatpush1.bf16.msra.mxu0 %v6741_v50  ;;  %4677 = vmatprep.mubr.bf16.mxu0 %v9098_v13  ;;  %v6750_v13 = vld [vmem:[%s8943_s9 + $0x130] ss:$8 sps:$4 sm:$0xff]  }
 0x61e   :  { %4647 = vmatprep.subr.bf16.mxu0 %v6746_v45 }
 0x621   :  { %4648 = vmatpush1.bf16.msra.mxu0 %v6744_v44 }
 0x622   :  { %4649 = vmatprep.subr.bf16.mxu0 %v6749_v62 }
 0x625   :  { %4650 = vmatpush1.bf16.msra.mxu0 %v6747_v52 }
 0x626   :  { %4651 = vmatprep.subr.bf16.mxu0 %v6752_v6 }
 0x629   :  { %4652 = vmatpush1.bf16.msra.mxu0 %v6750_v13 }
 0x62a   :  { %4653 = vmatprep.subr.bf16.mxu0 %v6755_v0 }
 0x62d   :  { %4654 = vmatpush1.bf16.msra.mxu0 %v6753_v21 }
 0x62e   :  { %4655 = vmatprep.subr.bf16.mxu0 %v6758_v19 }
 0x631   :  { %4656 = vmatpush1.bf16.msra.mxu0 %v6756_v30 }
 0x632   :  { %4657 = vmatprep.subr.bf16.mxu0 %v6761_v63 }
 0x635   :  { %4658 = vmatpush1.bf16.msra.mxu0 %v6759_v16 }
 0x636   :  { %4659 = vmatprep.subr.bf16.mxu0 %v6764_v41 }
 0x639   :  { %4660 = vmatpush1.bf16.msra.mxu0 %v6762_v22 }
 0x63c   :  { %4678 = vmatmul.mubr.bf16.vlgmr.msra.gmra.mrb[24].mxu0 %v6131_v31 }
 0x70f   :  { %v4679_v31 = vpop.f32.mrb[24].mxu0 }
 0x710   :  { %v4704_v4 = vmul.f32 %v4697_v61, %v4679_v31  ;;  %v4681_v23 = vpop.f32.mrb[25].mxu0 }
 0x711   :  { %v4705_v47 = vmul.f32 %v4701_v26, %v4681_v23  ;;  %v4683_v48 = vpop.f32.mrb[26].mxu0 }
 0x712   :  { %v4720_v7 = vadd.f32 %v4713_v40, %v4704_v4  ;;  %v4706_v49 = vmul.f32 %v4697_v61, %v4683_v48  ;;  %v4685_v54 = vpop.f32.mrb[27].mxu0 }
 0x713   :  { %v4721_v29 = vadd.f32 %v4717_v55, %v4705_v47  ;;  %v4707_v38 = vmul.f32 %v4701_v26, %v4685_v54 }
 0x714   :  { %v4724_v58 = vmax.f32 %v4720_v7, 0.0  ;;  %v4722_v46 = vadd.f32 %v4713_v40, %v4706_v49 }
 0x715   :  { %v4725_v25 = vmax.f32 %v4721_v29, 0.0  ;;  %v4723_v36 = vadd.f32 %v4717_v55, %v4707_v38 }
 0x716   :  { %v4726_v51 = vmax.f32 %v4722_v46, 0.0 }
 0x717   :  { %v4732_v42 = vcombine.low %v4724_v58, %v4725_v25  ;;  %v4733_v39 = vcombine.high %v4724_v58, %v4725_v25  ;;  %v4727_v37 = vmax.f32 %v4723_v36, 0.0 }
 0x719   :  { %v4740_v33 = vrot.slane %v4732_v42, %v9110_v43  ;;  %v4747_v12 = vrot.slane %v4733_v39, %v9110_v43  ;;  %v4750_v10 = vcombine.low %v4726_v51, %v4727_v37  ;;  %v4751_v35 = vcombine.high %v4726_v51, %v4727_v37 }
 0x71b   :  { %v4748_v34 = vcombine.high %v4740_v33, %v4740_v33  ;;  %v4749_v8 = vcombine.high %v4747_v12, %v4747_v12  ;;  %v4774_v50 = vrot.slane %v4740_v33, %v9110_v43  ;;  %v4790_v2 = vrot.slane %v4747_v12, %v9110_v43 }
 0x71c   :  { %v8729_v45 = vrot.slane %v4750_v10, %v9110_v43  ;;  %v8732_v44 = vrot.slane %v4751_v35, %v9110_v43 }
 0x71d   :  { %v4775_v62 = vcombine.high %v4774_v50, %v4774_v50  ;;  %v4782_v52 = vrot.slane %v4748_v34, %v9110_v43  ;;  %v4791_v6 = vcombine.high %v4790_v2, %v4790_v2  ;;  %v4798_v13 = vrot.slane %v4749_v8, %v9110_v43 }
 0x71e   :  { %v4848_v0 = vsel %vm1463_vm0, %v4774_v50, -inf  ;;  %v4876_v21 = vsel %vm1463_vm0, %v4790_v2, -inf  ;;  %v4766_v19 = vcombine.high %v8729_v45, %v8729_v45  ;;  %v4767_v30 = vcombine.high %v8732_v44, %v8732_v44 }
 0x71f   :  { %v4783_v63 = vcombine.high %v4782_v52, %v4782_v52  ;;  %v4799_v16 = vcombine.high %v4798_v13, %v4798_v13  ;;  %v4849_v41 = vrot.slane %v4848_v0, 4  ;;  %v4855_v22 = vsel %vm1463_vm0, %v4775_v62, -inf }
 0x720   :  { %v4856_v27 = vrot.slane %v4855_v22, 4  ;;  %v4862_v11 = vsel %vm1463_vm0, %v4782_v52, -inf  ;;  %v4877_v1 = vrot.slane %v4876_v21, 4  ;;  %v4883_v9 = vsel %vm1463_vm0, %v4791_v6, -inf }
 0x721   :  { %v4850_v60 = vmax.f32 %v4848_v0, %v4849_v41  ;;  %v4863_v24 = vrot.slane %v4862_v11, 4  ;;  %v4869_v5 = vsel %vm1463_vm0, %v4783_v63, -inf  ;;  %v4884_v57 = vrot.slane %v4883_v9, 4 }
 0x722   :  { %v4857_v20 = vmax.f32 %v4855_v22, %v4856_v27  ;;  %v4870_v28 = vrot.slane %v4869_v5, 4  ;;  %v4878_v18 = vmax.f32 %v4876_v21, %v4877_v1  ;;  %v4890_v59 = vsel %vm1463_vm0, %v4798_v13, -inf }
 0x723   :  { %v4851_v3 = vrot.slane %v4850_v60, 2  ;;  %v4864_v15 = vmax.f32 %v4862_v11, %v4863_v24  ;;  %v4885_v53 = vmax.f32 %v4883_v9, %v4884_v57  ;;  %v4891_v56 = vrot.slane %v4890_v59, 4 }
 0x724   :  { %v4858_v32 = vrot.slane %v4857_v20, 2  ;;  %v4871_v17 = vmax.f32 %v4869_v5, %v4870_v28  ;;  %v4879_v14 = vrot.slane %v4878_v18, 2  ;;  %v4897_v61 = vsel %vm1463_vm0, %v4799_v16, -inf }
 0x725   :  { %v4852_v26 = vmax.f32 %v4850_v60, %v4851_v3  ;;  %v4865_v40 = vrot.slane %v4864_v15, 2  ;;  %v4886_v31 = vrot.slane %v4885_v53, 2  ;;  %v4892_v55 = vmax.f32 %v4890_v59, %v4891_v56 }
 0x726   :  { %v4859_v4 = vmax.f32 %v4857_v20, %v4858_v32  ;;  %v4872_v23 = vrot.slane %v4871_v17, 2  ;;  %v4880_v47 = vmax.f32 %v4878_v18, %v4879_v14  ;;  %v4898_v48 = vrot.slane %v4897_v61, 4 }
 0x727   :  { %v4853_v7 = vrot.slane %v4852_v26, 1  ;;  %v4866_v49 = vmax.f32 %v4864_v15, %v4865_v40  ;;  %v4887_v54 = vmax.f32 %v4885_v53, %v4886_v31  ;;  %v4893_v29 = vrot.slane %v4892_v55, 2 }
 0x728   :  { %v4860_v38 = vrot.slane %v4859_v4, 1  ;;  %v4873_v58 = vmax.f32 %v4871_v17, %v4872_v23  ;;  %v4881_v46 = vrot.slane %v4880_v47, 1  ;;  %v4899_v25 = vmax.f32 %v4897_v61, %v4898_v48 }
 0x729   :  { %v4854_v36 = vmax.f32 %v4852_v26, %v4853_v7  ;;  %v4867_v51 = vrot.slane %v4866_v49, 1  ;;  %v4888_v42 = vrot.slane %v4887_v54, 1  ;;  %v4894_v39 = vmax.f32 %v4892_v55, %v4893_v29 }
 0x72a   :  { %v4861_v37 = vmax.f32 %v4859_v4, %v4860_v38  ;;  %v4874_v33 = vrot.slane %v4873_v58, 1  ;;  %v4882_v12 = vmax.f32 %v4880_v47, %v4881_v46  ;;  %v4900_v10 = vrot.slane %v4899_v25, 2 }
 0x72b   :  { %v4868_v35 = vmax.f32 %v4866_v49, %v4867_v51  ;;  %v8748_v34 = vmax.f32 %v4887_v54, %v4888_v42  ;;  %v4895_v8 = vrot.slane %v4894_v39, 1  ;;  %v4960_v50 = vpack.c.bf16 %v4854_v36, %v4854_v36 }
 0x72c   :  { %v4875_v2 = vmax.f32 %v4873_v58, %v4874_v33  ;;  %v4901_v62 = vmax.f32 %v4899_v25, %v4900_v10  ;;  %v4961_v52 = vpack.c.bf16 %v4861_v37, %v4861_v37  ;;  %v4964_v6 = vpack.c.bf16 %v4882_v12, %v4882_v12 }
 0x72d   :  { %v8750_v13 = vmax.f32 %v4894_v39, %v4895_v8  ;;  %v4962_v0 = vpack.c.bf16 %v4868_v35, %v4868_v35  ;;  %v4965_v16 = vpack.c.bf16 %v8748_v34, %v8748_v34  ;;  %v5024_v41 = vunpack.c.l.b16 %v4960_v50 }
 0x72e   :  { %v4902_v21 = vrot.slane %v4901_v62, 1  ;;  %v4963_v63 = vpack.c.bf16 %v4875_v2, %v4875_v2  ;;  %v8754_v22 = vunpack.c.l.b16 %v4961_v52  ;;  %v5028_v11 = vunpack.c.l.b16 %v4964_v6 }
 0x72f   :  { %v5026_v27 = vunpack.c.l.b16 %v4962_v0  ;;  %v4806_v1 = vrot.slane %v8729_v45, %v9110_v43  ;;  %v4966_v9 = vpack.c.bf16 %v8750_v13, %v8750_v13  ;;  %v4814_v60 = vrot.slane %v4766_v19, %v9110_v43 }
 0x730   :  { %v4822_v24 = vrot.slane %v8732_v44, %v9110_v43  ;;  %v4830_v5 = vrot.slane %v4767_v30, %v9110_v43  ;;  %v8770_v57 = vunpack.c.l.b16 %v4963_v63  ;;  %v4903_v54 = vmax.f32 %v4901_v62, %v4902_v21 }
 0x731   :  { %v5040_v20 = vsel %vm2136_vm2, %v5026_v27, %v5024_v41  ;;  %v4807_v28 = vcombine.high %v4806_v1, %v4806_v1  ;;  %v4904_v18 = vsel %vm1463_vm0, %v4806_v1, -inf  ;;  %v4815_v45 = vcombine.high %v4814_v60, %v4814_v60 }
 0x732   :  { %v8775_v59 = vsel %vm2138_vm4, %v5028_v11, %v5040_v20  ;;  %v4823_v19 = vcombine.high %v4822_v24, %v4822_v24  ;;  %v4831_v3 = vcombine.high %v4830_v5, %v4830_v5  ;;  %v4905_v15 = vrot.slane %v4904_v18, 4 }
 0x733   :  { %v4911_v53 = vsel %vm1463_vm0, %v4807_v28, -inf  ;;  %v4918_v56 = vsel %vm1463_vm0, %v4814_v60, -inf  ;;  %v4932_v44 = vsel %vm1463_vm0, %v4822_v24, -inf  ;;  %v4925_v17 = vsel %vm1463_vm0, %v4815_v45, -inf }
 0x734   :  { %v4912_v30 = vrot.slane %v4911_v53, 4  ;;  %v4919_v32 = vrot.slane %v4918_v56, 4  ;;  %v4933_v14 = vrot.slane %v4932_v44, 4  ;;  %v4906_v61 = vmax.f32 %v4904_v18, %v4905_v15 }
 0x735   :  { %v4926_v26 = vrot.slane %v4925_v17, 4  ;;  %v4939_v40 = vsel %vm1463_vm0, %v4823_v19, -inf  ;;  %v4946_v31 = vsel %vm1463_vm0, %v4830_v5, -inf  ;;  %v4953_v42 = vsel %vm1463_vm0, %v4831_v3, -inf }
 0x736   :  { %v4913_v55 = vmax.f32 %v4911_v53, %v4912_v30  ;;  %v4920_v4 = vmax.f32 %v4918_v56, %v4919_v32  ;;  %v4934_v23 = vmax.f32 %v4932_v44, %v4933_v14  ;;  %v4940_v47 = vrot.slane %v4939_v40, 4 }
 0x737   :  { %v4907_v48 = vrot.slane %v4906_v61, 2  ;;  %v4927_v7 = vmax.f32 %v4925_v17, %v4926_v26  ;;  %v4947_v49 = vrot.slane %v4946_v31, 4  ;;  %v4954_v50 = vrot.slane %v4953_v42, 4 }
 0x738   :  { %v4914_v29 = vrot.slane %v4913_v55, 2  ;;  %v4921_v38 = vrot.slane %v4920_v4, 2  ;;  %v4935_v58 = vrot.slane %v4934_v23, 2  ;;  %v4941_v46 = vmax.f32 %v4939_v40, %v4940_v47 }
 0x739   :  { %v4908_v25 = vmax.f32 %v4906_v61, %v4907_v48  ;;  %v4928_v36 = vrot.slane %v4927_v7, 2  ;;  %v4948_v51 = vmax.f32 %v4946_v31, %v4947_v49  ;;  %v4955_v41 = vmax.f32 %v4953_v42, %v4954_v50  ;;  %v6790_v50 = vld [vmem:[#allocation11 + $0xa0] sm:$0xff]  }
 0x73a   :  { %v4915_v39 = vmax.f32 %v4913_v55, %v4914_v29  ;;  %v4922_v37 = vmax.f32 %v4920_v4, %v4921_v38  ;;  %v4936_v33 = vmax.f32 %v4934_v23, %v4935_v58  ;;  %v4942_v12 = vrot.slane %v4941_v46, 2 }
 0x73b   :  { %v4909_v10 = vrot.slane %v4908_v25, 1  ;;  %v4949_v35 = vrot.slane %v4948_v51, 2  ;;  %v4929_v8 = vmax.f32 %v4927_v7, %v4928_v36  ;;  %v4956_v28 = vrot.slane %v4955_v41, 2 }
 0x73c   :  { %v4916_v2 = vrot.slane %v4915_v39, 1  ;;  %v4923_v52 = vrot.slane %v4922_v37, 1  ;;  %v4937_v62 = vrot.slane %v4936_v33, 1  ;;  %v4943_v6 = vmax.f32 %v4941_v46, %v4942_v12  ;;  %v6786_v12 = vld [vmem:[#allocation11 + $0x90] sm:$0xff]  }
 0x73d   :  { %v4910_v0 = vmax.f32 %v4908_v25, %v4909_v10  ;;  %v4950_v21 = vmax.f32 %v4948_v51, %v4949_v35  ;;  %v4930_v63 = vrot.slane %v4929_v8, 1  ;;  %v4967_v3 = vpack.c.bf16 %v4903_v54, %v4903_v54  ;;  %v6782_v51 = vld [vmem:[#allocation11 + $0x80] sm:$0xff]   ;;  %v6787_v10 = vld [vmem:[#allocation11 + $0xd8] sm:$0xff]  }
 0x73e   :  { %v4924_v27 = vmax.f32 %v4922_v37, %v4923_v52  ;;  %v4938_v11 = vmax.f32 %v4936_v33, %v4937_v62  ;;  %v4917_v1 = vmax.f32 %v4915_v39, %v4916_v2  ;;  %v4944_v60 = vrot.slane %v4943_v6, 1  ;;  %v6783_v39 = vld [vmem:[#allocation11 + $0xc8] sm:$0xff]   ;;  %v6785_v33 = vld [vmem:[#allocation11 + $0xd0] sm:$0xff]   ;;  %v6788_v35 = vld [vmem:[#allocation11 + $0x98] sm:$0xff]  }
 0x73f   :  { %v4951_v24 = vrot.slane %v4950_v21, 1  ;;  %v4968_v5 = vpack.c.bf16 %v4910_v0, %v4910_v0  ;;  %v4931_v20 = vmax.f32 %v4929_v8, %v4930_v63  ;;  %v5029_v15 = vunpack.c.l.b16 %v4965_v16  ;;  %v6784_v37 = vld [vmem:[#allocation11 + $0x88] sm:$0xff]   ;;  %v6789_v8 = vld [vmem:[#allocation11 + $0xe0] sm:$0xff]   ;;  %v6793_v62 = vld [vmem:[#allocation11 + $0xf0] sm:$0xff]  }
 0x740   :  { %v4970_v18 = vpack.c.bf16 %v4924_v27, %v4924_v27  ;;  %v4972_v45 = vpack.c.bf16 %v4938_v11, %v4938_v11  ;;  %v4945_v19 = vmax.f32 %v4943_v6, %v4944_v60  ;;  %v4957_v53 = vmax.f32 %v4955_v41, %v4956_v28  ;;  %v6791_v2 = vld [vmem:[#allocation11 + $0xe8] sm:$0xff]   ;;  %v6794_v6 = vld [vmem:[#allocation11 + $0xb0] sm:$0xff]   ;;  %v6795_v0 = vld [vmem:[#allocation11 + $0xf8] sm:$0xff]  }
 0x741   :  { %v4969_v56 = vpack.c.bf16 %v4917_v1, %v4917_v1  ;;  %v4971_v44 = vpack.c.bf16 %v4931_v20, %v4931_v20  ;;  %v5030_v30 = vunpack.c.l.b16 %v4966_v9  ;;  %v5032_v32 = vunpack.c.l.b16 %v4968_v5  ;;  %v6792_v52 = vld [vmem:[#allocation11 + $0xa8] sm:$0xff]   ;;  %v6797_v63 = vld [vmem:[%s8947_s13 + $0x40] sm:$0xff]   ;;  %v6801_v1 = vld [vmem:[%s8947_s13 + $0x48] sm:$0xff]  }
 0x742   :  { %v5034_v17 = vunpack.c.l.b16 %v4970_v18  ;;  %v4973_v14 = vpack.c.bf16 %v4945_v19, %v4945_v19  ;;  %v5036_v61 = vunpack.c.l.b16 %v4972_v45  ;;  %v4958_v26 = vrot.slane %v4957_v53, 1  ;;  %v6798_v41 = vld [vmem:[%s8947_s13] sm:$0xff]   ;;  %v6803_v60 = vld [vmem:[%s8947_s13 + $0xc8] sm:$0xff]   ;;  %v6805_v20 = vld [vmem:[%s8947_s13 + $0x50] sm:$0xff]  }
 0x743   :  { %v5031_v40 = vunpack.c.l.b16 %v4967_v3  ;;  %v5047_v31 = vsel %vm2136_vm2, %v8770_v57, %v8754_v22  ;;  %v5033_v55 = vunpack.c.l.b16 %v4969_v56  ;;  %v4952_v16 = vmax.f32 %v4950_v21, %v4951_v24  ;;  %v6796_v21 = vld [vmem:[#allocation11 + $0xb8] sm:$0xff]   ;;  %v6799_v27 = vld [vmem:[%s8947_s13 + $0xc0] sm:$0xff]   ;;  %v6807_v28 = vld [vmem:[%s8947_s13 + $0xd0] sm:$0xff]  }
 0x744   :  { %v5048_v34 = vsel %vm2138_vm4, %v5029_v15, %v5047_v31  ;;  %v5042_v4 = vsel %vm2140_vm5, %v5030_v30, %v8775_v59  ;;  %v4959_v23 = vmax.f32 %v4957_v53, %v4958_v26  ;;  %v5035_v13 = vunpack.c.l.b16 %v4971_v44  ;;  %v6800_v11 = vld [vmem:[%s8947_s13 + $0x80] sm:$0xff]   ;;  %6391 = vmatprep.subr.bf16.mxu0 %v6799_v27  ;;  %v6802_v24 = vld [vmem:[%s8947_s13 + $0x8] sm:$0xff]   ;;  %v6806_v18 = vld [vmem:[%s8947_s13 + $0x10] sm:$0xff]  }
 0x745   :  { %v5049_v9 = vsel %vm2140_vm5, %v5031_v40, %v5048_v34  ;;  %v5043_v47 = vsel %vm2142_vm6, %v5032_v32, %v5042_v4  ;;  %v5037_v48 = vunpack.c.l.b16 %v4973_v14  ;;  %v4974_v49 = vpack.c.bf16 %v4952_v16, %v4952_v16  ;;  %6392 = vmatpush3.bf16.msra.mxu0 %v6800_v11  ;;  %v6804_v5 = vld [vmem:[%s8947_s13 + $0x88] sm:$0xff]   ;;  %v6808_v45 = vld [vmem:[%s8947_s13 + $0x90] sm:$0xff]   ;;  %v6809_v19 = vld [vmem:[%s8947_s13 + $0x58] sm:$0xff]  }
 0x746   :  { %v5050_v7 = vsel %vm2142_vm6, %v5033_v55, %v5049_v9  ;;  %v5044_v54 = vsel %vm2144_vm8, %v5034_v17, %v5043_v47  ;;  %v4975_v22 = vpack.c.bf16 %v4959_v23, %v4959_v23  ;;  %6393 = vmatprep.subr.bf16.mxu0 %v6803_v60  ;;  %v6811_v3 = vld [vmem:[%s8947_s13 + $0xd8] sm:$0xff]   ;;  %v6813_v56 = vld [vmem:[%s8947_s13 + $0x60] sm:$0xff]   ;;  %v6817_v17 = vld [vmem:[%s8947_s13 + $0x68] sm:$0xff]   ;;  %v6961_v9 = vmov 0.0  }
 0x747   :  { %v5051_v57 = vsel %vm2144_vm8, %v5035_v13, %v5050_v7  ;;  %v5045_v29 = vsel %vm2146_vm9, %v5036_v61, %v5044_v54  ;;  %v5038_v59 = vunpack.c.l.b16 %v4974_v49  ;;  %v6810_v15 = vld [vmem:[%s8947_s13 + $0x18] sm:$0xff]   ;;  %v6814_v44 = vld [vmem:[%s8947_s13 + $0x20] sm:$0xff]   ;;  %v6818_v14 = vld [vmem:[%s8947_s13 + $0x28] sm:$0xff]  }
 0x748   :  { %v5052_v38 = vsel %vm2146_vm9, %v5037_v48, %v5051_v57  ;;  %v5039_v58 = vunpack.c.l.b16 %v4975_v22  ;;  %v6812_v53 = vld [vmem:[%s8947_s13 + $0x98] sm:$0xff]   ;;  %v6815_v30 = vld [vmem:[%s8947_s13 + $0xe0] sm:$0xff]   ;;  %v6819_v61 = vld [vmem:[%s8947_s13 + $0xe8] sm:$0xff]   ;;  %v6962_v22 = vmov 1935823168  }
 0x749   :  { %v5046_v46 = vsel %vm2148_vm10, %v5038_v59, %v5045_v29  ;;  %6394 = vmatpush3.bf16.msra.mxu0 %v6804_v5  ;;  %v6816_v32 = vld [vmem:[%s8947_s13 + $0xa0] sm:$0xff]   ;;  %v6820_v26 = vld [vmem:[%s8947_s13 + $0xa8] sm:$0xff]   ;;  %v6821_v40 = vld [vmem:[%s8947_s13 + $0x70] sm:$0xff]   ;;  %v5365_v57 = vunpack.c.l.s4 %v6962_v22 }
 0x74a   :  { %v5053_v25 = vsel %vm2148_vm10, %v5039_v58, %v5052_v38  ;;  %v5054_v42 = vpack.c.b16 %v5046_v46, %v5046_v46  ;;  %6395 = vmatprep.subr.bf16.mxu0 %v6807_v28  ;;  %v6822_v31 = vld [vmem:[%s8947_s13 + $0x30] sm:$0xff]   ;;  %v6825_v34 = vld [vmem:[%s8947_s13 + $0x78] sm:$0xff]  }
 0x74b   :  { %v5055_v36 = vpack.c.b16 %v5053_v25, %v5053_v25  ;;  %v6823_v55 = vld [vmem:[%s8947_s13 + $0xf0] sm:$0xff]   ;;  %v6827_v4 = vld [vmem:[%s8947_s13 + $0xf8] sm:$0xff]   ;;  %v5366_v29 = vunpack.c.0.s8 %v5365_v57 }
 0x74c   :  { %v6824_v16 = vld [vmem:[%s8947_s13 + $0xb0] sm:$0xff]   ;;  %v6826_v23 = vld [vmem:[%s8947_s13 + $0x38] sm:$0xff]  }
 0x74d   :  { %5186 = vmatprep.mubr.bf16.mxu1 %v5055_v36  ;;  %6396 = vmatpush3.bf16.msra.mxu0 %v6808_v45  ;;  %v6828_v13 = vld [vmem:[%s8947_s13 + $0xb8] sm:$0xff]   ;;  %v9111_v46 = vld [vmem:[#allocation21_spill] sm:$0xff] }
 0x74e   :  { %5187 = vmatmul.mubr.bf16.vlgmr.msra.gmra.mrb[24].mxu1 %v5054_v42  ;;  %6397 = vmatprep.subr.bf16.mxu0 %v6811_v3  ;;  %v5369_v25 = vsub.s32 %v5366_v29, %v9111_v46 }
 0x74f   :  { %6348 = vmatpush3.bf16.msra.mxu1 %v6782_v51  ;;  %5355 = vmatprep.mubr.bf16.mxu1 %v5055_v36 }
 0x750   :  { %6349 = vmatprep.subr.bf16.mxu1 %v6783_v39 }
 0x751   :  { %6398 = vmatpush3.bf16.msra.mxu0 %v6812_v53 }
 0x752   :  { %6399 = vmatprep.subr.bf16.mxu0 %v6815_v30 }
 0x753   :  { %6350 = vmatpush3.bf16.msra.mxu1 %v6784_v37 }
 0x754   :  { %6351 = vmatprep.subr.bf16.mxu1 %v6785_v33 }
 0x755   :  { %6400 = vmatpush3.bf16.msra.mxu0 %v6816_v32 }
 0x756   :  { %6401 = vmatprep.subr.bf16.mxu0 %v6819_v61 }
 0x757   :  { %6352 = vmatpush3.bf16.msra.mxu1 %v6786_v12 }
 0x758   :  { %6353 = vmatprep.subr.bf16.mxu1 %v6787_v10 }
 0x759   :  { %6402 = vmatpush3.bf16.msra.mxu0 %v6820_v26 }
 0x75a   :  { %6403 = vmatprep.subr.bf16.mxu0 %v6823_v55 }
 0x75b   :  { %6354 = vmatpush3.bf16.msra.mxu1 %v6788_v35 }
 0x75c   :  { %6355 = vmatprep.subr.bf16.mxu1 %v6789_v8 }
 0x75d   :  { %6404 = vmatpush3.bf16.msra.mxu0 %v6824_v16 }
 0x75e   :  { %6405 = vmatprep.subr.bf16.mxu0 %v6827_v4 }
 0x75f   :  { %6356 = vmatpush3.bf16.msra.mxu1 %v6790_v50  ;;  %v6829_v50 = vld [vmem:[%s8949_s15] sm:$0xff]  }
 0x760   :  { %6357 = vmatprep.subr.bf16.mxu1 %v6791_v2 }
 0x761   :  { %6406 = vmatpush3.bf16.msra.mxu0 %v6828_v13 }
 0x763   :  { %6358 = vmatpush3.bf16.msra.mxu1 %v6792_v52 }
 0x764   :  { %6359 = vmatprep.subr.bf16.mxu1 %v6793_v62 }
 0x767   :  { %6360 = vmatpush3.bf16.msra.mxu1 %v6794_v6  ;;  %v6830_v6 = vld [vmem:[%s8949_s15 + $0x8] sm:$0xff]  }
 0x768   :  { %6361 = vmatprep.subr.bf16.mxu1 %v6795_v0  ;;  %v6832_v0 = vld [vmem:[%s8949_s15 + $0x18] sm:$0xff]  }
 0x76b   :  { %6362 = vmatpush3.bf16.msra.mxu1 %v6796_v21 }
 0x76c   :  { %6369 = vmatprep.subr.bf16.mxu1 %v6797_v63  ;;  %v6180_v63 = vld [vmem:[%s8948_s14] ss:$0 sm:$0xff]  ;;  %s6964_s14 = smov [#allocation13]  }
 0x76d   :  { %s5832_s20 = sshll.u32 %s6964_s14, 4  ;;  %s5833_s20 = int_to_ptr.vmem [resolvable:$true] %s5832_s20 }
 0x76e   :  { %5356 = vmatmul.mubr.bf16.vlgmr.msra.gmra.mrb[28].mxu1 %v5054_v42  ;;  %s6921_s27 = scalar_lea.vmem %s5833_s20, 32  ;;  %p6926_p5 = scmp.lt.s32.totalorder %s5833_s20, %s5833_s20 }
 0x76f   :  { %6370 = vmatpush3.bf16.msra.mxu1 %v6798_v41  ;;  %p6922_p4 = scmp.ne.s32.totalorder %s5833_s20, %s6921_s27  ;;  %p6927_p6 = scmp.lt.s32.totalorder %s6921_s27, %s6921_s27 }
 0x770   :  { %6371 = vmatprep.subr.bf16.mxu1 %v6801_v1 }
 0x771   :  { %p6928_p7 = por %p6927_p6, %p6926_p5 }
 0x773   :  { %6372 = vmatpush3.bf16.msra.mxu1 %v6802_v24  ;;  %p6929_p8 = pnand %p6928_p7, %p6922_p4 }
 0x774   :  { %6373 = vmatprep.subr.bf16.mxu1 %v6805_v20 }
 0x777   :  { %6374 = vmatpush3.bf16.msra.mxu1 %v6806_v18 }
 0x778   :  { %6375 = vmatprep.subr.bf16.mxu1 %v6809_v19 }
 0x77b   :  { %6376 = vmatpush3.bf16.msra.mxu1 %v6810_v15  ;;  %v6213_v15 = vld [vmem:[%s8950_s16] ss:$0 sm:$0xff] }
 0x77c   :  { %6377 = vmatprep.subr.bf16.mxu1 %v6813_v56 }
 0x77f   :  { %6378 = vmatpush3.bf16.msra.mxu1 %v6814_v44 }
 0x780   :  { %6379 = vmatprep.subr.bf16.mxu1 %v6817_v17 }
 0x783   :  { %6380 = vmatpush3.bf16.msra.mxu1 %v6818_v14 }
 0x784   :  { %6381 = vmatprep.subr.bf16.mxu1 %v6821_v40 }
 0x787   :  { %6382 = vmatpush3.bf16.msra.mxu1 %v6822_v31 }
 0x788   :  { %6383 = vmatprep.subr.bf16.mxu1 %v6825_v34 }
 0x78b   :  { %6384 = vmatpush3.bf16.msra.mxu1 %v6826_v23 }
 0x78c   :  { %6418 = vmatprep.subr.bf16.mxu1 %v6961_v9 }
 0x821   :  { %v6341_v47 = vpop.f32.mrb[24].mxu1 }
 0x822   :  { %v6342_v48 = vpop.f32.mrb[25].mxu1 }
 0x823   :  { %v6343_v7 = vadd.f32 %v6342_v48, %v6341_v47  ;;  %v6344_v49 = vpop.f32.mrb[26].mxu1 }
 0x824   :  { %v6345_v54 = vpop.f32.mrb[27].mxu1 }
 0x841   :  { %v6363_v38 = vpop.f32.mrb[28].mxu1 }
 0x842   :  { %v6364_v59 = vpop.f32.mrb[29].mxu1 }
 0x843   :  { %v6365_v58 = vadd.f32 %v6364_v59, %v6363_v38  ;;  %v6366_v36 = vpop.f32.mrb[30].mxu1 }
 0x844   :  { %v6367_v51 = vpop.f32.mrb[31].mxu1 }
 0x845   :  { %v5363_v42 = vmax.f32 %v6343_v7, %v6365_v58 }
 0x847   :  { %v5370_v39 = vrot.slane %v5363_v42, %v5369_v25 }
 0x849   :  { %v5372_v37 = vcombine.high %v5370_v39, %v5370_v39  ;;  %v5379_v33 = vrot.slane %v5370_v39, %v9110_v43 }
 0x84b   :  { %v5387_v12 = vcombine.high %v5379_v33, %v5379_v33  ;;  %v5386_v10 = vrot.slane %v5372_v37, %v9110_v43  ;;  %v5393_v2 = vpack.c.bf16 %v5379_v33, %v5379_v33  ;;  %v6831_v43 = vld [vmem:[%s8949_s15 + $0x10] sm:$0xff]  }
 0x84d   :  { %v5394_v35 = vpack.c.bf16 %v5387_v12, %v5387_v12  ;;  %v5388_v8 = vcombine.high %v5386_v10, %v5386_v10  ;;  %v5395_v62 = vpack.c.bf16 %v5386_v10, %v5386_v10 }
 0x84f   :  { %5692 = vmatprep.mubr.bf16.mxu1 %v5394_v35  ;;  %v5396_v52 = vpack.c.bf16 %v5388_v8, %v5388_v8 }
 0x850   :  { %5693 = vmatmul.mubr.bf16.vlgmr.msra.gmra.mrb[32].mxu1 %v5393_v2 }
 0x851   :  { %5732 = vmatprep.mubr.bf16.mxu0 %v5396_v52  ;;  %6419 = vmatpush3.bf16.msra.mxu1 %v6829_v50 }
 0x852   :  { %5733 = vmatmul.mubr.bf16.vlgmr.msra.gmra.mrb[28].mxu0 %v5395_v62  ;;  %6420 = vmatprep.subr.bf16.mxu1 %v6961_v9 }
 0x853   :  { %6426 = vmatprep.mubr.msk.bf16.mxu1 %vm6963_vm3, %v6961_v9 }
 0x855   :  { %6421 = vmatpush3.bf16.msra.mxu1 %v6830_v6 }
 0x856   :  { %6422 = vmatprep.subr.bf16.mxu1 %v6961_v9 }
 0x859   :  { %6423 = vmatpush3.bf16.msra.mxu1 %v6831_v43 }
 0x85a   :  { %6424 = vmatprep.subr.bf16.mxu1 %v6961_v9 }
 0x85d   :  { %6425 = vmatpush3.bf16.msra.mxu1 %v6832_v0 }
 0x923   :  { %v6385_v21 = vpop.f32.mrb[32].mxu1 }
 0x924   :  { %v6386_v41 = vpop.f32.mrb[33].mxu1 }
 0x925   :  { %v6387_v27 = vadd.f32 %v6386_v41, %v6385_v21  ;;  %v6388_v11 = vpop.f32.mrb[34].mxu1  ;;  %v6407_v1 = vpop.f32.mrb[28].mxu0 }
 0x926   :  { %v6389_v60 = vpop.f32.mrb[35].mxu1  ;;  %v6408_v24 = vpop.f32.mrb[29].mxu0 }
 0x927   :  { %v5695_v5 = vadd.f32 %v6387_v27, %v6180_v63  ;;  %v6409_v20 = vadd.f32 %v6408_v24, %v6407_v1  ;;  %v6410_v28 = vpop.f32.mrb[30].mxu0 }
 0x928   :  { %v6411_v18 = vpop.f32.mrb[31].mxu0 }
 0x929   :  { %v5735_v45 = vadd.f32 %v6409_v20, %v5695_v5 }
 0x92b   :  { %v5740_v19 = vmax.f32 %v5735_v45, 0.0 }
 0x92d   :  { %v5741_v3 = vpack.c.bf16 %v5740_v19, %v5740_v19 }
 0x92f   :  { %6427 = vmatmul.mubr.msk.bf16.vlgmr.msra.gmra.mrb[36].mxu1 %vm5781_vm7, %v5741_v3 }
 0xa02   :  { %v5819_v53 = vpop.f32.mrb[36].mxu1 }
 0xa03   :  { %v5820_v56 = vadd.f32 %v6213_v15, %v5819_v53  ;;  %v6428_v44 = vpop.f32.mrb[37].mxu1 }
 0xa04   :  { %v5822_v30 = vpop.f32.mrb[38].mxu1 }
 0xa05   :  { %5825 = vst [vmem:[#allocation13] sm:$0x3] %v5820_v56  ;;  %v6429_v32 = vpop.f32.mrb[39].mxu1 }
 0xa06   :  { %6932 = shalt.err (!%p6929_p8)
}
 0xa07   :  { %s9112_s6 = sld [smem:[#allocation49_spill]] }
 0xa0d   :  { %s6933_s16 = scalar_lea.hbm %s9112_s6, 32 }
 0xa0e   :  { %p6934_p9 = scmp.ne.s32.totalorder %s9112_s6, %s6933_s16  ;;  %p6937_p10 = scmp.lt.u32.totalorder %s6933_s16, %s9112_s6 }
 0xa10   :  { %p6939_p11 = pnand %p6937_p10, %p6934_p9 }
 0xa12   :  { %6942 = shalt.err (!%p6939_p11)
}
 0xa13   :  { %5835 = dma.vmem_to_hbm [thread:$0]  %s5833_s20, 32, %s9112_s6, [#allocation7]  }
 0xa14   :  { %6949 = dma.done.wait [#allocation7], 32  }
 0xa15   :  { %6950 = vsyncadd [#allocation7], 4294967264 }
 0xa16   :  { %5839 = vsyncpa [#allocation6], 1 }
 0xa17   :  { %5840 = vsyncpa [#allocation9], 1 }
 0xa18   :  { %5841 = vsyncpa [#allocation12], 1 }
 0xa19   :  { %5842 = vsyncpa [#allocation7], 1 }

</bundles_post_ra>
